<compile_context>
chip_gen: v6e
topology: v6e:2x2x1
jax: 0.10.0
libtpu: 0.0.40
codegen_flags: <defaults>
</compile_context>

<pallas_src>
import math

import numpy as np

import jax
import jax.numpy as jnp
from jax import lax
from jax.experimental import pallas as pl
from jax.experimental.pallas import tpu as pltpu

OUTCLASSES = 10
BATCH = 2
IN_LEN = 99                       # chosen so the flatten is exactly 32 * 35

# per-sample lengths through the network
L0 = IN_LEN                       # 99
L1 = L0 - 5 + 1                   # 95  conv1 (k=5, s=1)
L2F = L1 - 7 + 1                  # 89  conv2 run at stride 1 ...
L2 = (L1 - 7) // 2 + 1            # 45  ... then decimated by 2
L3 = L2 - 5 + 1                   # 41  conv3 (k=5)
L4 = L3 - 7 + 1                   # 35  conv4 (k=7)
FLAT = 32 * L4                    # 1120
HIDDEN = 768

_SELU_ALPHA = 1.6732632423543772
_SELU_SCALE = 1.0507009873554805


# ----------------------------- in-kernel helpers -----------------------------

def _im2col(x, lin, k, lout, nb):
    """x: (Cin, nb*lin) -> patch matrix (k*Cin, nb*lout); rows tap-major then Cin."""
    rows = []
    for t in range(k):
        segs = [x[:, b * lin + t: b * lin + t + lout] for b in range(nb)]
        rows.append(segs[0] if nb == 1 else jnp.concatenate(segs, axis=1))
    return jnp.concatenate(rows, axis=0)


def _conv(x, w_ref, b_ref, lin, k, lout, nb):
    """One im2col matmul: bf16 w (Cout, k*Cin) @ bf16 patches + f32 bias."""
    p = _im2col(x, lin, k, lout, nb).astype(jnp.bfloat16)
    return jnp.dot(w_ref[...], p, preferred_element_type=jnp.float32) + b_ref[...]


def _bn(x, g_ref, b_ref, eps=1e-5):
    """Training-mode BatchNorm1d: biased stats over batch*length (all columns)."""
    n = x.shape[1]
    mean = jnp.sum(x, axis=1, keepdims=True) * (1.0 / n)
    d = x - mean
    var = jnp.sum(d * d, axis=1, keepdims=True) * (1.0 / n)
    return d * lax.rsqrt(var + eps) * g_ref[...] + b_ref[...]


def _qnorm(x, gq_ref, gqt_ref, eps=1e-4):
    """Per-quaternion (4-channel group) L2 normalization via constant group matmuls."""
    ss = jnp.dot(gq_ref[...], x * x, preferred_element_type=jnp.float32)    # (ng, L)
    inv = lax.rsqrt(ss + eps)
    return x * jnp.dot(gqt_ref[...], inv, preferred_element_type=jnp.float32)


def _flatten_cmajor(x, nb, lper):
    """(C, nb*lper) -> (nb, C*lper) in PyTorch .view(-1, C*lper) order (c-major)."""
    c_dim = x.shape[0]
    rows = []
    for b in range(nb):
        hb = x[:, b * lper:(b + 1) * lper]                               # (C, lper)
        rows.append(jnp.concatenate([hb[c:c + 1, :] for c in range(c_dim)], axis=1))
    return rows[0] if nb == 1 else jnp.concatenate(rows, axis=0)         # (nb, C*lper)


# --------------------------------- kernel ------------------------------------

def qcnn_kernel(x_ref,
                w1, b1, g1, be1,
                w2, b2, g2, be2,
                w3, b3, g3, be3,
                w4, b4, g4, be4,
                sel, gq, gqt,
                b5, w6, b6,
                w5_hbm,
                out_ref,
                w5_vmem, w5_sem):
    nb = out_ref.shape[0]

    # Kick off the dominant HBM transfer first; it overlaps the conv stack.
    w5_cp = pltpu.make_async_copy(w5_hbm, w5_vmem, w5_sem)
    w5_cp.start()

    # ---------------- conv / BN / qnorm stack (f32 activations) ----------------
    h = x_ref[...].astype(jnp.float32)                       # (1, nb*99)
    h = _conv(h, w1, b1, L0, 5, L1, nb)                       # (16, nb*95)
    h = _bn(h, g1, be1)
    h = _conv(h, w2, b2, L1, 7, L2F, nb)                      # (32, nb*89) stride-1
    h = jnp.dot(h, sel[...], preferred_element_type=jnp.float32)   # (32, nb*45) stride-2
    h = _bn(h, g2, be2)
    h = _qnorm(h, gq, gqt)
    h = jnp.maximum(_conv(h, w3, b3, L2, 5, L3, nb), 0.0)     # (32, nb*41)
    h = _bn(h, g3, be3)
    h = jnp.maximum(_conv(h, w4, b4, L3, 7, L4, nb), 0.0)     # (32, nb*35)
    h = _bn(h, g4, be4)
    f = _flatten_cmajor(h, nb, L4).astype(jnp.bfloat16)       # (nb, 1120) bf16

    # ---------------- dense5 + SELU + dense6 + softmax -------------------------
    w5_cp.wait()
    hid = jnp.dot(f, w5_vmem[...], preferred_element_type=jnp.float32) + b5[...]
    hid = _SELU_SCALE * jnp.where(
        hid > 0.0, hid, _SELU_ALPHA * (jnp.exp(jnp.minimum(hid, 0.0)) - 1.0))
    logits = jnp.dot(hid, w6[...], preferred_element_type=jnp.float32) + b6[...]
    m = jnp.max(logits, axis=-1, keepdims=True)
    e = jnp.exp(logits - m)
    out_ref[...] = e / jnp.sum(e, axis=-1, keepdims=True)


# ------------------------- wrapper-side constants -----------------------------

def _decimate_sel(nb):
    """0/1 matrix (nb*L2F, nb*L2) keeping every 2nd stride-1 conv2 output column."""
    sel = np.zeros((nb * L2F, nb * L2), np.float32)
    for b in range(nb):
        for j in range(L2):
            sel[b * L2F + 2 * j, b * L2 + j] = 1.0
    return jnp.asarray(sel)


def _qnorm_mats(c):
    """Group-sum matrix (ng, C) and its transpose for 4-channel quaternion groups."""
    ng = c // 4
    g = np.zeros((ng, c), np.float32)
    for k in range(ng):
        g[k, 4 * k:4 * k + 4] = 1.0
    return jnp.asarray(g), jnp.asarray(g.T)


# -------------------------------- wrapper -------------------------------------

def qcnn_forward(x, params):
    b = x.shape[0]
    # batch-contiguous lane layout: (B, 1, L) -> (1, B*L)
    x2 = x.reshape(1, b * IN_LEN)

    small = params[:16]            # conv weights/biases + BN gamma/beta
    w5, b5, w6, b6 = params[16:]

    sel = _decimate_sel(b)
    gq, gqt = _qnorm_mats(32)

    vmem = pl.BlockSpec(memory_space=pltpu.MemorySpace.VMEM)
    in_specs = [vmem] * 23 + [pl.BlockSpec(memory_space=pl.ANY)]   # w5 stays in HBM

    return pl.pallas_call(
        qcnn_kernel,
        out_shape=jax.ShapeDtypeStruct((b, OUTCLASSES), jnp.float32),
        in_specs=in_specs,
        out_specs=vmem,
        scratch_shapes=[
            pltpu.VMEM((FLAT, HIDDEN), jnp.bfloat16),   # w5 staging buffer
            pltpu.SemaphoreType.DMA,                    # its completion semaphore
        ],
    )(x2, *small, sel, gq, gqt, b5, w6, b6, w5)


# ------------------------------ parameters ------------------------------------

def init_params(key):
    ks = jax.random.split(key, 8)

    def conv_w(k, cout, cin, ksz):
        # layout (Cout, K*Cin) with column = tap*Cin + cin  (matches im2col rows;
        # from PyTorch (Cout, Cin, K): w[:, ci, t] -> col t*Cin + ci), stored bf16.
        fan = cin * ksz
        w = jax.random.normal(k, (cout, ksz * cin), jnp.float32) / math.sqrt(fan)
        return w.astype(jnp.bfloat16)

    def bn(c):
        return jnp.ones((c, 1), jnp.float32), jnp.zeros((c, 1), jnp.float32)

    w1 = conv_w(ks[0], 16, 1, 5)
    b1 = jnp.zeros((16, 1), jnp.float32)
    g1, be1 = bn(16)

    w2 = conv_w(ks[1], 32, 16, 7)
    b2 = jnp.zeros((32, 1), jnp.float32)
    g2, be2 = bn(32)

    w3 = conv_w(ks[2], 32, 32, 5)
    b3 = jnp.zeros((32, 1), jnp.float32)
    g3, be3 = bn(32)

    w4 = conv_w(ks[3], 32, 32, 7)
    b4 = jnp.zeros((32, 1), jnp.float32)
    g4, be4 = bn(32)

    # dense5: PyTorch weight (768, 1120); stored transposed (1120, 768), rows in
    # c*35 + l (flatten) order, bf16 to halve the dominant HBM transfer.
    w5 = (jax.random.normal(ks[4], (FLAT, HIDDEN), jnp.float32)
          / math.sqrt(FLAT)).astype(jnp.bfloat16)
    b5 = jnp.zeros((1, HIDDEN), jnp.float32)

    w6 = jax.random.normal(ks[5], (HIDDEN, OUTCLASSES), jnp.float32) / math.sqrt(HIDDEN)
    b6 = jnp.zeros((1, OUTCLASSES), jnp.float32)

    return (w1, b1, g1, be1,
            w2, b2, g2, be2,
            w3, b3, g3, be3,
            w4, b4, g4, be4,
            w5, b5, w6, b6)


if __name__ == "__main__":
    key = jax.random.PRNGKey(0)
    pkey, xkey = jax.random.split(key)
    params = init_params(pkey)
    x = jax.random.normal(xkey, (BATCH, 1, IN_LEN), jnp.float32)

    out = jax.jit(qcnn_forward)(x, params)
    out = jax.block_until_ready(out)

    assert out.shape == (BATCH, OUTCLASSES), out.shape
    assert bool(jnp.all(jnp.isfinite(out)))
    assert bool(jnp.all(jnp.abs(jnp.sum(out, axis=1) - 1.0) < 1e-3))  # softmax rows
    print("KERNEL_OK")
</pallas_src>

<mosaic_0001>
module attributes {stable_mosaic.version = 11 : i64} {
  func.func @qcnn_kernel(%arg0: memref<1x198xf32, #tpu.memory_space<vmem>>, %arg1: memref<16x5xbf16, #tpu.memory_space<vmem>>, %arg2: memref<16x1xf32, #tpu.memory_space<vmem>>, %arg3: memref<16x1xf32, #tpu.memory_space<vmem>>, %arg4: memref<16x1xf32, #tpu.memory_space<vmem>>, %arg5: memref<32x112xbf16, #tpu.memory_space<vmem>>, %arg6: memref<32x1xf32, #tpu.memory_space<vmem>>, %arg7: memref<32x1xf32, #tpu.memory_space<vmem>>, %arg8: memref<32x1xf32, #tpu.memory_space<vmem>>, %arg9: memref<32x160xbf16, #tpu.memory_space<vmem>>, %arg10: memref<32x1xf32, #tpu.memory_space<vmem>>, %arg11: memref<32x1xf32, #tpu.memory_space<vmem>>, %arg12: memref<32x1xf32, #tpu.memory_space<vmem>>, %arg13: memref<32x224xbf16, #tpu.memory_space<vmem>>, %arg14: memref<32x1xf32, #tpu.memory_space<vmem>>, %arg15: memref<32x1xf32, #tpu.memory_space<vmem>>, %arg16: memref<32x1xf32, #tpu.memory_space<vmem>>, %arg17: memref<178x90xf32, #tpu.memory_space<vmem>>, %arg18: memref<8x32xf32, #tpu.memory_space<vmem>>, %arg19: memref<32x8xf32, #tpu.memory_space<vmem>>, %arg20: memref<1x768xf32, #tpu.memory_space<vmem>>, %arg21: memref<768x10xf32, #tpu.memory_space<vmem>>, %arg22: memref<1x10xf32, #tpu.memory_space<vmem>>, %arg23: memref<1120x768xbf16, #tpu.memory_space<any>>, %arg24: memref<2x10xf32, #tpu.memory_space<vmem>>, %arg25: memref<1120x768xbf16, #tpu.memory_space<vmem>>, %arg26: memref<!tpu.dma_semaphore, #tpu.memory_space<semaphore_mem>>) attributes {dimension_semantics = [], scalar_prefetch = 0 : i64, scratch_operands = 2 : i64, tpu.core_type = #tpu.core_type<tc>} {
    tpu.enqueue_dma source(%arg23 : memref<1120x768xbf16, #tpu.memory_space<any>>) target(%arg25 : memref<1120x768xbf16, #tpu.memory_space<vmem>>) target_semaphore(%arg26 : memref<!tpu.dma_semaphore, #tpu.memory_space<semaphore_mem>>)
    %c0 = arith.constant 0 : index
    %c0_0 = arith.constant 0 : index
    %0 = vector.load %arg0[%c0, %c0_0] : memref<1x198xf32, #tpu.memory_space<vmem>>, vector<1x198xf32>
    %1 = vector.extract_strided_slice %0 {offsets = [0, 0], sizes = [1, 95], strides = [1, 1]} : vector<1x198xf32> to vector<1x95xf32>
    %2 = vector.extract_strided_slice %0 {offsets = [0, 99], sizes = [1, 95], strides = [1, 1]} : vector<1x198xf32> to vector<1x95xf32>
    %3 = tpu.concatenate %1, %2 in 1 : vector<1x95xf32>, vector<1x95xf32> -> vector<1x190xf32>
    %4 = vector.extract_strided_slice %0 {offsets = [0, 1], sizes = [1, 95], strides = [1, 1]} : vector<1x198xf32> to vector<1x95xf32>
    %5 = vector.extract_strided_slice %0 {offsets = [0, 100], sizes = [1, 95], strides = [1, 1]} : vector<1x198xf32> to vector<1x95xf32>
    %6 = tpu.concatenate %4, %5 in 1 : vector<1x95xf32>, vector<1x95xf32> -> vector<1x190xf32>
    %7 = vector.extract_strided_slice %0 {offsets = [0, 2], sizes = [1, 95], strides = [1, 1]} : vector<1x198xf32> to vector<1x95xf32>
    %8 = vector.extract_strided_slice %0 {offsets = [0, 101], sizes = [1, 95], strides = [1, 1]} : vector<1x198xf32> to vector<1x95xf32>
    %9 = tpu.concatenate %7, %8 in 1 : vector<1x95xf32>, vector<1x95xf32> -> vector<1x190xf32>
    %10 = vector.extract_strided_slice %0 {offsets = [0, 3], sizes = [1, 95], strides = [1, 1]} : vector<1x198xf32> to vector<1x95xf32>
    %11 = vector.extract_strided_slice %0 {offsets = [0, 102], sizes = [1, 95], strides = [1, 1]} : vector<1x198xf32> to vector<1x95xf32>
    %12 = tpu.concatenate %10, %11 in 1 : vector<1x95xf32>, vector<1x95xf32> -> vector<1x190xf32>
    %13 = vector.extract_strided_slice %0 {offsets = [0, 4], sizes = [1, 95], strides = [1, 1]} : vector<1x198xf32> to vector<1x95xf32>
    %14 = vector.extract_strided_slice %0 {offsets = [0, 103], sizes = [1, 95], strides = [1, 1]} : vector<1x198xf32> to vector<1x95xf32>
    %15 = tpu.concatenate %13, %14 in 1 : vector<1x95xf32>, vector<1x95xf32> -> vector<1x190xf32>
    %16 = tpu.concatenate %3, %6, %9, %12, %15 in 0 : vector<1x190xf32>, vector<1x190xf32>, vector<1x190xf32>, vector<1x190xf32>, vector<1x190xf32> -> vector<5x190xf32>
    %17 = arith.truncf %16 : vector<5x190xf32> to vector<5x190xbf16>
    %c0_1 = arith.constant 0 : index
    %c0_2 = arith.constant 0 : index
    %18 = vector.load %arg1[%c0_1, %c0_2] : memref<16x5xbf16, #tpu.memory_space<vmem>>, vector<16x5xbf16>
    %cst = arith.constant dense<0.000000e+00> : vector<16x190xf32>
    %19 = tpu.matmul %18, %17, %cst {dimension_numbers = #tpu.dot_dimension_numbers<[1], [0], [0], [1], [0, 0, 1, 1], [], []>} : vector<16x5xbf16>, vector<5x190xbf16>, vector<16x190xf32> -> vector<16x190xf32>
    %c0_3 = arith.constant 0 : index
    %c0_4 = arith.constant 0 : index
    %20 = vector.load %arg2[%c0_3, %c0_4] : memref<16x1xf32, #tpu.memory_space<vmem>>, vector<16x1xf32>
    %21 = vector.broadcast %20 : vector<16x1xf32> to vector<16x190xf32>
    %22 = arith.addf %19, %21 : vector<16x190xf32>
    %cst_5 = arith.constant dense<0.000000e+00> : vector<16xf32>
    %23 = vector.multi_reduction <add>, %22, %cst_5 [1] : vector<16x190xf32> to vector<16xf32>
    %24 = vector.shape_cast %23 : vector<16xf32> to vector<16x1xf32>
    %cst_6 = arith.constant 0.00526315812 : f32
    %25 = vector.broadcast %cst_6 : f32 to vector<16x1xf32>
    %26 = arith.mulf %24, %25 : vector<16x1xf32>
    %27 = vector.broadcast %26 : vector<16x1xf32> to vector<16x190xf32>
    %28 = arith.subf %22, %27 : vector<16x190xf32>
    %29 = arith.mulf %28, %28 : vector<16x190xf32>
    %cst_7 = arith.constant dense<0.000000e+00> : vector<16xf32>
    %30 = vector.multi_reduction <add>, %29, %cst_7 [1] : vector<16x190xf32> to vector<16xf32>
    %31 = vector.shape_cast %30 : vector<16xf32> to vector<16x1xf32>
    %cst_8 = arith.constant 0.00526315812 : f32
    %32 = vector.broadcast %cst_8 : f32 to vector<16x1xf32>
    %33 = arith.mulf %31, %32 : vector<16x1xf32>
    %cst_9 = arith.constant 9.99999974E-6 : f32
    %34 = vector.broadcast %cst_9 : f32 to vector<16x1xf32>
    %35 = arith.addf %33, %34 : vector<16x1xf32>
    %36 = math.rsqrt %35 : vector<16x1xf32>
    %37 = vector.broadcast %36 : vector<16x1xf32> to vector<16x190xf32>
    %38 = arith.mulf %28, %37 : vector<16x190xf32>
    %c0_10 = arith.constant 0 : index
    %c0_11 = arith.constant 0 : index
    %39 = vector.load %arg3[%c0_10, %c0_11] : memref<16x1xf32, #tpu.memory_space<vmem>>, vector<16x1xf32>
    %40 = vector.broadcast %39 : vector<16x1xf32> to vector<16x190xf32>
    %41 = arith.mulf %38, %40 : vector<16x190xf32>
    %c0_12 = arith.constant 0 : index
    %c0_13 = arith.constant 0 : index
    %42 = vector.load %arg4[%c0_12, %c0_13] : memref<16x1xf32, #tpu.memory_space<vmem>>, vector<16x1xf32>
    %43 = vector.broadcast %42 : vector<16x1xf32> to vector<16x190xf32>
    %44 = arith.addf %41, %43 : vector<16x190xf32>
    %45 = vector.extract_strided_slice %44 {offsets = [0, 0], sizes = [16, 89], strides = [1, 1]} : vector<16x190xf32> to vector<16x89xf32>
    %46 = vector.extract_strided_slice %44 {offsets = [0, 95], sizes = [16, 89], strides = [1, 1]} : vector<16x190xf32> to vector<16x89xf32>
    %47 = tpu.concatenate %45, %46 in 1 : vector<16x89xf32>, vector<16x89xf32> -> vector<16x178xf32>
    %48 = vector.extract_strided_slice %44 {offsets = [0, 1], sizes = [16, 89], strides = [1, 1]} : vector<16x190xf32> to vector<16x89xf32>
    %49 = vector.extract_strided_slice %44 {offsets = [0, 96], sizes = [16, 89], strides = [1, 1]} : vector<16x190xf32> to vector<16x89xf32>
    %50 = tpu.concatenate %48, %49 in 1 : vector<16x89xf32>, vector<16x89xf32> -> vector<16x178xf32>
    %51 = vector.extract_strided_slice %44 {offsets = [0, 2], sizes = [16, 89], strides = [1, 1]} : vector<16x190xf32> to vector<16x89xf32>
    %52 = vector.extract_strided_slice %44 {offsets = [0, 97], sizes = [16, 89], strides = [1, 1]} : vector<16x190xf32> to vector<16x89xf32>
    %53 = tpu.concatenate %51, %52 in 1 : vector<16x89xf32>, vector<16x89xf32> -> vector<16x178xf32>
    %54 = vector.extract_strided_slice %44 {offsets = [0, 3], sizes = [16, 89], strides = [1, 1]} : vector<16x190xf32> to vector<16x89xf32>
    %55 = vector.extract_strided_slice %44 {offsets = [0, 98], sizes = [16, 89], strides = [1, 1]} : vector<16x190xf32> to vector<16x89xf32>
    %56 = tpu.concatenate %54, %55 in 1 : vector<16x89xf32>, vector<16x89xf32> -> vector<16x178xf32>
    %57 = vector.extract_strided_slice %44 {offsets = [0, 4], sizes = [16, 89], strides = [1, 1]} : vector<16x190xf32> to vector<16x89xf32>
    %58 = vector.extract_strided_slice %44 {offsets = [0, 99], sizes = [16, 89], strides = [1, 1]} : vector<16x190xf32> to vector<16x89xf32>
    %59 = tpu.concatenate %57, %58 in 1 : vector<16x89xf32>, vector<16x89xf32> -> vector<16x178xf32>
    %60 = vector.extract_strided_slice %44 {offsets = [0, 5], sizes = [16, 89], strides = [1, 1]} : vector<16x190xf32> to vector<16x89xf32>
    %61 = vector.extract_strided_slice %44 {offsets = [0, 100], sizes = [16, 89], strides = [1, 1]} : vector<16x190xf32> to vector<16x89xf32>
    %62 = tpu.concatenate %60, %61 in 1 : vector<16x89xf32>, vector<16x89xf32> -> vector<16x178xf32>
    %63 = vector.extract_strided_slice %44 {offsets = [0, 6], sizes = [16, 89], strides = [1, 1]} : vector<16x190xf32> to vector<16x89xf32>
    %64 = vector.extract_strided_slice %44 {offsets = [0, 101], sizes = [16, 89], strides = [1, 1]} : vector<16x190xf32> to vector<16x89xf32>
    %65 = tpu.concatenate %63, %64 in 1 : vector<16x89xf32>, vector<16x89xf32> -> vector<16x178xf32>
    %66 = tpu.concatenate %47, %50, %53, %56, %59, %62, %65 in 0 : vector<16x178xf32>, vector<16x178xf32>, vector<16x178xf32>, vector<16x178xf32>, vector<16x178xf32>, vector<16x178xf32>, vector<16x178xf32> -> vector<112x178xf32>
    %67 = arith.truncf %66 : vector<112x178xf32> to vector<112x178xbf16>
    %c0_14 = arith.constant 0 : index
    %c0_15 = arith.constant 0 : index
    %68 = vector.load %arg5[%c0_14, %c0_15] : memref<32x112xbf16, #tpu.memory_space<vmem>>, vector<32x112xbf16>
    %cst_16 = arith.constant dense<0.000000e+00> : vector<32x178xf32>
    %69 = tpu.matmul %68, %67, %cst_16 {dimension_numbers = #tpu.dot_dimension_numbers<[1], [0], [0], [1], [0, 0, 1, 1], [], []>} : vector<32x112xbf16>, vector<112x178xbf16>, vector<32x178xf32> -> vector<32x178xf32>
    %c0_17 = arith.constant 0 : index
    %c0_18 = arith.constant 0 : index
    %70 = vector.load %arg6[%c0_17, %c0_18] : memref<32x1xf32, #tpu.memory_space<vmem>>, vector<32x1xf32>
    %71 = vector.broadcast %70 : vector<32x1xf32> to vector<32x178xf32>
    %72 = arith.addf %69, %71 : vector<32x178xf32>
    %c0_19 = arith.constant 0 : index
    %c0_20 = arith.constant 0 : index
    %73 = vector.load %arg17[%c0_19, %c0_20] : memref<178x90xf32, #tpu.memory_space<vmem>>, vector<178x90xf32>
    %cst_21 = arith.constant dense<0.000000e+00> : vector<32x90xf32>
    %74 = tpu.matmul %72, %73, %cst_21 {dimension_numbers = #tpu.dot_dimension_numbers<[1], [0], [0], [1], [0, 0, 1, 1], [], []>} : vector<32x178xf32>, vector<178x90xf32>, vector<32x90xf32> -> vector<32x90xf32>
    %cst_22 = arith.constant dense<0.000000e+00> : vector<32xf32>
    %75 = vector.multi_reduction <add>, %74, %cst_22 [1] : vector<32x90xf32> to vector<32xf32>
    %76 = vector.shape_cast %75 : vector<32xf32> to vector<32x1xf32>
    %cst_23 = arith.constant 0.0111111114 : f32
    %77 = vector.broadcast %cst_23 : f32 to vector<32x1xf32>
    %78 = arith.mulf %76, %77 : vector<32x1xf32>
    %79 = vector.broadcast %78 : vector<32x1xf32> to vector<32x90xf32>
    %80 = arith.subf %74, %79 : vector<32x90xf32>
    %81 = arith.mulf %80, %80 : vector<32x90xf32>
    %cst_24 = arith.constant dense<0.000000e+00> : vector<32xf32>
    %82 = vector.multi_reduction <add>, %81, %cst_24 [1] : vector<32x90xf32> to vector<32xf32>
    %83 = vector.shape_cast %82 : vector<32xf32> to vector<32x1xf32>
    %cst_25 = arith.constant 0.0111111114 : f32
    %84 = vector.broadcast %cst_25 : f32 to vector<32x1xf32>
    %85 = arith.mulf %83, %84 : vector<32x1xf32>
    %cst_26 = arith.constant 9.99999974E-6 : f32
    %86 = vector.broadcast %cst_26 : f32 to vector<32x1xf32>
    %87 = arith.addf %85, %86 : vector<32x1xf32>
    %88 = math.rsqrt %87 : vector<32x1xf32>
    %89 = vector.broadcast %88 : vector<32x1xf32> to vector<32x90xf32>
    %90 = arith.mulf %80, %89 : vector<32x90xf32>
    %c0_27 = arith.constant 0 : index
    %c0_28 = arith.constant 0 : index
    %91 = vector.load %arg7[%c0_27, %c0_28] : memref<32x1xf32, #tpu.memory_space<vmem>>, vector<32x1xf32>
    %92 = vector.broadcast %91 : vector<32x1xf32> to vector<32x90xf32>
    %93 = arith.mulf %90, %92 : vector<32x90xf32>
    %c0_29 = arith.constant 0 : index
    %c0_30 = arith.constant 0 : index
    %94 = vector.load %arg8[%c0_29, %c0_30] : memref<32x1xf32, #tpu.memory_space<vmem>>, vector<32x1xf32>
    %95 = vector.broadcast %94 : vector<32x1xf32> to vector<32x90xf32>
    %96 = arith.addf %93, %95 : vector<32x90xf32>
    %c0_31 = arith.constant 0 : index
    %c0_32 = arith.constant 0 : index
    %97 = vector.load %arg18[%c0_31, %c0_32] : memref<8x32xf32, #tpu.memory_space<vmem>>, vector<8x32xf32>
    %98 = arith.mulf %96, %96 : vector<32x90xf32>
    %cst_33 = arith.constant dense<0.000000e+00> : vector<8x90xf32>
    %99 = tpu.matmul %97, %98, %cst_33 {dimension_numbers = #tpu.dot_dimension_numbers<[1], [0], [0], [1], [0, 0, 1, 1], [], []>} : vector<8x32xf32>, vector<32x90xf32>, vector<8x90xf32> -> vector<8x90xf32>
    %cst_34 = arith.constant 9.99999974E-5 : f32
    %100 = vector.broadcast %cst_34 : f32 to vector<8x90xf32>
    %101 = arith.addf %99, %100 : vector<8x90xf32>
    %102 = math.rsqrt %101 : vector<8x90xf32>
    %c0_35 = arith.constant 0 : index
    %c0_36 = arith.constant 0 : index
    %103 = vector.load %arg19[%c0_35, %c0_36] : memref<32x8xf32, #tpu.memory_space<vmem>>, vector<32x8xf32>
    %cst_37 = arith.constant dense<0.000000e+00> : vector<32x90xf32>
    %104 = tpu.matmul %103, %102, %cst_37 {dimension_numbers = #tpu.dot_dimension_numbers<[1], [0], [0], [1], [0, 0, 1, 1], [], []>} : vector<32x8xf32>, vector<8x90xf32>, vector<32x90xf32> -> vector<32x90xf32>
    %105 = arith.mulf %96, %104 : vector<32x90xf32>
    %106 = vector.extract_strided_slice %105 {offsets = [0, 0], sizes = [32, 41], strides = [1, 1]} : vector<32x90xf32> to vector<32x41xf32>
    %107 = vector.extract_strided_slice %105 {offsets = [0, 45], sizes = [32, 41], strides = [1, 1]} : vector<32x90xf32> to vector<32x41xf32>
    %108 = tpu.concatenate %106, %107 in 1 : vector<32x41xf32>, vector<32x41xf32> -> vector<32x82xf32>
    %109 = vector.extract_strided_slice %105 {offsets = [0, 1], sizes = [32, 41], strides = [1, 1]} : vector<32x90xf32> to vector<32x41xf32>
    %110 = vector.extract_strided_slice %105 {offsets = [0, 46], sizes = [32, 41], strides = [1, 1]} : vector<32x90xf32> to vector<32x41xf32>
    %111 = tpu.concatenate %109, %110 in 1 : vector<32x41xf32>, vector<32x41xf32> -> vector<32x82xf32>
    %112 = vector.extract_strided_slice %105 {offsets = [0, 2], sizes = [32, 41], strides = [1, 1]} : vector<32x90xf32> to vector<32x41xf32>
    %113 = vector.extract_strided_slice %105 {offsets = [0, 47], sizes = [32, 41], strides = [1, 1]} : vector<32x90xf32> to vector<32x41xf32>
    %114 = tpu.concatenate %112, %113 in 1 : vector<32x41xf32>, vector<32x41xf32> -> vector<32x82xf32>
    %115 = vector.extract_strided_slice %105 {offsets = [0, 3], sizes = [32, 41], strides = [1, 1]} : vector<32x90xf32> to vector<32x41xf32>
    %116 = vector.extract_strided_slice %105 {offsets = [0, 48], sizes = [32, 41], strides = [1, 1]} : vector<32x90xf32> to vector<32x41xf32>
    %117 = tpu.concatenate %115, %116 in 1 : vector<32x41xf32>, vector<32x41xf32> -> vector<32x82xf32>
    %118 = vector.extract_strided_slice %105 {offsets = [0, 4], sizes = [32, 41], strides = [1, 1]} : vector<32x90xf32> to vector<32x41xf32>
    %119 = vector.extract_strided_slice %105 {offsets = [0, 49], sizes = [32, 41], strides = [1, 1]} : vector<32x90xf32> to vector<32x41xf32>
    %120 = tpu.concatenate %118, %119 in 1 : vector<32x41xf32>, vector<32x41xf32> -> vector<32x82xf32>
    %121 = tpu.concatenate %108, %111, %114, %117, %120 in 0 : vector<32x82xf32>, vector<32x82xf32>, vector<32x82xf32>, vector<32x82xf32>, vector<32x82xf32> -> vector<160x82xf32>
    %122 = arith.truncf %121 : vector<160x82xf32> to vector<160x82xbf16>
    %c0_38 = arith.constant 0 : index
    %c0_39 = arith.constant 0 : index
    %123 = vector.load %arg9[%c0_38, %c0_39] : memref<32x160xbf16, #tpu.memory_space<vmem>>, vector<32x160xbf16>
    %cst_40 = arith.constant dense<0.000000e+00> : vector<32x82xf32>
    %124 = tpu.matmul %123, %122, %cst_40 {dimension_numbers = #tpu.dot_dimension_numbers<[1], [0], [0], [1], [0, 0, 1, 1], [], []>} : vector<32x160xbf16>, vector<160x82xbf16>, vector<32x82xf32> -> vector<32x82xf32>
    %c0_41 = arith.constant 0 : index
    %c0_42 = arith.constant 0 : index
    %125 = vector.load %arg10[%c0_41, %c0_42] : memref<32x1xf32, #tpu.memory_space<vmem>>, vector<32x1xf32>
    %126 = vector.broadcast %125 : vector<32x1xf32> to vector<32x82xf32>
    %127 = arith.addf %124, %126 : vector<32x82xf32>
    %cst_43 = arith.constant 0.000000e+00 : f32
    %128 = vector.broadcast %cst_43 : f32 to vector<32x82xf32>
    %129 = arith.maximumf %127, %128 : vector<32x82xf32>
    %cst_44 = arith.constant dense<0.000000e+00> : vector<32xf32>
    %130 = vector.multi_reduction <add>, %129, %cst_44 [1] : vector<32x82xf32> to vector<32xf32>
    %131 = vector.shape_cast %130 : vector<32xf32> to vector<32x1xf32>
    %cst_45 = arith.constant 0.0121951215 : f32
    %132 = vector.broadcast %cst_45 : f32 to vector<32x1xf32>
    %133 = arith.mulf %131, %132 : vector<32x1xf32>
    %134 = vector.broadcast %133 : vector<32x1xf32> to vector<32x82xf32>
    %135 = arith.subf %129, %134 : vector<32x82xf32>
    %136 = arith.mulf %135, %135 : vector<32x82xf32>
    %cst_46 = arith.constant dense<0.000000e+00> : vector<32xf32>
    %137 = vector.multi_reduction <add>, %136, %cst_46 [1] : vector<32x82xf32> to vector<32xf32>
    %138 = vector.shape_cast %137 : vector<32xf32> to vector<32x1xf32>
    %cst_47 = arith.constant 0.0121951215 : f32
    %139 = vector.broadcast %cst_47 : f32 to vector<32x1xf32>
    %140 = arith.mulf %138, %139 : vector<32x1xf32>
    %cst_48 = arith.constant 9.99999974E-6 : f32
    %141 = vector.broadcast %cst_48 : f32 to vector<32x1xf32>
    %142 = arith.addf %140, %141 : vector<32x1xf32>
    %143 = math.rsqrt %142 : vector<32x1xf32>
    %144 = vector.broadcast %143 : vector<32x1xf32> to vector<32x82xf32>
    %145 = arith.mulf %135, %144 : vector<32x82xf32>
    %c0_49 = arith.constant 0 : index
    %c0_50 = arith.constant 0 : index
    %146 = vector.load %arg11[%c0_49, %c0_50] : memref<32x1xf32, #tpu.memory_space<vmem>>, vector<32x1xf32>
    %147 = vector.broadcast %146 : vector<32x1xf32> to vector<32x82xf32>
    %148 = arith.mulf %145, %147 : vector<32x82xf32>
    %c0_51 = arith.constant 0 : index
    %c0_52 = arith.constant 0 : index
    %149 = vector.load %arg12[%c0_51, %c0_52] : memref<32x1xf32, #tpu.memory_space<vmem>>, vector<32x1xf32>
    %150 = vector.broadcast %149 : vector<32x1xf32> to vector<32x82xf32>
    %151 = arith.addf %148, %150 : vector<32x82xf32>
    %152 = vector.extract_strided_slice %151 {offsets = [0, 0], sizes = [32, 35], strides = [1, 1]} : vector<32x82xf32> to vector<32x35xf32>
    %153 = vector.extract_strided_slice %151 {offsets = [0, 41], sizes = [32, 35], strides = [1, 1]} : vector<32x82xf32> to vector<32x35xf32>
    %154 = tpu.concatenate %152, %153 in 1 : vector<32x35xf32>, vector<32x35xf32> -> vector<32x70xf32>
    %155 = vector.extract_strided_slice %151 {offsets = [0, 1], sizes = [32, 35], strides = [1, 1]} : vector<32x82xf32> to vector<32x35xf32>
    %156 = vector.extract_strided_slice %151 {offsets = [0, 42], sizes = [32, 35], strides = [1, 1]} : vector<32x82xf32> to vector<32x35xf32>
    %157 = tpu.concatenate %155, %156 in 1 : vector<32x35xf32>, vector<32x35xf32> -> vector<32x70xf32>
    %158 = vector.extract_strided_slice %151 {offsets = [0, 2], sizes = [32, 35], strides = [1, 1]} : vector<32x82xf32> to vector<32x35xf32>
    %159 = vector.extract_strided_slice %151 {offsets = [0, 43], sizes = [32, 35], strides = [1, 1]} : vector<32x82xf32> to vector<32x35xf32>
    %160 = tpu.concatenate %158, %159 in 1 : vector<32x35xf32>, vector<32x35xf32> -> vector<32x70xf32>
    %161 = vector.extract_strided_slice %151 {offsets = [0, 3], sizes = [32, 35], strides = [1, 1]} : vector<32x82xf32> to vector<32x35xf32>
    %162 = vector.extract_strided_slice %151 {offsets = [0, 44], sizes = [32, 35], strides = [1, 1]} : vector<32x82xf32> to vector<32x35xf32>
    %163 = tpu.concatenate %161, %162 in 1 : vector<32x35xf32>, vector<32x35xf32> -> vector<32x70xf32>
    %164 = vector.extract_strided_slice %151 {offsets = [0, 4], sizes = [32, 35], strides = [1, 1]} : vector<32x82xf32> to vector<32x35xf32>
    %165 = vector.extract_strided_slice %151 {offsets = [0, 45], sizes = [32, 35], strides = [1, 1]} : vector<32x82xf32> to vector<32x35xf32>
    %166 = tpu.concatenate %164, %165 in 1 : vector<32x35xf32>, vector<32x35xf32> -> vector<32x70xf32>
    %167 = vector.extract_strided_slice %151 {offsets = [0, 5], sizes = [32, 35], strides = [1, 1]} : vector<32x82xf32> to vector<32x35xf32>
    %168 = vector.extract_strided_slice %151 {offsets = [0, 46], sizes = [32, 35], strides = [1, 1]} : vector<32x82xf32> to vector<32x35xf32>
    %169 = tpu.concatenate %167, %168 in 1 : vector<32x35xf32>, vector<32x35xf32> -> vector<32x70xf32>
    %170 = vector.extract_strided_slice %151 {offsets = [0, 6], sizes = [32, 35], strides = [1, 1]} : vector<32x82xf32> to vector<32x35xf32>
    %171 = vector.extract_strided_slice %151 {offsets = [0, 47], sizes = [32, 35], strides = [1, 1]} : vector<32x82xf32> to vector<32x35xf32>
    %172 = tpu.concatenate %170, %171 in 1 : vector<32x35xf32>, vector<32x35xf32> -> vector<32x70xf32>
    %173 = tpu.concatenate %154, %157, %160, %163, %166, %169, %172 in 0 : vector<32x70xf32>, vector<32x70xf32>, vector<32x70xf32>, vector<32x70xf32>, vector<32x70xf32>, vector<32x70xf32>, vector<32x70xf32> -> vector<224x70xf32>
    %174 = arith.truncf %173 : vector<224x70xf32> to vector<224x70xbf16>
    %c0_53 = arith.constant 0 : index
    %c0_54 = arith.constant 0 : index
    %175 = vector.load %arg13[%c0_53, %c0_54] : memref<32x224xbf16, #tpu.memory_space<vmem>>, vector<32x224xbf16>
    %cst_55 = arith.constant dense<0.000000e+00> : vector<32x70xf32>
    %176 = tpu.matmul %175, %174, %cst_55 {dimension_numbers = #tpu.dot_dimension_numbers<[1], [0], [0], [1], [0, 0, 1, 1], [], []>} : vector<32x224xbf16>, vector<224x70xbf16>, vector<32x70xf32> -> vector<32x70xf32>
    %c0_56 = arith.constant 0 : index
    %c0_57 = arith.constant 0 : index
    %177 = vector.load %arg14[%c0_56, %c0_57] : memref<32x1xf32, #tpu.memory_space<vmem>>, vector<32x1xf32>
    %178 = vector.broadcast %177 : vector<32x1xf32> to vector<32x70xf32>
    %179 = arith.addf %176, %178 : vector<32x70xf32>
    %cst_58 = arith.constant 0.000000e+00 : f32
    %180 = vector.broadcast %cst_58 : f32 to vector<32x70xf32>
    %181 = arith.maximumf %179, %180 : vector<32x70xf32>
    %cst_59 = arith.constant dense<0.000000e+00> : vector<32xf32>
    %182 = vector.multi_reduction <add>, %181, %cst_59 [1] : vector<32x70xf32> to vector<32xf32>
    %183 = vector.shape_cast %182 : vector<32xf32> to vector<32x1xf32>
    %cst_60 = arith.constant 0.0142857144 : f32
    %184 = vector.broadcast %cst_60 : f32 to vector<32x1xf32>
    %185 = arith.mulf %183, %184 : vector<32x1xf32>
    %186 = vector.broadcast %185 : vector<32x1xf32> to vector<32x70xf32>
    %187 = arith.subf %181, %186 : vector<32x70xf32>
    %188 = arith.mulf %187, %187 : vector<32x70xf32>
    %cst_61 = arith.constant dense<0.000000e+00> : vector<32xf32>
    %189 = vector.multi_reduction <add>, %188, %cst_61 [1] : vector<32x70xf32> to vector<32xf32>
    %190 = vector.shape_cast %189 : vector<32xf32> to vector<32x1xf32>
    %cst_62 = arith.constant 0.0142857144 : f32
    %191 = vector.broadcast %cst_62 : f32 to vector<32x1xf32>
    %192 = arith.mulf %190, %191 : vector<32x1xf32>
    %cst_63 = arith.constant 9.99999974E-6 : f32
    %193 = vector.broadcast %cst_63 : f32 to vector<32x1xf32>
    %194 = arith.addf %192, %193 : vector<32x1xf32>
    %195 = math.rsqrt %194 : vector<32x1xf32>
    %196 = vector.broadcast %195 : vector<32x1xf32> to vector<32x70xf32>
    %197 = arith.mulf %187, %196 : vector<32x70xf32>
    %c0_64 = arith.constant 0 : index
    %c0_65 = arith.constant 0 : index
    %198 = vector.load %arg15[%c0_64, %c0_65] : memref<32x1xf32, #tpu.memory_space<vmem>>, vector<32x1xf32>
    %199 = vector.broadcast %198 : vector<32x1xf32> to vector<32x70xf32>
    %200 = arith.mulf %197, %199 : vector<32x70xf32>
    %c0_66 = arith.constant 0 : index
    %c0_67 = arith.constant 0 : index
    %201 = vector.load %arg16[%c0_66, %c0_67] : memref<32x1xf32, #tpu.memory_space<vmem>>, vector<32x1xf32>
    %202 = vector.broadcast %201 : vector<32x1xf32> to vector<32x70xf32>
    %203 = arith.addf %200, %202 : vector<32x70xf32>
    %204 = vector.extract_strided_slice %203 {offsets = [0, 0], sizes = [32, 35], strides = [1, 1]} : vector<32x70xf32> to vector<32x35xf32>
    %205 = vector.extract_strided_slice %204 {offsets = [0, 0], sizes = [1, 35], strides = [1, 1]} : vector<32x35xf32> to vector<1x35xf32>
    %206 = vector.extract_strided_slice %204 {offsets = [1, 0], sizes = [1, 35], strides = [1, 1]} : vector<32x35xf32> to vector<1x35xf32>
    %207 = vector.extract_strided_slice %204 {offsets = [2, 0], sizes = [1, 35], strides = [1, 1]} : vector<32x35xf32> to vector<1x35xf32>
    %208 = vector.extract_strided_slice %204 {offsets = [3, 0], sizes = [1, 35], strides = [1, 1]} : vector<32x35xf32> to vector<1x35xf32>
    %209 = vector.extract_strided_slice %204 {offsets = [4, 0], sizes = [1, 35], strides = [1, 1]} : vector<32x35xf32> to vector<1x35xf32>
    %210 = vector.extract_strided_slice %204 {offsets = [5, 0], sizes = [1, 35], strides = [1, 1]} : vector<32x35xf32> to vector<1x35xf32>
    %211 = vector.extract_strided_slice %204 {offsets = [6, 0], sizes = [1, 35], strides = [1, 1]} : vector<32x35xf32> to vector<1x35xf32>
    %212 = vector.extract_strided_slice %204 {offsets = [7, 0], sizes = [1, 35], strides = [1, 1]} : vector<32x35xf32> to vector<1x35xf32>
    %213 = vector.extract_strided_slice %204 {offsets = [8, 0], sizes = [1, 35], strides = [1, 1]} : vector<32x35xf32> to vector<1x35xf32>
    %214 = vector.extract_strided_slice %204 {offsets = [9, 0], sizes = [1, 35], strides = [1, 1]} : vector<32x35xf32> to vector<1x35xf32>
    %215 = vector.extract_strided_slice %204 {offsets = [10, 0], sizes = [1, 35], strides = [1, 1]} : vector<32x35xf32> to vector<1x35xf32>
    %216 = vector.extract_strided_slice %204 {offsets = [11, 0], sizes = [1, 35], strides = [1, 1]} : vector<32x35xf32> to vector<1x35xf32>
    %217 = vector.extract_strided_slice %204 {offsets = [12, 0], sizes = [1, 35], strides = [1, 1]} : vector<32x35xf32> to vector<1x35xf32>
    %218 = vector.extract_strided_slice %204 {offsets = [13, 0], sizes = [1, 35], strides = [1, 1]} : vector<32x35xf32> to vector<1x35xf32>
    %219 = vector.extract_strided_slice %204 {offsets = [14, 0], sizes = [1, 35], strides = [1, 1]} : vector<32x35xf32> to vector<1x35xf32>
    %220 = vector.extract_strided_slice %204 {offsets = [15, 0], sizes = [1, 35], strides = [1, 1]} : vector<32x35xf32> to vector<1x35xf32>
    %221 = vector.extract_strided_slice %204 {offsets = [16, 0], sizes = [1, 35], strides = [1, 1]} : vector<32x35xf32> to vector<1x35xf32>
    %222 = vector.extract_strided_slice %204 {offsets = [17, 0], sizes = [1, 35], strides = [1, 1]} : vector<32x35xf32> to vector<1x35xf32>
    %223 = vector.extract_strided_slice %204 {offsets = [18, 0], sizes = [1, 35], strides = [1, 1]} : vector<32x35xf32> to vector<1x35xf32>
    %224 = vector.extract_strided_slice %204 {offsets = [19, 0], sizes = [1, 35], strides = [1, 1]} : vector<32x35xf32> to vector<1x35xf32>
    %225 = vector.extract_strided_slice %204 {offsets = [20, 0], sizes = [1, 35], strides = [1, 1]} : vector<32x35xf32> to vector<1x35xf32>
    %226 = vector.extract_strided_slice %204 {offsets = [21, 0], sizes = [1, 35], strides = [1, 1]} : vector<32x35xf32> to vector<1x35xf32>
    %227 = vector.extract_strided_slice %204 {offsets = [22, 0], sizes = [1, 35], strides = [1, 1]} : vector<32x35xf32> to vector<1x35xf32>
    %228 = vector.extract_strided_slice %204 {offsets = [23, 0], sizes = [1, 35], strides = [1, 1]} : vector<32x35xf32> to vector<1x35xf32>
    %229 = vector.extract_strided_slice %204 {offsets = [24, 0], sizes = [1, 35], strides = [1, 1]} : vector<32x35xf32> to vector<1x35xf32>
    %230 = vector.extract_strided_slice %204 {offsets = [25, 0], sizes = [1, 35], strides = [1, 1]} : vector<32x35xf32> to vector<1x35xf32>
    %231 = vector.extract_strided_slice %204 {offsets = [26, 0], sizes = [1, 35], strides = [1, 1]} : vector<32x35xf32> to vector<1x35xf32>
    %232 = vector.extract_strided_slice %204 {offsets = [27, 0], sizes = [1, 35], strides = [1, 1]} : vector<32x35xf32> to vector<1x35xf32>
    %233 = vector.extract_strided_slice %204 {offsets = [28, 0], sizes = [1, 35], strides = [1, 1]} : vector<32x35xf32> to vector<1x35xf32>
    %234 = vector.extract_strided_slice %204 {offsets = [29, 0], sizes = [1, 35], strides = [1, 1]} : vector<32x35xf32> to vector<1x35xf32>
    %235 = vector.extract_strided_slice %204 {offsets = [30, 0], sizes = [1, 35], strides = [1, 1]} : vector<32x35xf32> to vector<1x35xf32>
    %236 = vector.extract_strided_slice %204 {offsets = [31, 0], sizes = [1, 35], strides = [1, 1]} : vector<32x35xf32> to vector<1x35xf32>
    %237 = tpu.concatenate %205, %206, %207, %208, %209, %210, %211, %212, %213, %214, %215, %216, %217, %218, %219, %220 in 1 : vector<1x35xf32>, vector<1x35xf32>, vector<1x35xf32>, vector<1x35xf32>, vector<1x35xf32>, vector<1x35xf32>, vector<1x35xf32>, vector<1x35xf32>, vector<1x35xf32>, vector<1x35xf32>, vector<1x35xf32>, vector<1x35xf32>, vector<1x35xf32>, vector<1x35xf32>, vector<1x35xf32>, vector<1x35xf32> -> vector<1x560xf32>
    %238 = tpu.concatenate %221, %222, %223, %224, %225, %226, %227, %228, %229, %230, %231, %232, %233, %234, %235, %236 in 1 : vector<1x35xf32>, vector<1x35xf32>, vector<1x35xf32>, vector<1x35xf32>, vector<1x35xf32>, vector<1x35xf32>, vector<1x35xf32>, vector<1x35xf32>, vector<1x35xf32>, vector<1x35xf32>, vector<1x35xf32>, vector<1x35xf32>, vector<1x35xf32>, vector<1x35xf32>, vector<1x35xf32>, vector<1x35xf32> -> vector<1x560xf32>
    %239 = tpu.concatenate %237, %238 in 1 : vector<1x560xf32>, vector<1x560xf32> -> vector<1x1120xf32>
    %240 = vector.extract_strided_slice %203 {offsets = [0, 35], sizes = [32, 35], strides = [1, 1]} : vector<32x70xf32> to vector<32x35xf32>
    %241 = vector.extract_strided_slice %240 {offsets = [0, 0], sizes = [1, 35], strides = [1, 1]} : vector<32x35xf32> to vector<1x35xf32>
    %242 = vector.extract_strided_slice %240 {offsets = [1, 0], sizes = [1, 35], strides = [1, 1]} : vector<32x35xf32> to vector<1x35xf32>
    %243 = vector.extract_strided_slice %240 {offsets = [2, 0], sizes = [1, 35], strides = [1, 1]} : vector<32x35xf32> to vector<1x35xf32>
    %244 = vector.extract_strided_slice %240 {offsets = [3, 0], sizes = [1, 35], strides = [1, 1]} : vector<32x35xf32> to vector<1x35xf32>
    %245 = vector.extract_strided_slice %240 {offsets = [4, 0], sizes = [1, 35], strides = [1, 1]} : vector<32x35xf32> to vector<1x35xf32>
    %246 = vector.extract_strided_slice %240 {offsets = [5, 0], sizes = [1, 35], strides = [1, 1]} : vector<32x35xf32> to vector<1x35xf32>
    %247 = vector.extract_strided_slice %240 {offsets = [6, 0], sizes = [1, 35], strides = [1, 1]} : vector<32x35xf32> to vector<1x35xf32>
    %248 = vector.extract_strided_slice %240 {offsets = [7, 0], sizes = [1, 35], strides = [1, 1]} : vector<32x35xf32> to vector<1x35xf32>
    %249 = vector.extract_strided_slice %240 {offsets = [8, 0], sizes = [1, 35], strides = [1, 1]} : vector<32x35xf32> to vector<1x35xf32>
    %250 = vector.extract_strided_slice %240 {offsets = [9, 0], sizes = [1, 35], strides = [1, 1]} : vector<32x35xf32> to vector<1x35xf32>
    %251 = vector.extract_strided_slice %240 {offsets = [10, 0], sizes = [1, 35], strides = [1, 1]} : vector<32x35xf32> to vector<1x35xf32>
    %252 = vector.extract_strided_slice %240 {offsets = [11, 0], sizes = [1, 35], strides = [1, 1]} : vector<32x35xf32> to vector<1x35xf32>
    %253 = vector.extract_strided_slice %240 {offsets = [12, 0], sizes = [1, 35], strides = [1, 1]} : vector<32x35xf32> to vector<1x35xf32>
    %254 = vector.extract_strided_slice %240 {offsets = [13, 0], sizes = [1, 35], strides = [1, 1]} : vector<32x35xf32> to vector<1x35xf32>
    %255 = vector.extract_strided_slice %240 {offsets = [14, 0], sizes = [1, 35], strides = [1, 1]} : vector<32x35xf32> to vector<1x35xf32>
    %256 = vector.extract_strided_slice %240 {offsets = [15, 0], sizes = [1, 35], strides = [1, 1]} : vector<32x35xf32> to vector<1x35xf32>
    %257 = vector.extract_strided_slice %240 {offsets = [16, 0], sizes = [1, 35], strides = [1, 1]} : vector<32x35xf32> to vector<1x35xf32>
    %258 = vector.extract_strided_slice %240 {offsets = [17, 0], sizes = [1, 35], strides = [1, 1]} : vector<32x35xf32> to vector<1x35xf32>
    %259 = vector.extract_strided_slice %240 {offsets = [18, 0], sizes = [1, 35], strides = [1, 1]} : vector<32x35xf32> to vector<1x35xf32>
    %260 = vector.extract_strided_slice %240 {offsets = [19, 0], sizes = [1, 35], strides = [1, 1]} : vector<32x35xf32> to vector<1x35xf32>
    %261 = vector.extract_strided_slice %240 {offsets = [20, 0], sizes = [1, 35], strides = [1, 1]} : vector<32x35xf32> to vector<1x35xf32>
    %262 = vector.extract_strided_slice %240 {offsets = [21, 0], sizes = [1, 35], strides = [1, 1]} : vector<32x35xf32> to vector<1x35xf32>
    %263 = vector.extract_strided_slice %240 {offsets = [22, 0], sizes = [1, 35], strides = [1, 1]} : vector<32x35xf32> to vector<1x35xf32>
    %264 = vector.extract_strided_slice %240 {offsets = [23, 0], sizes = [1, 35], strides = [1, 1]} : vector<32x35xf32> to vector<1x35xf32>
    %265 = vector.extract_strided_slice %240 {offsets = [24, 0], sizes = [1, 35], strides = [1, 1]} : vector<32x35xf32> to vector<1x35xf32>
    %266 = vector.extract_strided_slice %240 {offsets = [25, 0], sizes = [1, 35], strides = [1, 1]} : vector<32x35xf32> to vector<1x35xf32>
    %267 = vector.extract_strided_slice %240 {offsets = [26, 0], sizes = [1, 35], strides = [1, 1]} : vector<32x35xf32> to vector<1x35xf32>
    %268 = vector.extract_strided_slice %240 {offsets = [27, 0], sizes = [1, 35], strides = [1, 1]} : vector<32x35xf32> to vector<1x35xf32>
    %269 = vector.extract_strided_slice %240 {offsets = [28, 0], sizes = [1, 35], strides = [1, 1]} : vector<32x35xf32> to vector<1x35xf32>
    %270 = vector.extract_strided_slice %240 {offsets = [29, 0], sizes = [1, 35], strides = [1, 1]} : vector<32x35xf32> to vector<1x35xf32>
    %271 = vector.extract_strided_slice %240 {offsets = [30, 0], sizes = [1, 35], strides = [1, 1]} : vector<32x35xf32> to vector<1x35xf32>
    %272 = vector.extract_strided_slice %240 {offsets = [31, 0], sizes = [1, 35], strides = [1, 1]} : vector<32x35xf32> to vector<1x35xf32>
    %273 = tpu.concatenate %241, %242, %243, %244, %245, %246, %247, %248, %249, %250, %251, %252, %253, %254, %255, %256 in 1 : vector<1x35xf32>, vector<1x35xf32>, vector<1x35xf32>, vector<1x35xf32>, vector<1x35xf32>, vector<1x35xf32>, vector<1x35xf32>, vector<1x35xf32>, vector<1x35xf32>, vector<1x35xf32>, vector<1x35xf32>, vector<1x35xf32>, vector<1x35xf32>, vector<1x35xf32>, vector<1x35xf32>, vector<1x35xf32> -> vector<1x560xf32>
    %274 = tpu.concatenate %257, %258, %259, %260, %261, %262, %263, %264, %265, %266, %267, %268, %269, %270, %271, %272 in 1 : vector<1x35xf32>, vector<1x35xf32>, vector<1x35xf32>, vector<1x35xf32>, vector<1x35xf32>, vector<1x35xf32>, vector<1x35xf32>, vector<1x35xf32>, vector<1x35xf32>, vector<1x35xf32>, vector<1x35xf32>, vector<1x35xf32>, vector<1x35xf32>, vector<1x35xf32>, vector<1x35xf32>, vector<1x35xf32> -> vector<1x560xf32>
    %275 = tpu.concatenate %273, %274 in 1 : vector<1x560xf32>, vector<1x560xf32> -> vector<1x1120xf32>
    %276 = tpu.concatenate %239, %275 in 0 : vector<1x1120xf32>, vector<1x1120xf32> -> vector<2x1120xf32>
    %277 = arith.truncf %276 : vector<2x1120xf32> to vector<2x1120xbf16>
    tpu.wait_dma2 semaphore(%arg26 : memref<!tpu.dma_semaphore, #tpu.memory_space<semaphore_mem>>) src(%arg23 : memref<1120x768xbf16, #tpu.memory_space<any>>) dst(%arg25 : memref<1120x768xbf16, #tpu.memory_space<vmem>>)
    %c0_68 = arith.constant 0 : index
    %c0_69 = arith.constant 0 : index
    %278 = vector.load %arg25[%c0_68, %c0_69] : memref<1120x768xbf16, #tpu.memory_space<vmem>>, vector<1120x768xbf16>
    %cst_70 = arith.constant dense<0.000000e+00> : vector<2x768xf32>
    %279 = tpu.matmul %277, %278, %cst_70 {dimension_numbers = #tpu.dot_dimension_numbers<[1], [0], [0], [1], [0, 0, 1, 1], [], []>} : vector<2x1120xbf16>, vector<1120x768xbf16>, vector<2x768xf32> -> vector<2x768xf32>
    %c0_71 = arith.constant 0 : index
    %c0_72 = arith.constant 0 : index
    %280 = vector.load %arg20[%c0_71, %c0_72] : memref<1x768xf32, #tpu.memory_space<vmem>>, vector<1x768xf32>
    %281 = vector.broadcast %280 : vector<1x768xf32> to vector<2x768xf32>
    %282 = arith.addf %279, %281 : vector<2x768xf32>
    %cst_73 = arith.constant 0.000000e+00 : f32
    %283 = vector.broadcast %cst_73 : f32 to vector<2x768xf32>
    %284 = arith.cmpf ogt, %282, %283 : vector<2x768xf32>
    %cst_74 = arith.constant 0.000000e+00 : f32
    %285 = vector.broadcast %cst_74 : f32 to vector<2x768xf32>
    %286 = arith.minimumf %282, %285 : vector<2x768xf32>
    %287 = math.exp %286 : vector<2x768xf32>
    %cst_75 = arith.constant 1.000000e+00 : f32
    %288 = vector.broadcast %cst_75 : f32 to vector<2x768xf32>
    %289 = arith.subf %287, %288 : vector<2x768xf32>
    %cst_76 = arith.constant 1.67326319 : f32
    %290 = vector.broadcast %cst_76 : f32 to vector<2x768xf32>
    %291 = arith.mulf %290, %289 : vector<2x768xf32>
    %292 = arith.select %284, %282, %291 : vector<2x768xi1>, vector<2x768xf32>
    %cst_77 = arith.constant 1.05070102 : f32
    %293 = vector.broadcast %cst_77 : f32 to vector<2x768xf32>
    %294 = arith.mulf %293, %292 : vector<2x768xf32>
    %c0_78 = arith.constant 0 : index
    %c0_79 = arith.constant 0 : index
    %295 = vector.load %arg21[%c0_78, %c0_79] : memref<768x10xf32, #tpu.memory_space<vmem>>, vector<768x10xf32>
    %cst_80 = arith.constant dense<0.000000e+00> : vector<2x10xf32>
    %296 = tpu.matmul %294, %295, %cst_80 {dimension_numbers = #tpu.dot_dimension_numbers<[1], [0], [0], [1], [0, 0, 1, 1], [], []>} : vector<2x768xf32>, vector<768x10xf32>, vector<2x10xf32> -> vector<2x10xf32>
    %c0_81 = arith.constant 0 : index
    %c0_82 = arith.constant 0 : index
    %297 = vector.load %arg22[%c0_81, %c0_82] : memref<1x10xf32, #tpu.memory_space<vmem>>, vector<1x10xf32>
    %298 = vector.broadcast %297 : vector<1x10xf32> to vector<2x10xf32>
    %299 = arith.addf %296, %298 : vector<2x10xf32>
    %cst_83 = arith.constant dense<0xFF800000> : vector<2xf32>
    %300 = vector.multi_reduction <maximumf>, %299, %cst_83 [1] : vector<2x10xf32> to vector<2xf32>
    %301 = vector.shape_cast %300 : vector<2xf32> to vector<2x1xf32>
    %302 = vector.broadcast %301 : vector<2x1xf32> to vector<2x10xf32>
    %303 = arith.subf %299, %302 : vector<2x10xf32>
    %304 = math.exp %303 : vector<2x10xf32>
    %cst_84 = arith.constant dense<0.000000e+00> : vector<2xf32>
    %305 = vector.multi_reduction <add>, %304, %cst_84 [1] : vector<2x10xf32> to vector<2xf32>
    %306 = vector.shape_cast %305 : vector<2xf32> to vector<2x1xf32>
    %307 = vector.broadcast %306 : vector<2x1xf32> to vector<2x10xf32>
    %308 = arith.divf %304, %307 : vector<2x10xf32>
    %c0_85 = arith.constant 0 : index
    %c0_86 = arith.constant 0 : index
    %309 = vector.load %arg24[%c0_85, %c0_86] : memref<2x10xf32, #tpu.memory_space<vmem>>, vector<2x10xf32>
    tpu.vector_store %arg24[%c0_85, %c0_86], %308 {strides = array<i32>} : memref<2x10xf32, #tpu.memory_space<vmem>>, vector<2x10xf32>,
    return
  }
}

</mosaic_0001>

<bundles_post_ra>
// kernel: qcnn_forward.1
= control target key start
LH: loop header
LB: loop body
LE: loop exit
PB: predicated region body
PF: predicated region fallthrough
CT: control target
= control target key end

     0   :  { %s9100_s0 = inlined_call_operand.vmem [shape: f32[1,198], index: 0, kind: input, shape index: {}]   ;;  %s9101_s1 = inlined_call_operand.vmem [shape: bf16[16,5], index: 1, kind: input, shape index: {}]   ;;  %s9102_s2 = inlined_call_operand.vmem [shape: f32[16,1], index: 2, kind: input, shape index: {}]   ;;  %s9103_s3 = inlined_call_operand.vmem [shape: f32[16,1], index: 3, kind: input, shape index: {}]   ;;  %s9104_s4 = inlined_call_operand.vmem [shape: f32[16,1], index: 4, kind: input, shape index: {}]   ;;  %s9105_s5 = inlined_call_operand.hbm [shape: bf16[32,112], index: 5, kind: input, shape index: {}]   ;;  %s9106_s6 = inlined_call_operand.vmem [shape: f32[32,1], index: 6, kind: input, shape index: {}]   ;;  %s9107_s7 = inlined_call_operand.vmem [shape: f32[32,1], index: 7, kind: input, shape index: {}]   ;;  %s9108_s8 = inlined_call_operand.vmem [shape: f32[32,1], index: 8, kind: input, shape index: {}]   ;;  %s9109_s9 = inlined_call_operand.hbm [shape: bf16[32,160], index: 9, kind: input, shape index: {}]   ;;  %s9110_s10 = inlined_call_operand.vmem [shape: f32[32,1], index: 10, kind: input, shape index: {}]   ;;  %s9111_s11 = inlined_call_operand.vmem [shape: f32[32,1], index: 11, kind: input, shape index: {}]   ;;  %s9112_s12 = inlined_call_operand.vmem [shape: f32[32,1], index: 12, kind: input, shape index: {}]   ;;  %s9113_s13 = inlined_call_operand.hbm [shape: bf16[32,224], index: 13, kind: input, shape index: {}]   ;;  %s9114_s14 = inlined_call_operand.vmem [shape: f32[32,1], index: 14, kind: input, shape index: {}]   ;;  %s9115_s15 = inlined_call_operand.vmem [shape: f32[32,1], index: 15, kind: input, shape index: {}]   ;;  %s9116_s16 = inlined_call_operand.vmem [shape: f32[32,1], index: 16, kind: input, shape index: {}]   ;;  %s9117_s17 = inlined_call_operand.hbm [shape: f32[178,90], index: 17, kind: input, shape index: {}]   ;;  %s9118_s18 = inlined_call_operand.hbm [shape: f32[8,32], index: 18, kind: input, shape index: {}]   ;;  %s9119_s19 = inlined_call_operand.hbm [shape: f32[32,8], index: 19, kind: input, shape index: {}]   ;;  %s9120_s20 = inlined_call_operand.hbm [shape: f32[1,768], index: 20, kind: input, shape index: {}]   ;;  %s9121_s21 = inlined_call_operand.vmem [shape: f32[768,10], index: 21, kind: input, shape index: {}]   ;;  %s9122_s22 = inlined_call_operand.hbm [shape: f32[1,10], index: 22, kind: input, shape index: {}]   ;;  %s9123_s23 = inlined_call_operand.hbm [shape: bf16[1120,768], index: 23, kind: input, shape index: {}]   ;;  %s9124_s24 = inlined_call_operand.hbm [shape: f32[2,10], index: 24, kind: output, shape index: {}]  }
   0x1   :  { %9136 = sst [smem:[#allocation30_spill]] %s9100_s0 }
   0x2   :  { %9137 = sst [smem:[#allocation31_spill]] %s9101_s1 }
   0x3   :  { %9138 = sst [smem:[#allocation32_spill]] %s9102_s2 }
   0x4   :  { %9139 = sst [smem:[#allocation33_spill]] %s9103_s3 }
   0x5   :  { %9140 = sst [smem:[#allocation34_spill]] %s9104_s4 }
   0x6   :  { %9141 = sst [smem:[#allocation35_spill]] %s9105_s5 }
   0x7   :  { %9142 = sst [smem:[#allocation36_spill]] %s9106_s6 }
   0x8   :  { %9143 = sst [smem:[#allocation37_spill]] %s9107_s7 }
   0x9   :  { %9144 = sst [smem:[#allocation38_spill]] %s9108_s8 }
   0xa   :  { %29 = vsyncpa [#allocation5], 0 }
   0xb   :  { %30 = vsyncpa [#allocation8], 0 }
   0xc   :  { %31 = vsyncpa [#allocation11], 0 }
   0xd   :  { %32 = vsyncpa [#allocation14], 0 }
   0xe   :  { %33 = vsyncpa [#allocation17], 0 }
   0xf   :  { %34 = vsyncpa [#allocation6], 0  ;;  %s7848_s5 = smov [#allocation7]  }
  0x10   :  { %s68_s26 = sshll.u32 %s7848_s5, 4  ;;  %s69_s26 = int_to_ptr.vmem [resolvable:$true] %s68_s26 }
  0x11   :  { %s7642_s27 = scalar_lea.vmem %s69_s26, 512  ;;  %p7647_p1 = scmp.lt.s32.totalorder %s69_s26, %s69_s26 }
  0x12   :  { %p7643_p0 = scmp.ne.s32.totalorder %s69_s26, %s7642_s27  ;;  %p7648_p2 = scmp.lt.s32.totalorder %s7642_s27, %s7642_s27 }
  0x14   :  { %p7649_p3 = por %p7648_p2, %p7647_p1 }
  0x16   :  { %p7650_p4 = pnand %p7649_p3, %p7643_p0 }
  0x18   :  { %7653 = shalt.err (!%p7650_p4)
}
  0x19   :  { %s7849_s28 = smov 128   ;;  %s7850_s6 = smov 8  }
  0x1a   :  { %74 = dma.hbm_to_vmem [thread:$0]  %s9109_s9, 512, %s69_s26, [#allocation8], %s7849_s28, %s7849_s28, %s7850_s6  }
  0x1b   :  { %s7851_s0 = smov [#allocation10]   ;;  %s7852_s30 = smov [#allocation13]  }
  0x1c   :  { %s104_s7 = sshll.u32 %s7851_s0, 4  ;;  %s126_s3 = sshll.u32 %s7852_s30, 4  ;;  %s105_s7 = int_to_ptr.vmem [resolvable:$true] %s104_s7  ;;  %s127_s3 = int_to_ptr.vmem [resolvable:$true] %s126_s3 }
  0x1d   :  { %s7662_s25 = scalar_lea.vmem %s105_s7, 2944  ;;  %p7667_p6 = scmp.lt.s32.totalorder %s105_s7, %s105_s7 }
  0x1e   :  { %p7663_p5 = scmp.ne.s32.totalorder %s105_s7, %s7662_s25  ;;  %p7668_p7 = scmp.lt.s32.totalorder %s7662_s25, %s7662_s25 }
  0x20   :  { %p7669_p8 = por %p7668_p7, %p7667_p6 }
  0x22   :  { %p7670_p9 = pnand %p7669_p8, %p7663_p5 }
  0x24   :  { %7673 = shalt.err (!%p7670_p9)
}
  0x25   :  { %110 = dma.hbm_to_vmem [thread:$0]  %s9117_s17, 2944, %s105_s7, [#allocation11], %s7849_s28, %s7849_s28, %s7850_s6  }
  0x26   :  { %s7682_s9 = scalar_lea.vmem %s127_s3, 512  ;;  %p7687_p11 = scmp.lt.s32.totalorder %s127_s3, %s127_s3 }
  0x27   :  { %p7683_p10 = scmp.ne.s32.totalorder %s127_s3, %s7682_s9  ;;  %p7688_p12 = scmp.lt.s32.totalorder %s7682_s9, %s7682_s9 }
  0x29   :  { %p7689_p13 = por %p7688_p12, %p7687_p11 }
  0x2b   :  { %p7690_p0 = pnand %p7689_p13, %p7683_p10 }
  0x2d   :  { %7693 = shalt.err (!%p7690_p0)
}
  0x2e   :  { %132 = dma.hbm_to_vmem [thread:$0]  %s9119_s19, 512, %s127_s3, [#allocation14], %s7849_s28, %s7849_s28, %s7850_s6  }
  0x2f   :  { %s7853_s26 = smov [#allocation4]  }
  0x30   :  { %s50_s27 = sshll.u32 %s7853_s26, 4  ;;  %s51_s27 = int_to_ptr.vmem [resolvable:$true] %s50_s27 }
  0x31   :  { %s7702_s2 = scalar_lea.vmem %s51_s27, 256  ;;  %p7707_p2 = scmp.lt.s32.totalorder %s51_s27, %s51_s27 }
  0x32   :  { %p7703_p1 = scmp.ne.s32.totalorder %s51_s27, %s7702_s2  ;;  %p7708_p3 = scmp.lt.s32.totalorder %s7702_s2, %s7702_s2 }
  0x34   :  { %p7709_p4 = por %p7708_p3, %p7707_p2 }
  0x36   :  { %p7710_p5 = pnand %p7709_p4, %p7703_p1 }
  0x38   :  { %7713 = shalt.err (!%p7710_p5)
}
  0x39   :  { %s7854_s17 = smov 64   ;;  %s7855_s29 = smov 4  }
  0x3a   :  { %s9145_s30 = sld [smem:[#allocation35_spill]]  ;;  %s7856_s25 = smov [#allocation9]  }
  0x3b   :  { %s86_s8 = sshll.u32 %s7856_s25, 4  ;;  %s7857_s4 = smov [#allocation12]   ;;  %s87_s8 = int_to_ptr.vmem [resolvable:$true] %s86_s8 }
  0x3c   :  { %s117_s19 = sshll.u32 %s7857_s4, 4  ;;  %s7722_s3 = scalar_lea.vmem %s87_s8, 512  ;;  %s118_s19 = int_to_ptr.vmem [resolvable:$true] %s117_s19 }
  0x3d   :  { %p7723_p6 = scmp.ne.s32.totalorder %s87_s8, %s7722_s3  ;;  %p7727_p7 = scmp.lt.s32.totalorder %s87_s8, %s87_s8 }
  0x3e   :  { %p7728_p8 = scmp.lt.s32.totalorder %s7722_s3, %s7722_s3 }
  0x40   :  { %56 = dma.hbm_to_vmem [thread:$0]  %s9145_s30, 256, %s51_s27, [#allocation5], %s7854_s17, %s7854_s17, %s7855_s29  }
  0x41   :  { %p7729_p9 = por %p7728_p8, %p7727_p7 }
  0x43   :  { %p7730_p10 = pnand %p7729_p9, %p7723_p6 }
  0x45   :  { %7733 = shalt.err (!%p7730_p10)
}
  0x46   :  { %92 = dma.hbm_to_vmem [thread:$0]  %s9113_s13, 512, %s87_s8, [#allocation8], %s7849_s28, %s7849_s28, %s7850_s6  }
  0x47   :  { %s7742_s5 = scalar_lea.vmem %s118_s19, 128  ;;  %p7747_p12 = scmp.lt.s32.totalorder %s118_s19, %s118_s19 }
  0x48   :  { %p7743_p11 = scmp.ne.s32.totalorder %s118_s19, %s7742_s5  ;;  %p7748_p13 = scmp.lt.s32.totalorder %s7742_s5, %s7742_s5 }
  0x4a   :  { %p7749_p0 = por %p7748_p13, %p7747_p12 }
  0x4c   :  { %p7750_p1 = pnand %p7749_p0, %p7743_p11 }
  0x4e   :  { %7753 = shalt.err (!%p7750_p1)
}
  0x4f   :  { %120 = dma.hbm_to_vmem [thread:$0]  %s9118_s18, 128, %s118_s19, [#allocation11]  }
  0x50   :  { %s7858_s2 = smov [#allocation15]   ;;  %s7859_s29 = smov [#allocation16]  }
  0x51   :  { %s139_s17 = sshll.u32 %s7858_s2, 4  ;;  %s151_s0 = sshll.u32 %s7859_s29, 4  ;;  %s140_s17 = int_to_ptr.vmem [resolvable:$true] %s139_s17  ;;  %s152_s0 = int_to_ptr.vmem [resolvable:$true] %s151_s0 }
  0x52   :  { %s7762_s7 = scalar_lea.vmem %s140_s17, 96  ;;  %p7767_p3 = scmp.lt.s32.totalorder %s140_s17, %s140_s17 }
  0x53   :  { %p7763_p2 = scmp.ne.s32.totalorder %s140_s17, %s7762_s7  ;;  %p7768_p4 = scmp.lt.s32.totalorder %s7762_s7, %s7762_s7 }
  0x55   :  { %p7769_p5 = por %p7768_p4, %p7767_p3 }
  0x57   :  { %p7770_p6 = pnand %p7769_p5, %p7763_p2 }
  0x59   :  { %7773 = shalt.err (!%p7770_p6)
}
  0x5a   :  { %142 = dma.hbm_to_vmem [thread:$0]  %s9120_s20, 96, %s140_s17, [#allocation14]  }
  0x5b   :  { %s7782_s6 = scalar_lea.vmem %s152_s0, 16  ;;  %s7786_s18 = scalar_lea.vmem %s152_s0, 32 }
  0x5c   :  { %p7783_p7 = scmp.ne.s32.totalorder %s152_s0, %s7782_s6  ;;  %p7787_p8 = scmp.lt.s32.totalorder %s152_s0, %s152_s0 }
  0x5d   :  { %p7788_p9 = scmp.lt.s32.totalorder %s7786_s18, %s7782_s6 }
  0x5f   :  { %p7789_p10 = por %p7788_p9, %p7787_p8 }
  0x61   :  { %p7790_p11 = pnand %p7789_p10, %p7783_p7 }
  0x63   :  { %7793 = shalt.err (!%p7790_p11)
}
  0x64   :  { %154 = dma.hbm_to_vmem [thread:$0]  %s9122_s22, 16, %s152_s0, [#allocation17]  }
  0x65   :  { %7834 = dma.done.wait [#allocation5], 256  }
  0x66   :  { %7835 = vsyncadd [#allocation5], 4294967040 }
  0x67   :  { %7836 = dma.done.wait [#allocation8], 1024  }
  0x68   :  { %7837 = vsyncadd [#allocation8], 4294966272 }
  0x69   :  { %7838 = dma.done.wait [#allocation11], 3072  }
  0x6a   :  { %7839 = vsyncadd [#allocation11], 4294964224 }
  0x6b   :  { %7840 = dma.done.wait [#allocation14], 608  }
  0x6c   :  { %7841 = vsyncadd [#allocation14], 4294966688 }
  0x6d   :  { %7842 = dma.done.wait [#allocation17], 16  }
  0x6e   :  { %7843 = vsyncadd [#allocation17], 4294967280  ;;  %v193_v0 = vlaneseq  ;;  %s9146_s22 = sld [smem:[#allocation30_spill]]  ;;  %s7860_s4 = smov 122   ;;  %v7866_v8 = vmov 0   ;;  %vm218_vm0 = vcmask 1006592  }
  0x6f   :  { %s7861_s19 = smov 123   ;;  %s7862_s3 = smov 124   ;;  %350 = vmatprep.mubr.bf16.mxu1 %v7866_v8  ;;  %6475 = vset.pattern.permute.xlu0 %v7866_v8  ;;  %vm229_vm1 = vcmask 998400   ;;  %vm205_vm2 = vcmask 1014784   ;;  %vm209_vm3 = vcmask 777216   ;;  %vm273_vm4 = vcmask 1040384  }
  0x70   :  { %v8055_v1 = vshrl.u32 %v193_v0, 7  ;;  %s7863_s9 = smov 127   ;;  %s7864_s1 = smov 121   ;;  %6476 = vset.pattern.permute.xlu1 %v7866_v8  ;;  %vm240_vm5 = vcmask 990208   ;;  %vm249_vm6 = vcmask 982016   ;;  %vm276_vm7 = vcmask 1041408  }
  0x71   :  { %s7865_s5 = smov 126   ;;  %s7867_s26 = smov 120   ;;  %vm279_vm8 = vcmask 1042432   ;;  %vm282_vm9 = vcmask 1043456   ;;  %v7869_v44 = vmov 65535   ;;  %vm306_vm10 = vcmask 39936  }
  0x72   :  { %v195_v2 = vsub.s32 0, %v8055_v1  ;;  %v199_v3 = vsub.s32 1, %v8055_v1  ;;  %s7868_s27 = smov 125   ;;  %s9147_s29 = sld [smem:[#allocation32_spill]]  ;;  %v310_v45 = vsel %vm276_vm7, 4294967295, %v7869_v44  ;;  %vm361_vm11 = vcmask 506880  }
  0x73   :  { %v311_v54 = vsel %vm279_vm8, %v310_v45, 0  ;;  %s9148_s6 = sld [smem:[#allocation31_spill]]  ;;  %s9133_s7 = smov 117   ;;  %vm574_vm12 = vcmask 949248   ;;  %vm448_vm13 = vcmask 728064   ;;  %vm555_vm14 = vcmask 957440  }
  0x74   :  { %v191_v4 = vld [vmem:[%s9146_s22] sm:$0x3]  ;;  %s9149_s25 = sld [smem:[#allocation33_spill]]  ;;  %s7871_s13 = smov 116   ;;  %vm532_vm15 = vcmask 965632  }
  0x75   :  { %v196_v5 = vrot.slane %v191_v4, %v195_v2  ;;  %v200_v6 = vrot.slane %v191_v4, %v199_v3  ;;  %s9150_s17 = sld [smem:[#allocation34_spill]]  ;;  %s7872_s28 = smov 119  }
  0x76   :  { %s9152_s30 = sld [smem:[#allocation37_spill]] }
  0x77   :  { %v6455_v7 = vpack.i.bf16 %v200_v6, %v196_v5  ;;  %s9153_s8 = sld [smem:[#allocation38_spill]] }
  0x78   :  { %v289_v9 = vld [vmem:[%s9147_s29] sm:$0xff]  ;;  %v290_v10 = vld [vmem:[%s9147_s29 + $0x8] sm:$0xff] }
  0x79   :  { %6456 = vrot.lane.b32.xlu1 %v6455_v7, %s7860_s4  ;;  %6451 = vrot.lane.b32.xlu0 %v6455_v7, %s7861_s19  ;;  %v6942_v62 = vld [vmem:[%s9148_s6] sm:$0xff]   ;;  %s9131_s6 = smov 118  }
  0x7d   :  { %6461 = vrot.lane.b32.xlu1 %v6455_v7, %s7862_s3  ;;  %211 = vrot.lane.b32.xlu0 %v196_v5, %s7863_s9 }
  0x81   :  { %6466 = vrot.lane.b32.xlu1 %v6455_v7, %s7864_s1  ;;  %222 = vrot.lane.b32.xlu0 %v196_v5, %s7865_s5 }
  0x85   :  { %6471 = vrot.lane.b32.xlu1 %v6455_v7, %s7867_s26  ;;  %233 = vrot.lane.b32.xlu0 %v196_v5, %s7868_s27 }
  0x89   :  { %293 = vperm.xlu0 %6475, %v289_v9   ;;  %298 = vperm.xlu1 %6476, %v290_v10  }
  0xeb   :  { %v6457_v11 = vpop.permute.xlu1 %6456  ;;  %v6452_v12 = vpop.permute.xlu0 %6451 }
  0xec   :  { %v6454_v13 = vunpack.i.h.bf16 %v6452_v12  ;;  %v6453_v14 = vunpack.i.l.bf16 %v6452_v12  ;;  %v6459_v15 = vunpack.i.h.bf16 %v6457_v11  ;;  %v6458_v16 = vunpack.i.l.bf16 %v6457_v11 }
  0xee   :  { %v219_v21 = vsel %vm218_vm0, %v6453_v14, %v6454_v13  ;;  %v255_v22 = vrot.slane %v6454_v13, 7  ;;  %v230_v24 = vsel %vm229_vm1, %v6458_v16, %v6459_v15  ;;  %v260_v31 = vrot.slane %v6459_v15, 6 }
  0xef   :  { %v6462_v17 = vpop.permute.xlu1 %6461  ;;  %v212_v18 = vpop.permute.xlu0 %211  ;;  %vm509_vm0 = vcmask 973824  }
  0xf0   :  { %v6464_v19 = vunpack.i.h.bf16 %v6462_v17  ;;  %v6463_v20 = vunpack.i.l.bf16 %v6462_v17  ;;  %v221_v27 = vsel %vm209_vm3, %v212_v18, %v219_v21  ;;  %v399_v17 = vld [vmem:[%s9149_s25 + $0x8] sm:$0xff]  ;;  %v398_v18 = vld [vmem:[%s9149_s25] sm:$0xff]  ;;  %s9151_s25 = sld [smem:[#allocation36_spill]] }
  0xf1   :  { %v254_v35 = vrot.slane %v221_v27, 7 }
  0xf2   :  { %v206_v26 = vsel %vm205_vm2, %v6463_v20, %v6464_v19  ;;  %v275_v33 = vsel %vm273_vm4, %v6464_v19, %v255_v22  ;;  %vm635_vm2 = vcmask 916480  }
  0xf3   :  { %v6467_v23 = vpop.permute.xlu1 %6466  ;;  %v223_v25 = vpop.permute.xlu0 %222  ;;  %v210_v34 = vsel %vm209_vm3, %v191_v4, %v206_v26  ;;  %v278_v48 = vsel %vm276_vm7, %v275_v33, %v260_v31 }
  0xf4   :  { %v6469_v28 = vunpack.i.h.bf16 %v6467_v23  ;;  %v6468_v29 = vunpack.i.l.bf16 %v6467_v23  ;;  %v232_v30 = vsel %vm209_vm3, %v223_v25, %v230_v24  ;;  %v274_v49 = vsel %vm273_vm4, %v210_v34, %v254_v35  ;;  %v414_v35 = vld [vmem:[%s9150_s17] sm:$0xff] }
  0xf5   :  { %v259_v39 = vrot.slane %v232_v30, 6 }
  0xf6   :  { %v241_v32 = vsel %vm240_vm5, %v6468_v29, %v6469_v28  ;;  %v265_v36 = vrot.slane %v6469_v28, 5 }
  0xf7   :  { %v6472_v37 = vpop.permute.xlu1 %6471  ;;  %v234_v38 = vpop.permute.xlu0 %233  ;;  %v277_v52 = vsel %vm276_vm7, %v274_v49, %v259_v39 }
  0xf8   :  { %v6474_v40 = vunpack.i.h.bf16 %v6472_v37  ;;  %v6473_v41 = vunpack.i.l.bf16 %v6472_v37  ;;  %v243_v42 = vsel %vm209_vm3, %v234_v38, %v241_v32  ;;  %v281_v50 = vsel %vm279_vm8, %v278_v48, %v265_v36  ;;  %v415_v36 = vld [vmem:[%s9150_s17 + $0x8] sm:$0xff] }
  0xf9   :  { %v264_v43 = vrot.slane %v243_v42, 5 }
  0xfa   :  { %v270_v46 = vrot.slane %v6474_v40, 4  ;;  %v250_v47 = vsel %vm249_vm6, %v6473_v41, %v6474_v40 }
  0xfb   :  { %v252_v51 = vsel %vm209_vm3, %v6463_v20, %v250_v47  ;;  %v280_v56 = vsel %vm279_vm8, %v277_v52, %v264_v43  ;;  %vm819_vm3 = vcmask 736256   ;;  %vm1130_vm8 = vcmask 334848  }
  0xfc   :  { %v284_v53 = vsel %vm282_vm9, %v281_v50, %v270_v46  ;;  %v269_v55 = vrot.slane %v252_v51, 4 }
  0xfd   :  { %v286_v57 = vpack.c.bf16 %v284_v53, %v284_v53 }
  0xfe   :  { %v283_v58 = vsel %vm282_vm9, %v280_v56, %v269_v55  ;;  %vm1350_vm9 = vcmask 670720  }
  0xff   :  { %v316_v59 = vand.u32 %v311_v54, %v286_v57  ;;  %v285_v60 = vpack.c.bf16 %v283_v58, %v283_v58 }
 0x101   :  { %332 = vmatprep.subr.bf16.mxu1 %v316_v59  ;;  %v313_v61 = vand.u32 %v311_v54, %v285_v60 }
 0x103   :  { %333 = vmatpush1.bf16.msra.mxu1 %v313_v61 }
 0x104   :  { %v294_v0 = vpop.permute.xlu0 %293  ;;  %v299_v9 = vpop.permute.xlu1 %298 }
 0x106   :  { %5812 = vmatmul.mubr.msk.bf16.vlgmr.msra.gmra.mxu1 %vm306_vm10, %v6942_v62  ;;  %vm9135_vm10 = vcmask 785408  }
 0x107   :  { %674 = vmatprep.mubr.bf16.mxu1 %v7866_v8 }
 0x1c6   :  { %v352_v63 = vpop.f32.mrf.mxu1 }
 0x1c7   :  { %v353_v6 = vadd.f32 %v352_v63, %v294_v0 }
 0x1c8   :  { %v354_v4 = vpop.f32.mrf.mxu1 }
 0x1c9   :  { %v355_v5 = vadd.f32 %v354_v4, %v294_v0  ;;  %v601_v0 = vld [vmem:[%s9151_s25] sm:$0xff] }
 0x1ca   :  { %v356_v7 = vpop.f32.mrf.mxu1 }
 0x1cb   :  { %v362_v10 = vsel %vm361_vm11, %v355_v5, 0.0  ;;  %v357_v14 = vadd.f32 %v356_v7, %v299_v9  ;;  %v604_v7 = vld [vmem:[%s9151_s25 + $0x18] sm:$0xff] }
 0x1cc   :  { %v358_v11 = vpop.f32.mrf.mxu1  ;;  %v363_v12 = vadd.f32 %v362_v10, %v353_v6  ;;  %v7874_v10 = vmov 0.0  }
 0x1cd   :  { %v359_v13 = vadd.f32 %v358_v11, %v299_v9  ;;  %v710_v9 = vld [vmem:[#allocation10 + $0x78] sm:$0xff]  ;;  %734 = vmatprep.subr.mxu0 %v7874_v10  ;;  %v709_v11 = vld [vmem:[#allocation10 + $0x70] sm:$0xff] }
 0x1ce   :  { %364 = vadd.xlane.f32.xlu1 %v363_v12  ;;  %735 = vmatpush1.msra.mxu0 %v710_v9  ;;  %v708_v12 = vld [vmem:[#allocation10 + $0x68] sm:$0xff] }
 0x1cf   :  { %v366_v15 = vsel %vm361_vm11, %v359_v13, 0.0  ;;  %736 = vmatprep.subr.mxu0 %v7874_v10 }
 0x1d0   :  { %v367_v16 = vadd.f32 %v366_v15, %v357_v14  ;;  %737 = vmatpush1.msra.mxu0 %v709_v11  ;;  %v705_v15 = vld [vmem:[#allocation10 + $0x50] sm:$0xff] }
 0x1d1   :  { %738 = vmatprep.subr.mxu0 %v7874_v10 }
 0x1d2   :  { %368 = vadd.xlane.f32.xlu0 %v367_v16  ;;  %739 = vmatpush1.msra.mxu0 %v708_v12  ;;  %v704_v16 = vld [vmem:[#allocation10 + $0x48] sm:$0xff] }
 0x1d3   :  { %740 = vmatprep.subr.mxu0 %v7874_v10 }
 0x1df   :  { %407 = vperm.xlu1 %6476, %v399_v17   ;;  %v703_v17 = vld [vmem:[#allocation10 + $0x40] sm:$0xff] }
 0x1e8   :  { %402 = vperm.xlu0 %6475, %v398_v18   ;;  %v702_v18 = vld [vmem:[#allocation10 + $0x38] sm:$0xff] }
 0x257   :  { %v365_v19 = vpop.xlane.xlu1 %364 }
 0x258   :  { %v370_v20 = vmul.f32 0.005263158, %v365_v19  ;;  %v701_v19 = vld [vmem:[#allocation10 + $0x30] sm:$0xff] }
 0x25a   :  { %v372_v21 = vsub.f32 %v353_v6, %v370_v20  ;;  %v373_v22 = vsub.f32 %v355_v5, %v370_v20  ;;  %v603_v5 = vld [vmem:[%s9151_s25 + $0x10] sm:$0xff]  ;;  %v602_v6 = vld [vmem:[%s9151_s25 + $0x8] sm:$0xff]  ;;  %v700_v20 = vld [vmem:[#allocation10 + $0x28] sm:$0xff]  ;;  %s7892_s25 = smov [#allocation2]  }
 0x25b   :  { %v369_v23 = vpop.xlane.xlu0 %368  ;;  %v408_v38 = vpop.permute.xlu1 %407  ;;  %s187_s20 = sshll.u32 %s7892_s25, 4  ;;  %s188_s20 = int_to_ptr.vmem [resolvable:$true] %s187_s20 }
 0x25c   :  { %v371_v24 = vmul.f32 0.005263158, %v369_v23  ;;  %v376_v25 = vmul.f32 %v372_v21, %v372_v21  ;;  %v377_v26 = vmul.f32 %v373_v22, %v373_v22  ;;  %v697_v23 = vld [vmem:[#allocation10 + $0x10] sm:$0xff]  ;;  %p7807_p13 = scmp.lt.s32.totalorder %s188_s20, %s188_s20 }
 0x25e   :  { %v374_v27 = vsub.f32 %v357_v14, %v371_v24  ;;  %v375_v28 = vsub.f32 %v359_v13, %v371_v24  ;;  %v380_v29 = vsel %vm361_vm11, %v377_v26, 0.0  ;;  %v707_v13 = vld [vmem:[#allocation10 + $0x60] sm:$0xff]  ;;  %v706_v14 = vld [vmem:[#allocation10 + $0x58] sm:$0xff]  ;;  %v696_v24 = vld [vmem:[#allocation10 + $0x8] sm:$0xff] }
 0x25f   :  { %v381_v30 = vadd.f32 %v380_v29, %v376_v25  ;;  %741 = vmatpush1.msra.mxu0 %v707_v13  ;;  %v695_v25 = vld [vmem:[#allocation10] sm:$0xff]  ;;  %v717_v26 = vld [vmem:[#allocation10 + $0xb0] sm:$0x3]  ;;  %v714_v29 = vld [vmem:[#allocation10 + $0x98] sm:$0xff] }
 0x260   :  { %v378_v31 = vmul.f32 %v374_v27, %v374_v27  ;;  %v379_v32 = vmul.f32 %v375_v28, %v375_v28  ;;  %742 = vmatprep.subr.mxu0 %v7874_v10 }
 0x261   :  { %382 = vadd.xlane.f32.xlu0 %v381_v30  ;;  %743 = vmatpush1.msra.mxu0 %v706_v14 }
 0x262   :  { %v384_v33 = vsel %vm361_vm11, %v379_v32, 0.0  ;;  %744 = vmatprep.subr.mxu0 %v7874_v10  ;;  %vm1475_vm11 = vcmask 285696  }
 0x263   :  { %v385_v34 = vadd.f32 %v384_v33, %v378_v31  ;;  %v403_v37 = vpop.permute.xlu0 %402  ;;  %745 = vmatpush1.msra.mxu0 %v705_v15 }
 0x264   :  { %746 = vmatprep.subr.mxu0 %v7874_v10 }
 0x265   :  { %386 = vadd.xlane.f32.xlu1 %v385_v34  ;;  %747 = vmatpush1.msra.mxu0 %v704_v16 }
 0x266   :  { %748 = vmatprep.subr.mxu0 %v7874_v10 }
 0x267   :  { %749 = vmatpush1.msra.mxu0 %v703_v17 }
 0x268   :  { %750 = vmatprep.subr.mxu0 %v7874_v10 }
 0x269   :  { %751 = vmatpush1.msra.mxu0 %v702_v18 }
 0x26a   :  { %752 = vmatprep.subr.mxu0 %v7874_v10 }
 0x26b   :  { %753 = vmatpush1.msra.mxu0 %v701_v19 }
 0x26c   :  { %754 = vmatprep.subr.mxu0 %v7874_v10 }
 0x26d   :  { %755 = vmatpush1.msra.mxu0 %v700_v20 }
 0x26e   :  { %756 = vmatprep.subr.mxu0 %v7874_v10 }
 0x276   :  { %418 = vperm.xlu1 %6476, %v414_v35  }
 0x277   :  { %423 = vperm.xlu0 %6475, %v415_v36  }
 0x2ea   :  { %v383_v39 = vpop.xlane.xlu0 %382 }
 0x2eb   :  { %v388_v40 = vmul.f32 0.005263158, %v383_v39 }
 0x2ed   :  { %v390_v41 = vadd.f32 1e-05, %v388_v40 }
 0x2ee   :  { %v387_v42 = vpop.xlane.xlu1 %386 }
 0x2ef   :  { %6957 = vrsqrt.f32 %v390_v41  ;;  %v389_v43 = vmul.f32 0.005263158, %v387_v42 }
 0x2f1   :  { %v391_v44 = vadd.f32 1e-05, %v389_v43 }
 0x2f2   :  { %v419_v51 = vpop.permute.xlu1 %418  ;;  %v424_v59 = vpop.permute.xlu0 %423 }
 0x2f3   :  { %6959 = vrsqrt.f32 %v391_v44 }
 0x2fc   :  { %v6958_v45 = vpop.eup %6957 }
 0x2fd   :  { %v394_v46 = vmul.f32 %v6958_v45, %v372_v21  ;;  %v395_v47 = vmul.f32 %v6958_v45, %v373_v22  ;;  %v699_v21 = vld [vmem:[#allocation10 + $0x20] sm:$0xff]  ;;  %v698_v22 = vld [vmem:[#allocation10 + $0x18] sm:$0xff] }
 0x2fe   :  { %757 = vmatpush1.msra.mxu0 %v699_v21 }
 0x2ff   :  { %v410_v48 = vmul.f32 %v403_v37, %v394_v46  ;;  %v411_v49 = vmul.f32 %v403_v37, %v395_v47  ;;  %758 = vmatprep.subr.mxu0 %v7874_v10 }
 0x300   :  { %v6960_v50 = vpop.eup %6959  ;;  %759 = vmatpush1.msra.mxu0 %v698_v22 }
 0x301   :  { %v396_v52 = vmul.f32 %v6960_v50, %v374_v27  ;;  %v397_v53 = vmul.f32 %v6960_v50, %v375_v28  ;;  %v8119_v54 = vadd.f32 %v419_v51, %v410_v48  ;;  %v427_v55 = vadd.f32 %v419_v51, %v411_v49  ;;  %760 = vmatprep.subr.mxu0 %v7874_v10  ;;  %v716_v27 = vld [vmem:[#allocation10 + $0xa8] sm:$0xff]  ;;  %v715_v28 = vld [vmem:[#allocation10 + $0xa0] sm:$0xff] }
 0x302   :  { %761 = vmatpush1.msra.mxu0 %v697_v23 }
 0x303   :  { %v412_v56 = vmul.f32 %v408_v38, %v396_v52  ;;  %v413_v57 = vmul.f32 %v408_v38, %v397_v53  ;;  %v6482_v58 = vpack.i.bf16 %v427_v55, %v8119_v54  ;;  %762 = vmatprep.subr.mxu0 %v7874_v10 }
 0x304   :  { %763 = vmatpush1.msra.mxu0 %v696_v24 }
 0x305   :  { %6483 = vrot.lane.b32.xlu0 %v6482_v58, %s9133_s7  ;;  %6478 = vrot.lane.b32.xlu1 %v6482_v58, %s7871_s13  ;;  %v8124_v60 = vadd.f32 %v424_v59, %v412_v56  ;;  %v429_v61 = vadd.f32 %v424_v59, %v413_v57 }
 0x306   :  { %764 = vmatprep.subr.mxu0 %v7874_v10 }
 0x307   :  { %v6502_v62 = vpack.i.bf16 %v429_v61, %v8124_v60  ;;  %v6517_v63 = vpack.i.bf16 %v8124_v60, %v8119_v54  ;;  %v6567_v4 = vpack.i.bf16 %v429_v61, %v427_v55  ;;  %765 = vmatpush1.msra.mxu0 %v695_v25 }
 0x308   :  { %784 = vmatprep.subr.mxu0 %v7874_v10 }
 0x309   :  { %6493 = vrot.lane.b32.xlu0 %v6482_v58, %s7872_s28  ;;  %6488 = vrot.lane.b32.xlu1 %v6482_v58, %s9131_s6 }
 0x30a   :  { %5817 = vmatpush2.msk.msra.mxu0 %vm276_vm7, %v717_v26  ;;  %vm1012_vm7 = vcmask 64512  }
 0x30b   :  { %786 = vmatprep.subr.mxu0 %v7874_v10 }
 0x30c   :  { %787 = vmatpush2.msra.mxu0 %v716_v27 }
 0x30d   :  { %6503 = vrot.lane.b32.xlu0 %v6502_v62, %s7871_s13  ;;  %6498 = vrot.lane.b32.xlu1 %v6482_v58, %s7867_s26 }
 0x30e   :  { %788 = vmatprep.subr.mxu0 %v7874_v10 }
 0x30f   :  { %789 = vmatpush2.msra.mxu0 %v715_v28 }
 0x310   :  { %790 = vmatprep.subr.mxu0 %v7874_v10 }
 0x311   :  { %6518 = vrot.lane.b32.xlu0 %v6517_v63, %s7861_s19  ;;  %6508 = vrot.lane.b32.xlu1 %v6517_v63, %s7860_s4 }
 0x312   :  { %791 = vmatpush2.msra.mxu0 %v714_v29 }
 0x313   :  { %792 = vmatprep.subr.mxu0 %v7874_v10 }
 0x315   :  { %6523 = vrot.lane.b32.xlu0 %v6502_v62, %s9131_s6  ;;  %6513 = vrot.lane.b32.xlu1 %v6502_v62, %s9133_s7 }
 0x319   :  { %6538 = vrot.lane.b32.xlu0 %v6517_v63, %s7868_s27  ;;  %6528 = vrot.lane.b32.xlu1 %v6517_v63, %s7862_s3 }
 0x31d   :  { %6543 = vrot.lane.b32.xlu0 %v6502_v62, %s7867_s26  ;;  %6533 = vrot.lane.b32.xlu1 %v6502_v62, %s7872_s28 }
 0x321   :  { %6548 = vrot.lane.b32.xlu0 %v6482_v58, %s7864_s1  ;;  %6553 = vrot.lane.b32.xlu1 %v6517_v63, %s7865_s5 }
 0x325   :  { %6563 = vrot.lane.b32.xlu0 %v6517_v63, %s7863_s9  ;;  %6558 = vrot.lane.b32.xlu1 %v6502_v62, %s7864_s1 }
 0x329   :  { %607 = vperm.xlu0 %6475, %v601_v0   ;;  %6568 = vrot.lane.b32.xlu1 %v6567_v4, %s7860_s4 }
 0x32d   :  { %617 = vperm.xlu0 %6475, %v603_v5   ;;  %612 = vperm.xlu1 %6476, %v602_v6  }
 0x331   :  { %622 = vperm.xlu1 %6476, %v604_v7  }
 0x377   :  { %v6484_v30 = vpop.permute.xlu0 %6483  ;;  %v6479_v31 = vpop.permute.xlu1 %6478 }
 0x378   :  { %v6481_v36 = vunpack.i.h.bf16 %v6479_v31  ;;  %v6480_v38 = vunpack.i.l.bf16 %v6479_v31  ;;  %v6486_v49 = vunpack.i.h.bf16 %v6484_v30  ;;  %v6485_v50 = vunpack.i.l.bf16 %v6484_v30 }
 0x37a   :  { %v575_v45 = vsel %vm574_vm12, %v6480_v38, %v6481_v36  ;;  %v556_v5 = vsel %vm555_vm14, %v6485_v50, %v6486_v49 }
 0x37b   :  { %v8180_v32 = vpop.permute.xlu0 %6493  ;;  %v6489_v33 = vpop.permute.xlu1 %6488 }
 0x37c   :  { %v6491_v55 = vunpack.i.h.bf16 %v6489_v33  ;;  %v6490_v59 = vunpack.i.l.bf16 %v6489_v33  ;;  %v6496_v20 = vunpack.i.h.bf16 %v8180_v32  ;;  %v6495_v21 = vunpack.i.l.bf16 %v8180_v32 }
 0x37e   :  { %v533_v14 = vsel %vm532_vm15, %v6490_v59, %v6491_v55  ;;  %v510_v32 = vsel %vm509_vm0, %v6495_v21, %v6496_v20 }
 0x37f   :  { %v6504_v34 = vpop.permute.xlu0 %6503  ;;  %v8182_v35 = vpop.permute.xlu1 %6498 }
 0x380   :  { %v6506_v37 = vunpack.i.h.bf16 %v6504_v34  ;;  %v6505_v39 = vunpack.i.l.bf16 %v6504_v34  ;;  %v6501_v22 = vunpack.i.h.bf16 %v8182_v35  ;;  %v6500_v26 = vunpack.i.l.bf16 %v8182_v35 }
 0x382   :  { %v596_v40 = vpack.c.bf16 %v6506_v37, %v6481_v36  ;;  %v576_v46 = vsel %vm574_vm12, %v6505_v39, %v6506_v37  ;;  %vm1756_vm12 = vcmask 572416  }
 0x383   :  { %v6519_v41 = vpop.permute.xlu0 %6518  ;;  %v8184_v42 = vpop.permute.xlu1 %6508 }
 0x384   :  { %v6511_v43 = vunpack.i.h.bf16 %v8184_v42  ;;  %v6510_v44 = vunpack.i.l.bf16 %v8184_v42  ;;  %644 = vmatprep.subr.bf16.mxu1 %v596_v40  ;;  %v6520_v56 = vunpack.i.l.bf16 %v6519_v41  ;;  %v6521_v61 = vunpack.i.h.bf16 %v6519_v41  ;;  %v6944_v42 = vld [vmem:[#allocation4 + $0x8] sm:$0xff]  }
 0x385   :  { %v487_v40 = vsel %vm249_vm6, %v6500_v26, %v6501_v22 }
 0x386   :  { %v582_v47 = vsel %vm448_vm13, %v6511_v43, %v576_v46  ;;  %v581_v48 = vsel %vm448_vm13, %v6510_v44, %v575_v45  ;;  %v562_v11 = vsel %vm448_vm13, %v6520_v56, %v556_v5 }
 0x387   :  { %v6524_v51 = vpop.permute.xlu0 %6523  ;;  %v6514_v52 = vpop.permute.xlu1 %6513  ;;  %v595_v53 = vpack.c.bf16 %v582_v47, %v581_v48 }
 0x388   :  { %v6516_v57 = vunpack.i.h.bf16 %v6514_v52  ;;  %v6515_v58 = vunpack.i.l.bf16 %v6514_v52  ;;  %v6526_v62 = vunpack.i.h.bf16 %v6524_v51  ;;  %v6525_v63 = vunpack.i.l.bf16 %v6524_v51 }
 0x389   :  { %645 = vmatpush1.bf16.msra.mxu1 %v595_v53 }
 0x38a   :  { %v557_v0 = vsel %vm555_vm14, %v6515_v58, %v6516_v57  ;;  %v594_v4 = vpack.c.bf16 %v6516_v57, %v6486_v49  ;;  %v534_v15 = vsel %vm532_vm15, %v6525_v63, %v6526_v62  ;;  %v592_v19 = vpack.c.bf16 %v6526_v62, %v6491_v55 }
 0x38b   :  { %v6539_v6 = vpop.permute.xlu0 %6538  ;;  %v6529_v7 = vpop.permute.xlu1 %6528  ;;  %v563_v9 = vsel %vm448_vm13, %v6521_v61, %v557_v0  ;;  %vm1932_vm15 = vcmask 384000  }
 0x38c   :  { %v6531_v12 = vunpack.i.h.bf16 %v6529_v7  ;;  %v6530_v13 = vunpack.i.l.bf16 %v6529_v7  ;;  %646 = vmatprep.subr.bf16.mxu1 %v594_v4  ;;  %v593_v16 = vpack.c.bf16 %v563_v9, %v562_v11  ;;  %v6540_v27 = vunpack.i.l.bf16 %v6539_v6 }
 0x38d   :  { %v6541_v30 = vunpack.i.h.bf16 %v6539_v6 }
 0x38e   :  { %v540_v17 = vsel %vm448_vm13, %v6531_v12, %v534_v15  ;;  %v539_v18 = vsel %vm448_vm13, %v6530_v13, %v533_v14  ;;  %647 = vmatpush1.bf16.msra.mxu1 %v593_v16  ;;  %v516_v35 = vsel %vm448_vm13, %v6540_v27, %v510_v32 }
 0x38f   :  { %v6544_v23 = vpop.permute.xlu0 %6543  ;;  %v6534_v24 = vpop.permute.xlu1 %6533  ;;  %v591_v25 = vpack.c.bf16 %v540_v17, %v539_v18  ;;  %648 = vmatprep.subr.bf16.mxu1 %v592_v19  ;;  %v6943_v18 = vld [vmem:[#allocation4] sm:$0xff]  }
 0x390   :  { %v6536_v28 = vunpack.i.h.bf16 %v6534_v24  ;;  %v6535_v29 = vunpack.i.l.bf16 %v6534_v24  ;;  %v6546_v31 = vunpack.i.h.bf16 %v6544_v23  ;;  %v6545_v33 = vunpack.i.l.bf16 %v6544_v23 }
 0x392   :  { %v511_v34 = vsel %vm509_vm0, %v6535_v29, %v6536_v28  ;;  %v590_v36 = vpack.c.bf16 %v6536_v28, %v6496_v20  ;;  %649 = vmatpush1.bf16.msra.mxu1 %v591_v25  ;;  %v488_v46 = vsel %vm249_vm6, %v6545_v33, %v6546_v31  ;;  %v588_v52 = vpack.c.bf16 %v6546_v31, %v6501_v22 }
 0x393   :  { %v6549_v37 = vpop.permute.xlu0 %6548  ;;  %v6554_v38 = vpop.permute.xlu1 %6553  ;;  %v517_v39 = vsel %vm448_vm13, %v6541_v30, %v511_v34  ;;  %vm933_vm6 = vcmask 261120   ;;  %vm1928_vm0 = vcmask 859136  }
 0x394   :  { %v6556_v41 = vunpack.i.h.bf16 %v6554_v38  ;;  %v6555_v45 = vunpack.i.l.bf16 %v6554_v38  ;;  %650 = vmatprep.subr.bf16.mxu1 %v590_v36  ;;  %v6551_v47 = vunpack.i.h.bf16 %v6549_v37  ;;  %v6550_v48 = vunpack.i.l.bf16 %v6549_v37 }
 0x395   :  { %v589_v49 = vpack.c.bf16 %v517_v39, %v516_v35 }
 0x396   :  { %v494_v50 = vsel %vm448_vm13, %v6556_v41, %v488_v46  ;;  %v493_v51 = vsel %vm448_vm13, %v6555_v45, %v487_v40  ;;  %v465_v62 = vsel %vm240_vm5, %v6550_v48, %v6551_v47 }
 0x397   :  { %651 = vmatpush1.bf16.msra.mxu1 %v589_v49  ;;  %v6564_v53 = vpop.permute.xlu0 %6563  ;;  %v6559_v55 = vpop.permute.xlu1 %6558  ;;  %v587_v56 = vpack.c.bf16 %v494_v50, %v493_v51 }
 0x398   :  { %v6566_v57 = vunpack.i.h.bf16 %v6564_v53  ;;  %v6565_v58 = vunpack.i.l.bf16 %v6564_v53  ;;  %v6561_v59 = vunpack.i.h.bf16 %v6559_v55  ;;  %v6560_v61 = vunpack.i.l.bf16 %v6559_v55  ;;  %652 = vmatprep.subr.bf16.mxu1 %v588_v52  ;;  %v875_v53 = vld [vmem:[%s9152_s30 + $0x18] sm:$0xff] }
 0x399   :  { %v903_v55 = vld [vmem:[%s9153_s8 + $0x18] sm:$0xff] }
 0x39a   :  { %v471_v63 = vsel %vm448_vm13, %v6565_v58, %v465_v62  ;;  %v466_v0 = vsel %vm240_vm5, %v6560_v61, %v6561_v59  ;;  %v586_v4 = vpack.c.bf16 %v6561_v59, %v6551_v47  ;;  %v874_v58 = vld [vmem:[%s9152_s30 + $0x10] sm:$0xff]  ;;  %vm7875_vm5 = vmmov 0  }
 0x39b   :  { %653 = vmatpush1.bf16.msra.mxu1 %v587_v56  ;;  %v6569_v5 = vpop.permute.xlu1 %6568  ;;  %v472_v6 = vsel %vm448_vm13, %v6566_v57, %v466_v0  ;;  %v873_v56 = vld [vmem:[%s9152_s30 + $0x8] sm:$0xff]  ;;  %v872_v57 = vld [vmem:[%s9152_s30] sm:$0xff]  ;;  %v902_v59 = vld [vmem:[%s9153_s8 + $0x10] sm:$0xff]  ;;  %s7890_s30 = smov 13  }
 0x39c   :  { %v6571_v7 = vunpack.i.h.bf16 %v6569_v5  ;;  %v6570_v9 = vunpack.i.l.bf16 %v6569_v5  ;;  %654 = vmatprep.subr.bf16.mxu1 %v586_v4  ;;  %v585_v11 = vpack.c.bf16 %v472_v6, %v471_v63 }
 0x39e   :  { %v442_v12 = vsel %vm229_vm1, %v6510_v44, %v6570_v9  ;;  %v443_v13 = vsel %vm229_vm1, %v6511_v43, %v6571_v7  ;;  %v584_v14 = vpack.c.bf16 %v6571_v7, %v6570_v9  ;;  %v713_v43 = vld [vmem:[#allocation10 + $0x90] sm:$0xff]  ;;  %vm718_vm1 = vcmask 408576  }
 0x39f   :  { %655 = vmatpush1.bf16.msra.mxu1 %v585_v11  ;;  %v449_v15 = vsel %vm448_vm13, %v8119_v54, %v442_v12  ;;  %v450_v16 = vsel %vm448_vm13, %v8124_v60, %v443_v13  ;;  %793 = vmatpush2.msra.mxu0 %v713_v43  ;;  %v712_v54 = vld [vmem:[#allocation10 + $0x88] sm:$0xff]  ;;  %v711_v60 = vld [vmem:[#allocation10 + $0x80] sm:$0xff]  ;;  %vm1930_vm13 = vcmask 97280  }
 0x3a0   :  { %656 = vmatprep.subr.bf16.mxu1 %v584_v14  ;;  %v583_v17 = vpack.c.bf16 %v450_v16, %v449_v15  ;;  %794 = vmatprep.subr.mxu0 %v7874_v10 }
 0x3a1   :  { %795 = vmatpush2.msra.mxu0 %v712_v54 }
 0x3a2   :  { %796 = vmatprep.subr.mxu0 %v7874_v10 }
 0x3a3   :  { %657 = vmatpush1.bf16.msra.mxu1 %v583_v17  ;;  %797 = vmatpush2.msra.mxu0 %v711_v60  ;;  %v900_v60 = vld [vmem:[%s9153_s8] sm:$0xff] }
 0x3a4   :  { %6385 = vmatprep.subr.mxu1 %v7874_v10  ;;  %1703 = vmatprep.subr.bf16.mxu0 %v7866_v8  ;;  %v608_v19 = vpop.permute.xlu0 %607 }
 0x3a6   :  { %5815 = vmatmul.mubr.msk.bf16.vlgmr.msra.gmra.mxu1 %vm635_vm2, %v6943_v18 }
 0x3a7   :  { %684 = vmatprep.mubr.bf16.mxu1 %v7866_v8 }
 0x3a8   :  { %v613_v24 = vpop.permute.xlu1 %612  ;;  %v618_v29 = vpop.permute.xlu0 %617 }
 0x3ac   :  { %v623_v36 = vpop.permute.xlu1 %622 }
 0x3ae   :  { %5816 = vmatmul.mubr.msk.bf16.gmra.mxu1 %vm635_vm2, %v6944_v42  ;;  %vm1936_vm2 = vcmask 195584  }
 0x3af   :  { %6393 = vmatprep.mubr.msk.f32.mxu1 %vm7875_vm5, %v7874_v10  ;;  %vm1938_vm5 = vcmask 482304  }
 0x466   :  { %v676_v44 = vpop.f32.mrf.mxu1 }
 0x467   :  { %v677_v22 = vadd.f32 %v676_v44, %v608_v19  ;;  %v901_v44 = vld [vmem:[%s9153_s8 + $0x8] sm:$0xff]  ;;  %s7802_s8 = scalar_lea.vmem %s188_s20, 53760 }
 0x468   :  { %v678_v20 = vpop.f32.mrf.mxu1  ;;  %p7803_p12 = scmp.ne.s32.totalorder %s188_s20, %s7802_s8  ;;  %p7808_p0 = scmp.lt.s32.totalorder %s7802_s8, %s7802_s8 }
 0x469   :  { %v679_v21 = vadd.f32 %v678_v20, %v608_v19 }
 0x46a   :  { %v680_v23 = vpop.f32.mrf.mxu1  ;;  %p7809_p1 = por %p7808_p0, %p7807_p13 }
 0x46b   :  { %5818 = vmatprep.mubr.msk.f32.mxu0 %vm718_vm1, %v679_v21  ;;  %v681_v27 = vadd.f32 %v680_v23, %v613_v24 }
 0x46c   :  { %v682_v25 = vpop.f32.mrf.mxu1  ;;  %799 = vmatmul.mubr.f32.vlgmr.msra.gmra.mxu0 %v677_v22  ;;  %p7810_p2 = pnand %p7809_p1, %p7803_p12 }
 0x46d   :  { %v683_v26 = vadd.f32 %v682_v25, %v613_v24 }
 0x46e   :  { %v686_v28 = vpop.f32.mrf.mxu1 }
 0x46f   :  { %5819 = vmatprep.mubr.msk.f32.mxu0 %vm718_vm1, %v683_v26  ;;  %v687_v33 = vadd.f32 %v686_v28, %v618_v29 }
 0x470   :  { %v688_v30 = vpop.f32.mrf.mxu1  ;;  %804 = vmatmul.mubr.f32.gmra.mxu0 %v681_v27 }
 0x471   :  { %v689_v31 = vadd.f32 %v688_v30, %v618_v29 }
 0x472   :  { %v690_v34 = vpop.f32.mrf.mxu1 }
 0x473   :  { %5820 = vmatprep.mubr.msk.f32.mxu0 %vm718_vm1, %v689_v31  ;;  %v691_v38 = vadd.f32 %v690_v34, %v623_v36 }
 0x474   :  { %v692_v32 = vpop.f32.mrf.mxu1  ;;  %809 = vmatmul.mubr.f32.gmra.mxu0 %v687_v33 }
 0x475   :  { %v693_v37 = vadd.f32 %v692_v32, %v623_v36 }
 0x477   :  { %5821 = vmatprep.mubr.msk.f32.mxu0 %vm718_vm1, %v693_v37  ;;  %vm1942_vm1 = vcmask 7168  }
 0x478   :  { %814 = vmatmul.mubr.f32.gmra.mxu0 %v691_v38 }
 0x52c   :  { %v800_v39 = vpop.f32.mrf.mxu0 }
 0x52d   :  { %v820_v52 = vsel %vm819_vm3, %v800_v39, 0.0 }
 0x52e   :  { %v802_v40 = vpop.f32.mrf.mxu0 }
 0x530   :  { %v805_v35 = vpop.f32.mrf.mxu0 }
 0x531   :  { %v823_v51 = vsel %vm819_vm3, %v805_v35, 0.0 }
 0x532   :  { %v807_v41 = vpop.f32.mrf.mxu0 }
 0x534   :  { %v810_v45 = vpop.f32.mrf.mxu0 }
 0x535   :  { %v826_v46 = vsel %vm819_vm3, %v810_v45, 0.0 }
 0x536   :  { %827 = vadd.xlane.f32.xlu1 %v826_v46  ;;  %v812_v47 = vpop.f32.mrf.mxu0 }
 0x538   :  { %v815_v48 = vpop.f32.mrf.mxu0 }
 0x539   :  { %v829_v49 = vsel %vm819_vm3, %v815_v48, 0.0 }
 0x53a   :  { %830 = vadd.xlane.f32.xlu0 %v829_v49  ;;  %v817_v50 = vpop.f32.mrf.mxu0 }
 0x53e   :  { %824 = vadd.xlane.f32.xlu0 %v823_v51 }
 0x542   :  { %821 = vadd.xlane.f32.xlu0 %v820_v52 }
 0x547   :  { %893 = vperm.xlu1 %6476, %v875_v53  }
 0x54b   :  { %921 = vperm.xlu1 %6476, %v903_v55  }
 0x54f   :  { %883 = vperm.xlu1 %6476, %v873_v56  }
 0x553   :  { %878 = vperm.xlu1 %6476, %v872_v57  }
 0x558   :  { %888 = vperm.xlu0 %6475, %v874_v58  }
 0x55c   :  { %916 = vperm.xlu0 %6475, %v902_v59  }
 0x5bf   :  { %v828_v63 = vpop.xlane.xlu1 %827 }
 0x5c0   :  { %v834_v5 = vmul.f32 0.011111111, %v828_v63 }
 0x5c2   :  { %v838_v13 = vsub.f32 %v810_v45, %v834_v5 }
 0x5c3   :  { %v831_v61 = vpop.xlane.xlu0 %830  ;;  %v894_v19 = vpop.permute.xlu1 %893 }
 0x5c4   :  { %v835_v62 = vmul.f32 0.011111111, %v831_v61  ;;  %v842_v43 = vmul.f32 %v838_v13, %v838_v13 }
 0x5c6   :  { %v839_v6 = vsub.f32 %v815_v48, %v835_v62  ;;  %v850_v54 = vsel %vm819_vm3, %v842_v43, 0.0 }
 0x5c7   :  { %v825_v0 = vpop.xlane.xlu0 %824  ;;  %v922_v20 = vpop.permute.xlu1 %921 }
 0x5c8   :  { %v833_v4 = vmul.f32 0.011111111, %v825_v0  ;;  %v843_v16 = vmul.f32 %v839_v6, %v839_v6  ;;  %v928_v0 = vld [vmem:[#allocation12] sm:$0xff] }
 0x5ca   :  { %v837_v7 = vsub.f32 %v805_v35, %v833_v4  ;;  %v853_v18 = vsel %vm819_vm3, %v843_v16, 0.0  ;;  %v1008_v4 = vld [vmem:[#allocation13] sm:$0xff] }
 0x5cb   :  { %v822_v9 = vpop.xlane.xlu0 %821  ;;  %v884_v21 = vpop.permute.xlu1 %883 }
 0x5cc   :  { %v832_v11 = vmul.f32 0.011111111, %v822_v9  ;;  %v841_v12 = vmul.f32 %v837_v7, %v837_v7 }
 0x5ce   :  { %v836_v14 = vsub.f32 %v800_v39, %v832_v11  ;;  %v847_v15 = vsel %vm819_vm3, %v841_v12, 0.0  ;;  %v1009_v11 = vld [vmem:[#allocation13 + $0x8] sm:$0xff]  ;;  %v1010_v12 = vld [vmem:[#allocation13 + $0x10] sm:$0xff] }
 0x5cf   :  { %848 = vadd.xlane.f32.xlu1 %v847_v15  ;;  %v879_v23 = vpop.permute.xlu1 %878 }
 0x5d0   :  { %v840_v17 = vmul.f32 %v836_v14, %v836_v14 }
 0x5d2   :  { %v844_v42 = vsel %vm819_vm3, %v840_v17, 0.0  ;;  %vm1944_vm3 = vcmask 293888  }
 0x5d3   :  { %854 = vadd.xlane.f32.xlu1 %v853_v18  ;;  %845 = vadd.xlane.f32.xlu0 %v844_v42  ;;  %v889_v22 = vpop.permute.xlu0 %888 }
 0x5d7   :  { %851 = vadd.xlane.f32.xlu0 %v850_v54  ;;  %v917_v24 = vpop.permute.xlu0 %916 }
 0x5e4   :  { %906 = vperm.xlu1 %6476, %v900_v60  }
 0x5ed   :  { %911 = vperm.xlu0 %6475, %v901_v44   ;;  %v6947_v44 = vld [vmem:[#allocation7 + $0x4] ss:$8 sps:$4 sm:$0xff]  }
 0x658   :  { %v849_v25 = vpop.xlane.xlu1 %848 }
 0x659   :  { %v857_v26 = vmul.f32 0.011111111, %v849_v25 }
 0x65b   :  { %v861_v27 = vadd.f32 1e-05, %v857_v26 }
 0x65c   :  { %v855_v28 = vpop.xlane.xlu1 %854  ;;  %v846_v29 = vpop.xlane.xlu0 %845 }
 0x65d   :  { %v859_v30 = vmul.f32 0.011111111, %v855_v28  ;;  %v856_v31 = vmul.f32 0.011111111, %v846_v29  ;;  %6961 = vrsqrt.f32 %v861_v27 }
 0x65f   :  { %v863_v33 = vadd.f32 1e-05, %v859_v30  ;;  %v860_v34 = vadd.f32 1e-05, %v856_v31 }
 0x660   :  { %v852_v36 = vpop.xlane.xlu0 %851  ;;  %v907_v58 = vpop.permute.xlu1 %906 }
 0x661   :  { %6963 = vrsqrt.f32 %v863_v33  ;;  %v858_v32 = vmul.f32 0.011111111, %v852_v36 }
 0x662   :  { %6965 = vrsqrt.f32 %v860_v34 }
 0x663   :  { %v862_v37 = vadd.f32 1e-05, %v858_v32 }
 0x665   :  { %6967 = vrsqrt.f32 %v862_v37 }
 0x668   :  { %v912_v55 = vpop.permute.xlu0 %911 }
 0x66a   :  { %v6962_v38 = vpop.eup %6961 }
 0x66b   :  { %v869_v35 = vmul.f32 %v6962_v38, %v837_v7 }
 0x66d   :  { %v897_v48 = vmul.f32 %v884_v21, %v869_v35  ;;  %v1250_v21 = vld [vmem:[%s9110_s10 + $0x8] sm:$0xff] }
 0x66e   :  { %v6964_v39 = vpop.eup %6963 }
 0x66f   :  { %v6966_v40 = vpop.eup %6965  ;;  %v871_v41 = vmul.f32 %v6964_v39, %v839_v6  ;;  %v925_v56 = vadd.f32 %v912_v55, %v897_v48 }
 0x670   :  { %v868_v45 = vmul.f32 %v6966_v40, %v836_v14 }
 0x671   :  { %v899_v46 = vmul.f32 %v894_v19, %v871_v41  ;;  %v930_v62 = vmul.f32 %v925_v56, %v925_v56  ;;  %v1252_v19 = vld [vmem:[%s9110_s10 + $0x18] sm:$0xff] }
 0x672   :  { %v6968_v47 = vpop.eup %6967  ;;  %v896_v51 = vmul.f32 %v879_v23, %v868_v45 }
 0x673   :  { %v927_v49 = vadd.f32 %v922_v20, %v899_v46  ;;  %v870_v50 = vmul.f32 %v6968_v47, %v838_v13  ;;  %v1251_v20 = vld [vmem:[%s9110_s10 + $0x10] sm:$0xff] }
 0x674   :  { %v924_v59 = vadd.f32 %v907_v58, %v896_v51 }
 0x675   :  { %v932_v52 = vmul.f32 %v927_v49, %v927_v49  ;;  %v898_v53 = vmul.f32 %v889_v22, %v870_v50  ;;  %v1249_v22 = vld [vmem:[%s9110_s10] sm:$0xff] }
 0x676   :  { %v929_v63 = vmul.f32 %v924_v59, %v924_v59 }
 0x677   :  { %6386 = vmatpush3.msra.mxu1 %v932_v52  ;;  %v926_v57 = vadd.f32 %v917_v24, %v898_v53 }
 0x678   :  { %6387 = vmatprep.subr.mxu1 %v7874_v10 }
 0x679   :  { %v931_v61 = vmul.f32 %v926_v57, %v926_v57 }
 0x67b   :  { %6388 = vmatpush3.msra.mxu1 %v931_v61 }
 0x67c   :  { %6389 = vmatprep.subr.mxu1 %v7874_v10 }
 0x67d   :  { %6390 = vmatpush3.msra.mxu1 %v930_v62 }
 0x67e   :  { %6391 = vmatprep.subr.mxu1 %v7874_v10  ;;  %v1011_v10 = vld [vmem:[#allocation13 + $0x18] sm:$0xff] }
 0x67f   :  { %6392 = vmatpush3.msra.mxu1 %v929_v63 }
 0x680   :  { %6394 = vmatmul.mubr.msk.f32.vlgmr.msra.gmra.mxu1 %vm933_vm6, %v928_v0 }
 0x681   :  { %6398 = vmatprep.mubr.msk.f32.mxu1 %vm1012_vm7, %v1008_v4 }
 0x740   :  { %v1003_v5 = vpop.f32.mrf.mxu1 }
 0x741   :  { %v1004_v6 = vadd.f32 0.0001, %v1003_v5 }
 0x742   :  { %v6395_v7 = vpop.f32.mrf.mxu1 }
 0x743   :  { %6969 = vrsqrt.f32 %v1004_v6 }
 0x750   :  { %v6970_v9 = vpop.eup %6969 }
 0x751   :  { %6396 = vmatprep.subr.mxu1 %v6970_v9 }
 0x752   :  { %6397 = vmatpush3.msra.mxu1 %v6970_v9 }
 0x753   :  { %6399 = vmatmul.mubr.msk.f32.vlgmr.msra.gmra.mxu1 %vm1012_vm7, %v1009_v11  ;;  %1297 = vmatprep.subr.bf16.mxu1 %v7866_v8 }
 0x754   :  { %6401 = vmatprep.mubr.msk.f32.mxu1 %vm1012_vm7, %v1010_v12 }
 0x757   :  { %6402 = vmatmul.mubr.msk.f32.gmra.mxu1 %vm1012_vm7, %v1011_v10  ;;  %vm1946_vm7 = vcmask 580608  }
 0x758   :  { %5831 = vmatprep.mubr.msk.bf16.mxu1 %vm933_vm6, %v6947_v44 }
 0x813   :  { %v6400_v13 = vpop.f32.mrf.mxu1 }
 0x814   :  { %v8281_v54 = vmul.f32 %v6400_v13, %v925_v56 }
 0x815   :  { %v1091_v14 = vpop.f32.mrf.mxu1 }
 0x816   :  { %v8277_v42 = vmul.f32 %v1091_v14, %v924_v59 }
 0x817   :  { %v6403_v15 = vpop.f32.mrf.mxu1 }
 0x818   :  { %v8273_v17 = vmul.f32 %v6403_v15, %v927_v49  ;;  %v6587_v60 = vpack.i.bf16 %v8281_v54, %v8277_v42 }
 0x819   :  { %v1101_v16 = vpop.f32.mrf.mxu1 }
 0x81a   :  { %v8275_v18 = vmul.f32 %v1101_v16, %v926_v57 }
 0x81c   :  { %v6582_v43 = vpack.i.bf16 %v8273_v17, %v8275_v18 }
 0x81e   :  { %6583 = vrot.lane.b32.xlu1 %v6582_v43, %s7864_s1  ;;  %6573 = vrot.lane.b32.xlu0 %v6582_v43, %s7868_s27 }
 0x822   :  { %6588 = vrot.lane.b32.xlu1 %v6587_v60, %s7864_s1  ;;  %6578 = vrot.lane.b32.xlu0 %v6587_v60, %s7868_s27 }
 0x826   :  { %6603 = vrot.lane.b32.xlu1 %v6582_v43, %s7860_s4  ;;  %6593 = vrot.lane.b32.xlu0 %v6582_v43, %s7865_s5 }
 0x82a   :  { %6608 = vrot.lane.b32.xlu1 %v6587_v60, %s7860_s4  ;;  %6598 = vrot.lane.b32.xlu0 %v6587_v60, %s7865_s5 }
 0x82e   :  { %6623 = vrot.lane.b32.xlu1 %v6582_v43, %s7861_s19  ;;  %6613 = vrot.lane.b32.xlu0 %v6582_v43, %s7863_s9 }
 0x832   :  { %6628 = vrot.lane.b32.xlu1 %v6587_v60, %s7861_s19  ;;  %6618 = vrot.lane.b32.xlu0 %v6587_v60, %s7863_s9 }
 0x836   :  { %6638 = vrot.lane.b32.xlu1 %v6587_v60, %s7862_s3  ;;  %6633 = vrot.lane.b32.xlu0 %v6582_v43, %s7862_s3 }
 0x83a   :  { %6648 = vrot.lane.b32.xlu1 %v6587_v60, %s7867_s26  ;;  %6643 = vrot.lane.b32.xlu0 %v6582_v43, %s7867_s26 }
 0x83e   :  { %1270 = vperm.xlu1 %6476, %v1252_v19   ;;  %1265 = vperm.xlu0 %6475, %v1251_v20  }
 0x842   :  { %1260 = vperm.xlu1 %6476, %v1250_v21   ;;  %1255 = vperm.xlu0 %6475, %v1249_v22  }
 0x890   :  { %v6584_v23 = vpop.permute.xlu1 %6583  ;;  %v6574_v24 = vpop.permute.xlu0 %6573 }
 0x891   :  { %v6586_v25 = vunpack.i.h.bf16 %v6584_v23  ;;  %v6585_v26 = vunpack.i.l.bf16 %v6584_v23  ;;  %v6576_v27 = vunpack.i.h.bf16 %v6574_v24  ;;  %v6575_v28 = vunpack.i.l.bf16 %v6574_v24 }
 0x893   :  { %v1218_v29 = vsel %vm1130_vm8, %v6576_v27, %v6586_v25  ;;  %v1217_v30 = vsel %vm1130_vm8, %v6575_v28, %v6585_v26 }
 0x894   :  { %v6589_v31 = vpop.permute.xlu1 %6588  ;;  %v6579_v33 = vpop.permute.xlu0 %6578  ;;  %v1242_v34 = vpack.c.bf16 %v1218_v29, %v1217_v30 }
 0x895   :  { %v6591_v36 = vunpack.i.h.bf16 %v6589_v31  ;;  %v6590_v32 = vunpack.i.l.bf16 %v6589_v31  ;;  %v6581_v37 = vunpack.i.h.bf16 %v6579_v33  ;;  %v6580_v38 = vunpack.i.l.bf16 %v6579_v33 }
 0x896   :  { %1298 = vmatpush1.bf16.msra.mxu1 %v1242_v34 }
 0x897   :  { %v1216_v39 = vsel %vm1130_vm8, %v6581_v37, %v6591_v36  ;;  %v1215_v40 = vsel %vm1130_vm8, %v6580_v38, %v6590_v32  ;;  %1299 = vmatprep.subr.bf16.mxu1 %v7866_v8 }
 0x898   :  { %v6604_v35 = vpop.permute.xlu1 %6603  ;;  %v6594_v41 = vpop.permute.xlu0 %6593  ;;  %v1241_v45 = vpack.c.bf16 %v1216_v39, %v1215_v40 }
 0x899   :  { %v6606_v46 = vunpack.i.h.bf16 %v6604_v35  ;;  %v6605_v47 = vunpack.i.l.bf16 %v6604_v35  ;;  %v6596_v48 = vunpack.i.h.bf16 %v6594_v41  ;;  %v6595_v49 = vunpack.i.l.bf16 %v6594_v41  ;;  %v6945_v41 = vld [vmem:[#allocation7] ss:$8 sps:$4 sm:$0xff]  }
 0x89a   :  { %1300 = vmatpush1.bf16.msra.mxu1 %v1241_v45  ;;  %v6948_v45 = vld [vmem:[#allocation7 + $0x14] ss:$8 sps:$4 sm:$0xff]  }
 0x89b   :  { %v1190_v50 = vsel %vm1130_vm8, %v6596_v48, %v6606_v46  ;;  %v1189_v51 = vsel %vm1130_vm8, %v6595_v49, %v6605_v47  ;;  %1301 = vmatprep.subr.bf16.mxu1 %v7866_v8  ;;  %v6950_v46 = vld [vmem:[#allocation7 + $0x10] ss:$8 sps:$4 sm:$0xff]  }
 0x89c   :  { %v6609_v52 = vpop.permute.xlu1 %6608  ;;  %v6599_v53 = vpop.permute.xlu0 %6598  ;;  %v1240_v55 = vpack.c.bf16 %v1190_v50, %v1189_v51 }
 0x89d   :  { %v6611_v56 = vunpack.i.h.bf16 %v6609_v52  ;;  %v6610_v57 = vunpack.i.l.bf16 %v6609_v52  ;;  %v6601_v58 = vunpack.i.h.bf16 %v6599_v53  ;;  %v6600_v59 = vunpack.i.l.bf16 %v6599_v53 }
 0x89e   :  { %1302 = vmatpush1.bf16.msra.mxu1 %v1240_v55 }
 0x89f   :  { %v1188_v61 = vsel %vm1130_vm8, %v6601_v58, %v6611_v56  ;;  %v1187_v62 = vsel %vm1130_vm8, %v6600_v59, %v6610_v57  ;;  %1303 = vmatprep.subr.bf16.mxu1 %v7866_v8 }
 0x8a0   :  { %v6624_v63 = vpop.permute.xlu1 %6623  ;;  %v6614_v0 = vpop.permute.xlu0 %6613  ;;  %v1239_v4 = vpack.c.bf16 %v1188_v61, %v1187_v62 }
 0x8a1   :  { %v6626_v5 = vunpack.i.h.bf16 %v6624_v63  ;;  %v6625_v6 = vunpack.i.l.bf16 %v6624_v63  ;;  %v6616_v7 = vunpack.i.h.bf16 %v6614_v0  ;;  %v6615_v9 = vunpack.i.l.bf16 %v6614_v0 }
 0x8a2   :  { %1304 = vmatpush1.bf16.msra.mxu1 %v1239_v4 }
 0x8a3   :  { %v1162_v11 = vsel %vm1130_vm8, %v6616_v7, %v6626_v5  ;;  %v1161_v12 = vsel %vm1130_vm8, %v6615_v9, %v6625_v6  ;;  %1305 = vmatprep.subr.bf16.mxu1 %v7866_v8 }
 0x8a4   :  { %v6629_v10 = vpop.permute.xlu1 %6628  ;;  %v6619_v13 = vpop.permute.xlu0 %6618  ;;  %v1238_v14 = vpack.c.bf16 %v1162_v11, %v1161_v12 }
 0x8a5   :  { %v6631_v15 = vunpack.i.h.bf16 %v6629_v10  ;;  %v6630_v16 = vunpack.i.l.bf16 %v6629_v10  ;;  %v6621_v43 = vunpack.i.h.bf16 %v6619_v13  ;;  %v6620_v60 = vunpack.i.l.bf16 %v6619_v13  ;;  %v1405_v13 = vld [vmem:[%s9111_s11 + $0x10] sm:$0xff] }
 0x8a6   :  { %1306 = vmatpush1.bf16.msra.mxu1 %v1238_v14  ;;  %v1433_v14 = vld [vmem:[%s9112_s12 + $0x10] sm:$0xff] }
 0x8a7   :  { %v1160_v44 = vsel %vm1130_vm8, %v6621_v43, %v6631_v15  ;;  %v1159_v19 = vsel %vm1130_vm8, %v6620_v60, %v6630_v16  ;;  %1307 = vmatprep.subr.bf16.mxu1 %v7866_v8  ;;  %v1434_v15 = vld [vmem:[%s9112_s12 + $0x18] sm:$0xff] }
 0x8a8   :  { %v6639_v20 = vpop.permute.xlu1 %6638  ;;  %v6634_v21 = vpop.permute.xlu0 %6633  ;;  %v1237_v22 = vpack.c.bf16 %v1160_v44, %v1159_v19  ;;  %v1406_v16 = vld [vmem:[%s9111_s11 + $0x18] sm:$0xff] }
 0x8a9   :  { %v6641_v23 = vunpack.i.h.bf16 %v6639_v20  ;;  %v6640_v24 = vunpack.i.l.bf16 %v6639_v20  ;;  %v6636_v25 = vunpack.i.h.bf16 %v6634_v21  ;;  %v6635_v26 = vunpack.i.l.bf16 %v6634_v21 }
 0x8aa   :  { %1308 = vmatpush1.bf16.msra.mxu1 %v1237_v22 }
 0x8ab   :  { %v1134_v27 = vsel %vm1130_vm8, %v8273_v17, %v6636_v25  ;;  %v1133_v28 = vsel %vm1130_vm8, %v8275_v18, %v6635_v26  ;;  %1309 = vmatprep.subr.bf16.mxu1 %v7866_v8  ;;  %v1132_v31 = vsel %vm1130_vm8, %v8281_v54, %v6641_v23  ;;  %v1131_v33 = vsel %vm1130_vm8, %v8277_v42, %v6640_v24 }
 0x8ac   :  { %v6644_v29 = vpop.permute.xlu0 %6643  ;;  %v1236_v30 = vpack.c.bf16 %v1134_v27, %v1133_v28  ;;  %v6649_v32 = vpop.permute.xlu1 %6648  ;;  %v1235_v17 = vpack.c.bf16 %v1132_v31, %v1131_v33 }
 0x8ad   :  { %v6646_v34 = vunpack.i.h.bf16 %v6644_v29  ;;  %v6645_v36 = vunpack.i.l.bf16 %v6644_v29  ;;  %v6651_v37 = vunpack.i.h.bf16 %v6649_v32  ;;  %v6650_v38 = vunpack.i.l.bf16 %v6649_v32 }
 0x8ae   :  { %1310 = vmatpush1.bf16.msra.mxu1 %v1236_v30 }
 0x8af   :  { %1311 = vmatprep.subr.bf16.mxu1 %v7866_v8  ;;  %v1233_v18 = vsel %vm1130_vm8, %v6635_v26, %v6645_v36  ;;  %v1234_v39 = vsel %vm1130_vm8, %v6636_v25, %v6646_v34  ;;  %v1231_v40 = vsel %vm1130_vm8, %v6640_v24, %v6650_v38  ;;  %v1232_v42 = vsel %vm1130_vm8, %v6641_v23, %v6651_v37  ;;  %v1432_v37 = vld [vmem:[%s9112_s12 + $0x8] sm:$0xff]  ;;  %v1403_v38 = vld [vmem:[%s9111_s11] sm:$0xff] }
 0x8b0   :  { %v1244_v54 = vpack.c.bf16 %v1234_v39, %v1233_v18  ;;  %v1243_v35 = vpack.c.bf16 %v1232_v42, %v1231_v40  ;;  %v1431_v18 = vld [vmem:[%s9112_s12] sm:$0xff]  ;;  %s9155_s12 = smov 118   ;;  %vm1948_vm8 = vcmask 867328  }
 0x8b2   :  { %1312 = vmatpush1.bf16.msra.mxu1 %v1235_v17  ;;  %v1404_v17 = vld [vmem:[%s9111_s11 + $0x8] sm:$0xff]  ;;  %s9154_s11 = smov 117  }
 0x8b3   :  { %1325 = vmatprep.subr.bf16.mxu1 %v7866_v8 }
 0x8b6   :  { %1326 = vmatpush2.bf16.msra.mxu1 %v1244_v54 }
 0x8b7   :  { %1327 = vmatprep.subr.bf16.mxu1 %v7866_v8 }
 0x8b9   :  { %v1266_v48 = vpop.permute.xlu0 %1265  ;;  %v1271_v51 = vpop.permute.xlu1 %1270 }
 0x8ba   :  { %1328 = vmatpush2.bf16.msra.mxu1 %v1243_v35 }
 0x8bd   :  { %1330 = vmatmul.mubr.bf16.vlgmr.msra.gmra.mxu1 %v6945_v41  ;;  %v1256_v53 = vpop.permute.xlu0 %1255  ;;  %v1261_v61 = vpop.permute.xlu1 %1260 }
 0x8be   :  { %5832 = vmatprep.mubr.msk.bf16.mxu1 %vm933_vm6, %v6948_v45  ;;  %vm1940_vm6 = vcmask 769024  }
 0x8c5   :  { %1338 = vmatmul.mubr.bf16.gmra.mxu1 %v6950_v46 }
 0x97d   :  { %v1331_v47 = vpop.f32.mrf.mxu1 }
 0x97e   :  { %v1332_v56 = vadd.f32 %v1331_v47, %v1256_v53 }
 0x97f   :  { %v1333_v49 = vpop.f32.mrf.mxu1 }
 0x980   :  { %v1346_v63 = vmax.f32 %v1332_v56, 0.0 }
 0x981   :  { %v1334_v50 = vpop.f32.mrf.mxu1 }
 0x982   :  { %v1335_v0 = vadd.f32 %v1334_v50, %v1261_v61  ;;  %v1351_v12 = vsel %vm1350_vm9, %v1346_v63, 0.0 }
 0x983   :  { %v1336_v52 = vpop.f32.mrf.mxu1 }
 0x984   :  { %v1347_v9 = vmax.f32 %v1335_v0, 0.0 }
 0x985   :  { %v1339_v55 = vpop.f32.mrf.mxu1 }
 0x986   :  { %v1340_v57 = vadd.f32 %v1339_v55, %v1266_v48  ;;  %v1354_v10 = vsel %vm1350_vm9, %v1347_v9, 0.0 }
 0x987   :  { %v1341_v58 = vpop.f32.mrf.mxu1 }
 0x988   :  { %v1348_v59 = vmax.f32 %v1340_v57, 0.0 }
 0x989   :  { %v1342_v62 = vpop.f32.mrf.mxu1 }
 0x98a   :  { %v1343_v4 = vadd.f32 %v1342_v62, %v1271_v51  ;;  %v1357_v5 = vsel %vm1350_vm9, %v1348_v59, 0.0 }
 0x98b   :  { %1358 = vadd.xlane.f32.xlu0 %v1357_v5  ;;  %v1344_v6 = vpop.f32.mrf.mxu1 }
 0x98c   :  { %v1349_v7 = vmax.f32 %v1343_v4, 0.0 }
 0x98e   :  { %v1360_v11 = vsel %vm1350_vm9, %v1349_v7, 0.0 }
 0x98f   :  { %1361 = vadd.xlane.f32.xlu1 %v1360_v11  ;;  %1352 = vadd.xlane.f32.xlu0 %v1351_v12 }
 0x993   :  { %1355 = vadd.xlane.f32.xlu0 %v1354_v10 }
 0x9a0   :  { %1419 = vperm.xlu1 %6476, %v1405_v13  }
 0x9a4   :  { %1447 = vperm.xlu1 %6476, %v1433_v14  }
 0x9a8   :  { %1452 = vperm.xlu1 %6476, %v1434_v15  }
 0x9a9   :  { %1424 = vperm.xlu0 %6475, %v1406_v16  }
 0xa14   :  { %v1359_v43 = vpop.xlane.xlu0 %1358 }
 0xa15   :  { %v1365_v60 = vmul.f32 0.0121951215, %v1359_v43 }
 0xa17   :  { %v1369_v21 = vsub.f32 %v1348_v59, %v1365_v60 }
 0xa18   :  { %v1362_v44 = vpop.xlane.xlu1 %1361  ;;  %v1353_v19 = vpop.xlane.xlu0 %1352 }
 0xa19   :  { %v1363_v20 = vmul.f32 0.0121951215, %v1353_v19  ;;  %v1366_v22 = vmul.f32 0.0121951215, %v1362_v44  ;;  %v1373_v30 = vmul.f32 %v1369_v21, %v1369_v21  ;;  %v6953_v44 = vld [vmem:[#allocation9 + $0x4] ss:$8 sps:$4 sm:$0xff]  }
 0xa1a   :  { %v1657_v19 = vld [vmem:[%s9114_s14 + $0x18] sm:$0xff]  ;;  %5837 = vmatprep.mubr.msk.bf16.mxu0 %vm9135_vm10, %v6953_v44 }
 0xa1b   :  { %v1367_v23 = vsub.f32 %v1346_v63, %v1363_v20  ;;  %v1370_v27 = vsub.f32 %v1349_v7, %v1366_v22  ;;  %v1381_v33 = vsel %vm1350_vm9, %v1373_v30, 0.0  ;;  %v1656_v20 = vld [vmem:[%s9114_s14 + $0x10] sm:$0xff]  ;;  %v1654_v22 = vld [vmem:[%s9114_s14] sm:$0xff] }
 0xa1c   :  { %v1356_v24 = vpop.xlane.xlu0 %1355  ;;  %v1420_v39 = vpop.permute.xlu1 %1419 }
 0xa1d   :  { %v1364_v25 = vmul.f32 0.0121951215, %v1356_v24  ;;  %v1371_v26 = vmul.f32 %v1367_v23, %v1367_v23  ;;  %v1374_v36 = vmul.f32 %v1370_v27, %v1370_v27 }
 0xa1f   :  { %v1368_v28 = vsub.f32 %v1347_v9, %v1364_v25  ;;  %v1375_v29 = vsel %vm1350_vm9, %v1371_v26, 0.0  ;;  %v1384_v32 = vsel %vm1350_vm9, %v1374_v36, 0.0 }
 0xa20   :  { %1376 = vadd.xlane.f32.xlu1 %v1375_v29  ;;  %v1448_v54 = vpop.permute.xlu1 %1447 }
 0xa21   :  { %v1372_v31 = vmul.f32 %v1368_v28, %v1368_v28 }
 0xa23   :  { %v1378_v34 = vsel %vm1350_vm9, %v1372_v31, 0.0 }
 0xa24   :  { %1382 = vadd.xlane.f32.xlu1 %v1381_v33  ;;  %1379 = vadd.xlane.f32.xlu0 %v1378_v34  ;;  %v1453_v40 = vpop.permute.xlu1 %1452  ;;  %v1425_v42 = vpop.permute.xlu0 %1424 }
 0xa28   :  { %1385 = vadd.xlane.f32.xlu0 %v1384_v32 }
 0xa35   :  { %1414 = vperm.xlu1 %6476, %v1404_v17  }
 0xa39   :  { %1442 = vperm.xlu1 %6476, %v1432_v37  }
 0xa3e   :  { %1409 = vperm.xlu0 %6475, %v1403_v38  }
 0xa42   :  { %1437 = vperm.xlu0 %6475, %v1431_v18  }
 0xaa9   :  { %v1377_v35 = vpop.xlane.xlu1 %1376 }
 0xaaa   :  { %v1387_v41 = vmul.f32 0.0121951215, %v1377_v35 }
 0xaac   :  { %v1391_v49 = vadd.f32 1e-05, %v1387_v41 }
 0xaad   :  { %v1383_v45 = vpop.xlane.xlu1 %1382  ;;  %v1380_v46 = vpop.xlane.xlu0 %1379 }
 0xaae   :  { %v1389_v47 = vmul.f32 0.0121951215, %v1383_v45  ;;  %v1388_v48 = vmul.f32 0.0121951215, %v1380_v46 }
 0xab0   :  { %v1393_v50 = vadd.f32 1e-05, %v1389_v47  ;;  %v1392_v51 = vadd.f32 1e-05, %v1388_v48 }
 0xab1   :  { %v1386_v52 = vpop.xlane.xlu0 %1385  ;;  %v1415_v63 = vpop.permute.xlu1 %1414 }
 0xab2   :  { %6971 = vrsqrt.f32 %v1393_v50  ;;  %v1390_v53 = vmul.f32 0.0121951215, %v1386_v52 }
 0xab3   :  { %6973 = vrsqrt.f32 %v1392_v51 }
 0xab4   :  { %6975 = vrsqrt.f32 %v1391_v49  ;;  %v1394_v55 = vadd.f32 1e-05, %v1390_v53 }
 0xab5   :  { %v1443_v13 = vpop.permute.xlu1 %1442 }
 0xab6   :  { %6977 = vrsqrt.f32 %v1394_v55 }
 0xab9   :  { %v1410_v6 = vpop.permute.xlu0 %1409 }
 0xabd   :  { %v1438_v16 = vpop.permute.xlu0 %1437 }
 0xabf   :  { %v6972_v56 = vpop.eup %6971 }
 0xac0   :  { %v6974_v57 = vpop.eup %6973  ;;  %v1401_v58 = vmul.f32 %v6972_v56, %v1369_v21  ;;  %v1655_v21 = vld [vmem:[%s9114_s14 + $0x8] sm:$0xff]  ;;  %s7887_s14 = smov 1  }
 0xac1   :  { %v6976_v59 = vpop.eup %6975  ;;  %v1400_v61 = vmul.f32 %v6974_v57, %v1368_v28 }
 0xac2   :  { %v1429_v0 = vmul.f32 %v1420_v39, %v1401_v58  ;;  %v1399_v5 = vmul.f32 %v6976_v59, %v1367_v23 }
 0xac3   :  { %v6978_v62 = vpop.eup %6977  ;;  %v1428_v7 = vmul.f32 %v1415_v63, %v1400_v61 }
 0xac4   :  { %v1402_v4 = vmul.f32 %v6978_v62, %v1370_v27  ;;  %v8380_v11 = vadd.f32 %v1448_v54, %v1429_v0  ;;  %v1427_v10 = vmul.f32 %v1410_v6, %v1399_v5 }
 0xac5   :  { %v8384_v14 = vadd.f32 %v1443_v13, %v1428_v7 }
 0xac6   :  { %v1430_v9 = vmul.f32 %v1425_v42, %v1402_v4  ;;  %v8388_v43 = vadd.f32 %v1438_v16, %v1427_v10 }
 0xac8   :  { %v8382_v12 = vadd.f32 %v1453_v40, %v1430_v9  ;;  %v6667_v60 = vpack.i.bf16 %v8384_v14, %v8388_v43 }
 0xaca   :  { %v6662_v15 = vpack.i.bf16 %v8382_v12, %v8380_v11 }
 0xacc   :  { %6663 = vrot.lane.b32.xlu1 %v6662_v15, %s7872_s28  ;;  %6653 = vrot.lane.b32.xlu0 %v6662_v15, %s7868_s27 }
 0xad0   :  { %6668 = vrot.lane.b32.xlu1 %v6667_v60, %s7872_s28  ;;  %6658 = vrot.lane.b32.xlu0 %v6667_v60, %s7868_s27  ;;  %s7885_s27 = smov 59   ;;  %s7889_s28 = smov 71  }
 0xad4   :  { %6683 = vrot.lane.b32.xlu1 %v6662_v15, %s7867_s26  ;;  %6673 = vrot.lane.b32.xlu0 %v6662_v15, %s7865_s5 }
 0xad8   :  { %6688 = vrot.lane.b32.xlu1 %v6667_v60, %s7867_s26  ;;  %6678 = vrot.lane.b32.xlu0 %v6667_v60, %s7865_s5  ;;  %s7882_s5 = smov 82   ;;  %s7884_s26 = smov 35  }
 0xadc   :  { %6703 = vrot.lane.b32.xlu1 %v6662_v15, %s7864_s1  ;;  %6693 = vrot.lane.b32.xlu0 %v6662_v15, %s7863_s9 }
 0xae0   :  { %6708 = vrot.lane.b32.xlu1 %v6667_v60, %s7864_s1  ;;  %6698 = vrot.lane.b32.xlu0 %v6667_v60, %s7863_s9  ;;  %s7880_s9 = smov 105   ;;  %s7881_s1 = smov 36  }
 0xae4   :  { %6718 = vrot.lane.b32.xlu1 %v6667_v60, %s7860_s4  ;;  %6713 = vrot.lane.b32.xlu0 %v6662_v15, %s7860_s4  ;;  %s7879_s4 = smov 47  }
 0xae8   :  { %6728 = vrot.lane.b32.xlu1 %v6667_v60, %s7871_s13  ;;  %6723 = vrot.lane.b32.xlu0 %v6662_v15, %s7871_s13  ;;  %s7888_s13 = smov 24  }
 0xaec   :  { %6743 = vrot.lane.b32.xlu1 %v6662_v15, %s9154_s11  ;;  %6733 = vrot.lane.b32.xlu0 %v6662_v15, %s7861_s19 }
 0xaf0   :  { %6748 = vrot.lane.b32.xlu1 %v6667_v60, %s9154_s11  ;;  %6738 = vrot.lane.b32.xlu0 %v6667_v60, %s7861_s19  ;;  %s7883_s19 = smov 106  }
 0xaf4   :  { %6763 = vrot.lane.b32.xlu1 %v6662_v15, %s9155_s12  ;;  %6753 = vrot.lane.b32.xlu0 %v6662_v15, %s7862_s3 }
 0xaf8   :  { %6768 = vrot.lane.b32.xlu1 %v6667_v60, %s9155_s12  ;;  %6758 = vrot.lane.b32.xlu0 %v6667_v60, %s7862_s3  ;;  %s7878_s12 = smov 70   ;;  %s7886_s3 = smov 94  }
 0xafc   :  { %1675 = vperm.xlu1 %6476, %v1657_v19   ;;  %1670 = vperm.xlu0 %6475, %v1656_v20  }
 0xb00   :  { %1665 = vperm.xlu1 %6476, %v1655_v21   ;;  %1660 = vperm.xlu0 %6475, %v1654_v22  }
 0xb3e   :  { %v6664_v23 = vpop.permute.xlu1 %6663  ;;  %v6654_v24 = vpop.permute.xlu0 %6653 }
 0xb3f   :  { %v6666_v25 = vunpack.i.h.bf16 %v6664_v23  ;;  %v6665_v26 = vunpack.i.l.bf16 %v6664_v23  ;;  %v6656_v27 = vunpack.i.h.bf16 %v6654_v24  ;;  %v6655_v28 = vunpack.i.l.bf16 %v6654_v24 }
 0xb41   :  { %v1563_v29 = vsel %vm1475_vm11, %v6656_v27, %v6666_v25  ;;  %v1562_v30 = vsel %vm1475_vm11, %v6655_v28, %v6665_v26 }
 0xb42   :  { %v1643_v31 = vpack.c.bf16 %v1563_v29, %v1562_v30  ;;  %v6669_v33 = vpop.permute.xlu1 %6668  ;;  %v6659_v34 = vpop.permute.xlu0 %6658 }
 0xb43   :  { %v6671_v36 = vunpack.i.h.bf16 %v6669_v33  ;;  %v6670_v32 = vunpack.i.l.bf16 %v6669_v33  ;;  %v6661_v17 = vunpack.i.h.bf16 %v6659_v34  ;;  %v6660_v37 = vunpack.i.l.bf16 %v6659_v34 }
 0xb44   :  { %1704 = vmatpush1.bf16.msra.mxu0 %v1643_v31 }
 0xb45   :  { %v1561_v38 = vsel %vm1475_vm11, %v6661_v17, %v6671_v36  ;;  %v1560_v18 = vsel %vm1475_vm11, %v6660_v37, %v6670_v32  ;;  %1705 = vmatprep.subr.bf16.mxu0 %v7866_v8 }
 0xb46   :  { %v1642_v39 = vpack.c.bf16 %v1561_v38, %v1560_v18  ;;  %v6684_v54 = vpop.permute.xlu1 %6683  ;;  %v6674_v40 = vpop.permute.xlu0 %6673 }
 0xb47   :  { %v6686_v42 = vunpack.i.h.bf16 %v6684_v54  ;;  %v6685_v35 = vunpack.i.l.bf16 %v6684_v54  ;;  %v6676_v41 = vunpack.i.h.bf16 %v6674_v40  ;;  %v6675_v45 = vunpack.i.l.bf16 %v6674_v40 }
 0xb48   :  { %1706 = vmatpush1.bf16.msra.mxu0 %v1642_v39 }
 0xb49   :  { %v1535_v46 = vsel %vm1475_vm11, %v6676_v41, %v6686_v42  ;;  %v1534_v47 = vsel %vm1475_vm11, %v6675_v45, %v6685_v35  ;;  %1707 = vmatprep.subr.bf16.mxu0 %v7866_v8 }
 0xb4a   :  { %v1641_v48 = vpack.c.bf16 %v1535_v46, %v1534_v47  ;;  %v6689_v49 = vpop.permute.xlu1 %6688  ;;  %v6679_v50 = vpop.permute.xlu0 %6678 }
 0xb4b   :  { %v6691_v51 = vunpack.i.h.bf16 %v6689_v49  ;;  %v6690_v52 = vunpack.i.l.bf16 %v6689_v49  ;;  %v6681_v53 = vunpack.i.h.bf16 %v6679_v50  ;;  %v6680_v55 = vunpack.i.l.bf16 %v6679_v50 }
 0xb4c   :  { %1708 = vmatpush1.bf16.msra.mxu0 %v1641_v48 }
 0xb4d   :  { %v1533_v56 = vsel %vm1475_vm11, %v6681_v53, %v6691_v51  ;;  %v1532_v57 = vsel %vm1475_vm11, %v6680_v55, %v6690_v52  ;;  %1709 = vmatprep.subr.bf16.mxu0 %v7866_v8 }
 0xb4e   :  { %v1640_v58 = vpack.c.bf16 %v1533_v56, %v1532_v57  ;;  %v6704_v59 = vpop.permute.xlu1 %6703  ;;  %v6694_v61 = vpop.permute.xlu0 %6693 }
 0xb4f   :  { %v6706_v62 = vunpack.i.h.bf16 %v6704_v59  ;;  %v6705_v63 = vunpack.i.l.bf16 %v6704_v59  ;;  %v6696_v0 = vunpack.i.h.bf16 %v6694_v61  ;;  %v6695_v4 = vunpack.i.l.bf16 %v6694_v61 }
 0xb50   :  { %1710 = vmatpush1.bf16.msra.mxu0 %v1640_v58 }
 0xb51   :  { %v1507_v5 = vsel %vm1475_vm11, %v6696_v0, %v6706_v62  ;;  %v1506_v6 = vsel %vm1475_vm11, %v6695_v4, %v6705_v63  ;;  %1711 = vmatprep.subr.bf16.mxu0 %v7866_v8 }
 0xb52   :  { %v1639_v7 = vpack.c.bf16 %v1507_v5, %v1506_v6  ;;  %v6709_v9 = vpop.permute.xlu1 %6708  ;;  %v6699_v10 = vpop.permute.xlu0 %6698 }
 0xb53   :  { %v6711_v13 = vunpack.i.h.bf16 %v6709_v9  ;;  %v6710_v15 = vunpack.i.l.bf16 %v6709_v9  ;;  %v6701_v16 = vunpack.i.h.bf16 %v6699_v10  ;;  %v6700_v60 = vunpack.i.l.bf16 %v6699_v10 }
 0xb54   :  { %1712 = vmatpush1.bf16.msra.mxu0 %v1639_v7 }
 0xb55   :  { %v1505_v44 = vsel %vm1475_vm11, %v6701_v16, %v6711_v13  ;;  %v1504_v19 = vsel %vm1475_vm11, %v6700_v60, %v6710_v15  ;;  %1713 = vmatprep.subr.bf16.mxu0 %v7866_v8 }
 0xb56   :  { %v1638_v20 = vpack.c.bf16 %v1505_v44, %v1504_v19  ;;  %v6719_v21 = vpop.permute.xlu1 %6718  ;;  %v6714_v22 = vpop.permute.xlu0 %6713 }
 0xb57   :  { %v6721_v23 = vunpack.i.h.bf16 %v6719_v21  ;;  %v6720_v24 = vunpack.i.l.bf16 %v6719_v21  ;;  %v6716_v25 = vunpack.i.h.bf16 %v6714_v22  ;;  %v6715_v26 = vunpack.i.l.bf16 %v6714_v22  ;;  %v6951_v21 = vld [vmem:[#allocation9] ss:$8 sps:$4 sm:$0xff]   ;;  %v6954_v22 = vld [vmem:[#allocation9 + $0x14] ss:$8 sps:$4 sm:$0xff]  }
 0xb58   :  { %1714 = vmatpush1.bf16.msra.mxu0 %v1638_v20 }
 0xb59   :  { %v1479_v27 = vsel %vm1475_vm11, %v8382_v12, %v6716_v25  ;;  %v1478_v28 = vsel %vm1475_vm11, %v8380_v11, %v6715_v26  ;;  %1715 = vmatprep.subr.bf16.mxu0 %v7866_v8  ;;  %v1477_v33 = vsel %vm1475_vm11, %v8384_v14, %v6721_v23  ;;  %v1476_v34 = vsel %vm1475_vm11, %v8388_v43, %v6720_v24 }
 0xb5a   :  { %v1637_v29 = vpack.c.bf16 %v1479_v27, %v1478_v28  ;;  %v6729_v30 = vpop.permute.xlu1 %6728  ;;  %v6724_v31 = vpop.permute.xlu0 %6723  ;;  %v1636_v12 = vpack.c.bf16 %v1477_v33, %v1476_v34 }
 0xb5b   :  { %v6726_v36 = vunpack.i.h.bf16 %v6724_v31  ;;  %v6725_v32 = vunpack.i.l.bf16 %v6724_v31  ;;  %v6731_v18 = vunpack.i.h.bf16 %v6729_v30  ;;  %v6730_v39 = vunpack.i.l.bf16 %v6729_v30 }
 0xb5c   :  { %1716 = vmatpush1.bf16.msra.mxu0 %v1637_v29 }
 0xb5d   :  { %1717 = vmatprep.subr.bf16.mxu0 %v7866_v8  ;;  %v1634_v17 = vsel %vm1475_vm11, %v6715_v26, %v6725_v32  ;;  %v1635_v11 = vsel %vm1475_vm11, %v6716_v25, %v6726_v36  ;;  %v1632_v45 = vsel %vm1475_vm11, %v6720_v24, %v6730_v39  ;;  %v1633_v46 = vsel %vm1475_vm11, %v6721_v23, %v6731_v18  ;;  %v6956_v23 = vld [vmem:[#allocation9 + $0x10] ss:$8 sps:$4 sm:$0xff]  }
 0xb5e   :  { %v6744_v37 = vpop.permute.xlu1 %6743  ;;  %v6734_v38 = vpop.permute.xlu0 %6733  ;;  %v1649_v54 = vpack.c.bf16 %v1635_v11, %v1634_v17  ;;  %v1648_v47 = vpack.c.bf16 %v1633_v46, %v1632_v45 }
 0xb5f   :  { %v6746_v14 = vunpack.i.h.bf16 %v6744_v37  ;;  %v6745_v43 = vunpack.i.l.bf16 %v6744_v37  ;;  %v6736_v40 = vunpack.i.h.bf16 %v6734_v38  ;;  %v6735_v42 = vunpack.i.l.bf16 %v6734_v38 }
 0xb60   :  { %1718 = vmatpush1.bf16.msra.mxu0 %v1636_v12 }
 0xb61   :  { %1723 = vmatprep.subr.bf16.mxu0 %v7866_v8  ;;  %v1619_v48 = vsel %vm1475_vm11, %v6736_v40, %v6746_v14  ;;  %v1618_v49 = vsel %vm1475_vm11, %v6735_v42, %v6745_v43 }
 0xb62   :  { %v6749_v35 = vpop.permute.xlu1 %6748  ;;  %v6739_v41 = vpop.permute.xlu0 %6738  ;;  %v1647_v57 = vpack.c.bf16 %v1619_v48, %v1618_v49 }
 0xb63   :  { %v6751_v52 = vunpack.i.h.bf16 %v6749_v35  ;;  %v6750_v53 = vunpack.i.l.bf16 %v6749_v35  ;;  %v6741_v55 = vunpack.i.h.bf16 %v6739_v41  ;;  %v6740_v56 = vunpack.i.l.bf16 %v6739_v41  ;;  %v1812_v35 = vld [vmem:[%s9115_s15 + $0x18] sm:$0xff]  ;;  %v1811_v41 = vld [vmem:[%s9115_s15 + $0x10] sm:$0xff] }
 0xb64   :  { %1724 = vmatpush2.bf16.msra.mxu0 %v1649_v54 }
 0xb65   :  { %1725 = vmatprep.subr.bf16.mxu0 %v7866_v8  ;;  %v1617_v63 = vsel %vm1475_vm11, %v6741_v55, %v6751_v52  ;;  %v1616_v0 = vsel %vm1475_vm11, %v6740_v56, %v6750_v53 }
 0xb66   :  { %v6764_v50 = vpop.permute.xlu1 %6763  ;;  %v6754_v51 = vpop.permute.xlu0 %6753  ;;  %v1646_v6 = vpack.c.bf16 %v1617_v63, %v1616_v0  ;;  %v1840_v63 = vld [vmem:[%s9116_s16 + $0x18] sm:$0xff]  ;;  %v1809_v0 = vld [vmem:[%s9115_s15] sm:$0xff] }
 0xb67   :  { %v6766_v58 = vunpack.i.h.bf16 %v6764_v50  ;;  %v6765_v59 = vunpack.i.l.bf16 %v6764_v50  ;;  %v6756_v61 = vunpack.i.h.bf16 %v6754_v51  ;;  %v6755_v62 = vunpack.i.l.bf16 %v6754_v51 }
 0xb68   :  { %1726 = vmatpush2.bf16.msra.mxu0 %v1648_v47 }
 0xb69   :  { %1727 = vmatprep.subr.bf16.mxu0 %v7866_v8  ;;  %v1591_v7 = vsel %vm1475_vm11, %v6756_v61, %v6766_v58  ;;  %v1590_v9 = vsel %vm1475_vm11, %v6755_v62, %v6765_v59  ;;  %v1839_v62 = vld [vmem:[%s9116_s16 + $0x10] sm:$0xff] }
 0xb6a   :  { %v6769_v4 = vpop.permute.xlu1 %6768  ;;  %v6759_v5 = vpop.permute.xlu0 %6758  ;;  %v1645_v60 = vpack.c.bf16 %v1591_v7, %v1590_v9 }
 0xb6b   :  { %v6771_v10 = vunpack.i.h.bf16 %v6769_v4  ;;  %v6770_v13 = vunpack.i.l.bf16 %v6769_v4  ;;  %v6761_v15 = vunpack.i.h.bf16 %v6759_v5  ;;  %v6760_v16 = vunpack.i.l.bf16 %v6759_v5  ;;  %v1810_v4 = vld [vmem:[%s9115_s15 + $0x8] sm:$0xff]  ;;  %v1837_v5 = vld [vmem:[%s9116_s16] sm:$0xff]  ;;  %s7876_s15 = smov 93  }
 0xb6c   :  { %1728 = vmatpush2.bf16.msra.mxu0 %v1647_v57 }
 0xb6d   :  { %1729 = vmatprep.subr.bf16.mxu0 %v7866_v8  ;;  %v1589_v44 = vsel %vm1475_vm11, %v6761_v15, %v6771_v10  ;;  %v1588_v19 = vsel %vm1475_vm11, %v6760_v16, %v6770_v13 }
 0xb6e   :  { %v1644_v20 = vpack.c.bf16 %v1589_v44, %v1588_v19 }
 0xb70   :  { %1730 = vmatpush2.bf16.msra.mxu0 %v1646_v6  ;;  %v1838_v6 = vld [vmem:[%s9116_s16 + $0x8] sm:$0xff]  ;;  %s7877_s16 = smov 12  }
 0xb71   :  { %1731 = vmatprep.subr.bf16.mxu0 %v7866_v8 }
 0xb74   :  { %1732 = vmatpush2.bf16.msra.mxu0 %v1645_v60 }
 0xb75   :  { %1733 = vmatprep.subr.bf16.mxu0 %v7866_v8 }
 0xb77   :  { %v1671_v25 = vpop.permute.xlu0 %1670  ;;  %v1676_v28 = vpop.permute.xlu1 %1675 }
 0xb78   :  { %1734 = vmatpush2.bf16.msra.mxu0 %v1644_v20 }
 0xb7b   :  { %1736 = vmatmul.mubr.bf16.vlgmr.msra.gmra.mxu0 %v6951_v21  ;;  %v1661_v30 = vpop.permute.xlu0 %1660  ;;  %v1666_v12 = vpop.permute.xlu1 %1665 }
 0xb7c   :  { %5838 = vmatprep.mubr.msk.bf16.mxu0 %vm9135_vm10, %v6954_v22  ;;  %vm1950_vm10 = vcmask 105472  }
 0xb83   :  { %1744 = vmatmul.mubr.bf16.gmra.mxu0 %v6956_v23 }
 0xc3b   :  { %v1737_v24 = vpop.f32.mrf.mxu0 }
 0xc3c   :  { %v1738_v33 = vadd.f32 %v1737_v24, %v1661_v30 }
 0xc3d   :  { %v1739_v26 = vpop.f32.mrf.mxu0 }
 0xc3e   :  { %v1752_v11 = vmax.f32 %v1738_v33, 0.0 }
 0xc3f   :  { %v1740_v27 = vpop.f32.mrf.mxu0 }
 0xc40   :  { %v1741_v37 = vadd.f32 %v1740_v27, %v1666_v12  ;;  %v1757_v40 = vsel %vm1756_vm12, %v1752_v11, 0.0 }
 0xc41   :  { %v1742_v29 = vpop.f32.mrf.mxu0 }
 0xc42   :  { %v1753_v14 = vmax.f32 %v1741_v37, 0.0 }
 0xc43   :  { %v1745_v31 = vpop.f32.mrf.mxu0 }
 0xc44   :  { %v1746_v34 = vadd.f32 %v1745_v31, %v1671_v25  ;;  %v1760_v42 = vsel %vm1756_vm12, %v1753_v14, 0.0 }
 0xc45   :  { %v1747_v36 = vpop.f32.mrf.mxu0 }
 0xc46   :  { %v1754_v32 = vmax.f32 %v1746_v34, 0.0 }
 0xc47   :  { %v1748_v17 = vpop.f32.mrf.mxu0 }
 0xc48   :  { %v1749_v38 = vadd.f32 %v1748_v17, %v1676_v28  ;;  %v1763_v18 = vsel %vm1756_vm12, %v1754_v32, 0.0 }
 0xc49   :  { %1764 = vadd.xlane.f32.xlu0 %v1763_v18  ;;  %v1750_v39 = vpop.f32.mrf.mxu0 }
 0xc4a   :  { %v1755_v54 = vmax.f32 %v1749_v38, 0.0 }
 0xc4c   :  { %v1766_v43 = vsel %vm1756_vm12, %v1755_v54, 0.0 }
 0xc4d   :  { %1767 = vadd.xlane.f32.xlu1 %v1766_v43  ;;  %1758 = vadd.xlane.f32.xlu0 %v1757_v40 }
 0xc51   :  { %1761 = vadd.xlane.f32.xlu0 %v1760_v42 }
 0xc5e   :  { %1830 = vperm.xlu1 %6476, %v1812_v35  }
 0xc67   :  { %1825 = vperm.xlu0 %6475, %v1811_v41  }
 0xcd2   :  { %v1765_v45 = vpop.xlane.xlu0 %1764 }
 0xcd3   :  { %v1771_v46 = vmul.f32 0.014285714, %v1765_v45 }
 0xcd5   :  { %v1775_v51 = vsub.f32 %v1754_v32, %v1771_v46 }
 0xcd6   :  { %v1768_v47 = vpop.xlane.xlu1 %1767  ;;  %v1759_v48 = vpop.xlane.xlu0 %1758 }
 0xcd7   :  { %v1772_v49 = vmul.f32 0.014285714, %v1768_v47  ;;  %v1769_v50 = vmul.f32 0.014285714, %v1759_v48  ;;  %v1779_v59 = vmul.f32 %v1775_v51, %v1775_v51 }
 0xcd9   :  { %v1776_v52 = vsub.f32 %v1755_v54, %v1772_v49  ;;  %v1773_v53 = vsub.f32 %v1752_v11, %v1769_v50  ;;  %v1787_v61 = vsel %vm1756_vm12, %v1779_v59, 0.0 }
 0xcda   :  { %v1762_v7 = vpop.xlane.xlu0 %1761  ;;  %v1831_v16 = vpop.permute.xlu1 %1830 }
 0xcdb   :  { %v1780_v55 = vmul.f32 %v1776_v52, %v1776_v52  ;;  %v1777_v56 = vmul.f32 %v1773_v53, %v1773_v53  ;;  %v1770_v9 = vmul.f32 0.014285714, %v1762_v7 }
 0xcdd   :  { %v1790_v57 = vsel %vm1756_vm12, %v1780_v55, 0.0  ;;  %v1781_v58 = vsel %vm1756_vm12, %v1777_v56, 0.0  ;;  %v8506_v10 = vsub.f32 %v1753_v14, %v1770_v9 }
 0xcde   :  { %1791 = vadd.xlane.f32.xlu0 %v1790_v57  ;;  %1782 = vadd.xlane.f32.xlu1 %v1781_v58 }
 0xcdf   :  { %v1778_v13 = vmul.f32 %v8506_v10, %v8506_v10 }
 0xce1   :  { %v1784_v15 = vsel %vm1756_vm12, %v1778_v13, 0.0 }
 0xce2   :  { %1788 = vadd.xlane.f32.xlu1 %v1787_v61  ;;  %v1826_v60 = vpop.permute.xlu0 %1825 }
 0xcf3   :  { %1853 = vperm.xlu1 %6476, %v1839_v62  }
 0xcf4   :  { %1858 = vperm.xlu0 %6475, %v1840_v63  }
 0xcf8   :  { %1815 = vperm.xlu0 %6475, %v1809_v0  }
 0xcfc   :  { %1820 = vperm.xlu0 %6475, %v1810_v4  }
 0xd00   :  { %1843 = vperm.xlu0 %6475, %v1837_v5  }
 0xd04   :  { %1848 = vperm.xlu0 %6475, %v1838_v6  }
 0xd17   :  { %1785 = vadd.xlane.f32.xlu1 %v1784_v15 }
 0xd67   :  { %v1783_v44 = vpop.xlane.xlu1 %1782  ;;  %v1792_v19 = vpop.xlane.xlu0 %1791 }
 0xd68   :  { %v1793_v20 = vmul.f32 0.014285714, %v1783_v44  ;;  %v1796_v21 = vmul.f32 0.014285714, %v1792_v19 }
 0xd6a   :  { %v1797_v22 = vadd.f32 1e-05, %v1793_v20  ;;  %v1800_v23 = vadd.f32 1e-05, %v1796_v21 }
 0xd6b   :  { %v1789_v24 = vpop.xlane.xlu1 %1788 }
 0xd6c   :  { %6979 = vrsqrt.f32 %v1797_v22  ;;  %v1795_v25 = vmul.f32 0.014285714, %v1789_v24 }
 0xd6d   :  { %6981 = vrsqrt.f32 %v1800_v23 }
 0xd6e   :  { %v1799_v26 = vadd.f32 1e-05, %v1795_v25 }
 0xd6f   :  { %v1859_v27 = vpop.permute.xlu0 %1858  ;;  %v1854_v11 = vpop.permute.xlu1 %1853 }
 0xd70   :  { %6983 = vrsqrt.f32 %v1799_v26 }
 0xd73   :  { %v1816_v28 = vpop.permute.xlu0 %1815 }
 0xd77   :  { %v8511_v33 = vpop.permute.xlu0 %1820 }
 0xd79   :  { %v6980_v29 = vpop.eup %6979 }
 0xd7a   :  { %v1805_v30 = vmul.f32 %v6980_v29, %v1773_v53  ;;  %v6982_v31 = vpop.eup %6981 }
 0xd7b   :  { %v1808_v32 = vmul.f32 %v6982_v31, %v1776_v52  ;;  %v1844_v37 = vpop.permute.xlu0 %1843 }
 0xd7c   :  { %v1833_v12 = vmul.f32 %v1816_v28, %v1805_v30 }
 0xd7d   :  { %v6984_v34 = vpop.eup %6983  ;;  %v1836_v18 = vmul.f32 %v1831_v16, %v1808_v32 }
 0xd7e   :  { %v1807_v36 = vmul.f32 %v6984_v34, %v1775_v51  ;;  %v8515_v39 = vadd.f32 %v1844_v37, %v1833_v12 }
 0xd7f   :  { %v8523_v35 = vadd.f32 %v1859_v27, %v1836_v18  ;;  %v1849_v25 = vpop.permute.xlu0 %1848 }
 0xd80   :  { %v1835_v17 = vmul.f32 %v1826_v60, %v1807_v36  ;;  %v1870_v59 = vrot.slane %v8515_v39, 2  ;;  %v1874_v61 = vrot.slane %v8515_v39, 3  ;;  %v1878_v20 = vrot.slane %v8515_v39, 4 }
 0xd81   :  { %v1997_v48 = vrot.slane %v8523_v35, 4  ;;  %v2001_v49 = vrot.slane %v8523_v35, 5  ;;  %v2005_v53 = vrot.slane %v8523_v35, 6  ;;  %v2009_v55 = vrot.slane %v8523_v35, 7 }
 0xd82   :  { %v8513_v38 = vadd.f32 %v1854_v11, %v1835_v17  ;;  %v6847_v63 = vpack.i.bf16 %v1870_v59, %v1874_v61  ;;  %v1985_v4 = vrot.slane %v8523_v35, 1  ;;  %v1989_v5 = vrot.slane %v8523_v35, 2 }
 0xd83   :  { %v6832_v52 = vpack.i.bf16 %v1997_v48, %v2001_v49  ;;  %v6842_v58 = vpack.i.bf16 %v2005_v53, %v2009_v55  ;;  %v1993_v7 = vrot.slane %v8523_v35, 3  ;;  %v6837_v19 = vpack.i.bf16 %v2001_v49, %v2005_v53 }
 0xd84   :  { %v6772_v54 = vpack.i.bf16 %v8515_v39, %v8513_v38  ;;  %v1965_v14 = vrot.slane %v8513_v38, 4  ;;  %v1969_v43 = vrot.slane %v8513_v38, 5  ;;  %v1957_v40 = vrot.slane %v8513_v38, 2 }
 0xd85   :  { %v1961_v42 = vrot.slane %v8513_v38, 3  ;;  %v1973_v45 = vrot.slane %v8513_v38, 6  ;;  %v1977_v51 = vrot.slane %v8513_v38, 7  ;;  %v1953_v57 = vrot.slane %v8513_v38, 1 }
 0xd86   :  { %6773 = vrot.lane.b32.xlu0 %v6772_v54, %s7876_s15  ;;  %v6787_v41 = vpack.i.bf16 %v1965_v14, %v1969_v43  ;;  %v6812_v6 = vpack.i.bf16 %v1985_v4, %v1989_v5  ;;  %v6817_v13 = vpack.i.bf16 %v1989_v5, %v1993_v7  ;;  %v6822_v60 = vpack.i.bf16 %v1993_v7, %v1997_v48 }
 0xd87   :  { %v6777_v46 = vpack.i.bf16 %v1957_v40, %v1961_v42  ;;  %v6802_v47 = vpack.i.bf16 %v1969_v43, %v1973_v45  ;;  %v6782_v50 = vpack.i.bf16 %v1961_v42, %v1965_v14  ;;  %v6792_v56 = vpack.i.bf16 %v1973_v45, %v1977_v51 }
 0xd88   :  { %6788 = vrot.lane.b32.xlu1 %v6787_v41, %s7877_s16  ;;  %v6797_v62 = vpack.i.bf16 %v1953_v57, %v1957_v40  ;;  %v6807_v0 = vpack.i.bf16 %v1977_v51, %v8523_v35  ;;  %v6827_v44 = vpack.i.bf16 %v8523_v35, %v1985_v4  ;;  %v6852_v23 = vpack.i.bf16 %v1874_v61, %v1878_v20 }
 0xd89   :  { %v1886_v30 = vrot.slane %v8515_v39, 6  ;;  %v1890_v36 = vrot.slane %v8515_v39, 7  ;;  %v1882_v32 = vrot.slane %v8515_v39, 5  ;;  %v1866_v37 = vrot.slane %v8515_v39, 1 }
 0xd8a   :  { %6778 = vrot.lane.b32.xlu0 %v6777_v46, %s7878_s12 }
 0xd8b   :  { %v6892_v18 = vpack.i.bf16 %v1882_v32, %v1886_v30  ;;  %v6887_v54 = vpack.i.bf16 %v1866_v37, %v1870_v59 }
 0xd8c   :  { %6803 = vrot.lane.b32.xlu1 %v6802_v47, %s7879_s4 }
 0xd8e   :  { %6783 = vrot.lane.b32.xlu0 %v6782_v50, %s7880_s9 }
 0xd90   :  { %6833 = vrot.lane.b32.xlu1 %v6832_v52, %s7881_s1 }
 0xd92   :  { %6793 = vrot.lane.b32.xlu0 %v6792_v56, %s7882_s5 }
 0xd94   :  { %6843 = vrot.lane.b32.xlu1 %v6842_v58, %s7883_s19 }
 0xd96   :  { %6798 = vrot.lane.b32.xlu0 %v6797_v62, %s7884_s26 }
 0xd98   :  { %6848 = vrot.lane.b32.xlu1 %v6847_v63, %s7878_s12 }
 0xd9a   :  { %6808 = vrot.lane.b32.xlu0 %v6807_v0, %s9154_s11 }
 0xd9e   :  { %6813 = vrot.lane.b32.xlu0 %v6812_v6, %s7885_s27 }
 0xda0   :  { %v1786_v9 = vpop.xlane.xlu1 %1785 }
 0xda1   :  { %v1794_v15 = vmul.f32 0.014285714, %v1786_v9 }
 0xda2   :  { %6818 = vrot.lane.b32.xlu0 %v6817_v13, %s7886_s3 }
 0xda3   :  { %v1798_v16 = vadd.f32 1e-05, %v1794_v15 }
 0xda5   :  { %6985 = vrsqrt.f32 %v1798_v16 }
 0xda6   :  { %6823 = vrot.lane.b32.xlu0 %v6822_v60, %s7887_s14 }
 0xdaa   :  { %6828 = vrot.lane.b32.xlu0 %v6827_v44, %s7888_s13 }
 0xdae   :  { %6838 = vrot.lane.b32.xlu0 %v6837_v19, %s7889_s28 }
 0xdb2   :  { %v6986_v21 = vpop.eup %6985  ;;  %2010 = vrot.lane.b32.xlu0 %v2009_v55, %s7890_s30 }
 0xdb3   :  { %v1806_v22 = vmul.f32 %v6986_v21, %v8506_v10  ;;  %v6872_v10 = vpack.i.bf16 %v1886_v30, %v1890_v36 }
 0xdb5   :  { %v1834_v24 = vmul.f32 %v8511_v33, %v1806_v22  ;;  %v6867_v33 = vpack.i.bf16 %v1878_v20, %v1882_v32 }
 0xdb6   :  { %6853 = vrot.lane.b32.xlu0 %v6852_v23, %s7880_s9 }
 0xdb7   :  { %v1862_v26 = vadd.f32 %v1849_v25, %v1834_v24 }
 0xdb9   :  { %v1902_v27 = vrot.slane %v1862_v26, 2  ;;  %v1906_v28 = vrot.slane %v1862_v26, 3  ;;  %v1898_v29 = vrot.slane %v1862_v26, 1  ;;  %v1910_v12 = vrot.slane %v1862_v26, 4 }
 0xdba   :  { %v6877_v11 = vpack.i.bf16 %v1890_v36, %v1862_v26  ;;  %v1914_v14 = vrot.slane %v1862_v26, 5  ;;  %v1918_v42 = vrot.slane %v1862_v26, 6  ;;  %v1922_v35 = vrot.slane %v1862_v26, 7 }
 0xdbb   :  { %v6862_v31 = vpack.i.bf16 %v1902_v27, %v1906_v28  ;;  %v6857_v34 = vpack.i.bf16 %v1898_v29, %v1902_v27  ;;  %v6882_v17 = vpack.i.bf16 %v1906_v28, %v1910_v12  ;;  %v6897_v40 = vpack.i.bf16 %v1862_v26, %v1898_v29 }
 0xdbc   :  { %v6902_v43 = vpack.i.bf16 %v1910_v12, %v1914_v14  ;;  %v6912_v41 = vpack.i.bf16 %v1918_v42, %v1922_v35  ;;  %v6907_v45 = vpack.i.bf16 %v1914_v14, %v1918_v42 }
 0xdbd   :  { %6863 = vrot.lane.b32.xlu0 %v6862_v31, %s7886_s3  ;;  %6858 = vrot.lane.b32.xlu1 %v6857_v34, %s7885_s27 }
 0xdc1   :  { %6873 = vrot.lane.b32.xlu0 %v6872_v10, %s7882_s5  ;;  %6868 = vrot.lane.b32.xlu1 %v6867_v33, %s7877_s16 }
 0xdc5   :  { %6883 = vrot.lane.b32.xlu0 %v6882_v17, %s7887_s14  ;;  %6878 = vrot.lane.b32.xlu1 %v6877_v11, %s9154_s11  ;;  %s7891_s11 = smov 48  }
 0xdc9   :  { %6893 = vrot.lane.b32.xlu0 %v6892_v18, %s7879_s4  ;;  %6888 = vrot.lane.b32.xlu1 %v6887_v54, %s7884_s26 }
 0xdcd   :  { %6903 = vrot.lane.b32.xlu0 %v6902_v43, %s7881_s1  ;;  %6898 = vrot.lane.b32.xlu1 %v6897_v40, %s7888_s13 }
 0xdd1   :  { %6913 = vrot.lane.b32.xlu0 %v6912_v41, %s7883_s19  ;;  %6908 = vrot.lane.b32.xlu1 %v6907_v45, %s7889_s28 }
 0xdd5   :  { %1923 = vrot.lane.b32.xlu0 %v1922_v35, %s7890_s30 }
 0xdf8   :  { %v8582_v46 = vpop.permute.xlu0 %6773 }
 0xdf9   :  { %v6775_v58 = vunpack.i.l.bf16 %v8582_v46 }
 0xdfa   :  { %v6789_v48 = vpop.permute.xlu1 %6788 }
 0xdfb   :  { %v6790_v53 = vunpack.i.l.bf16 %v6789_v48  ;;  %v2161_v5 = vsel %vm1475_vm11, %v6775_v58, %v1953_v57  ;;  %v6791_v26 = vunpack.i.h.bf16 %v6789_v48 }
 0xdfc   :  { %v6779_v47 = vpop.permute.xlu0 %6778 }
 0xdfd   :  { %v6780_v50 = vunpack.i.l.bf16 %v6779_v47  ;;  %v6781_v27 = vunpack.i.h.bf16 %v6779_v47 }
 0xdfe   :  { %v8588_v55 = vpop.permute.xlu1 %6803 }
 0xdff   :  { %v6805_v61 = vunpack.i.l.bf16 %v8588_v55  ;;  %v6806_v28 = vunpack.i.h.bf16 %v8588_v55 }
 0xe00   :  { %v8584_v49 = vpop.permute.xlu0 %6783 }
 0xe01   :  { %v6785_v51 = vunpack.i.l.bf16 %v8584_v49  ;;  %v6786_v20 = vunpack.i.h.bf16 %v8584_v49 }
 0xe02   :  { %v6834_v19 = vpop.permute.xlu1 %6833 }
 0xe03   :  { %v2164_v52 = vsel %vm1930_vm13, %v6780_v50, %v6785_v51  ;;  %v2016_v10 = vsel %vm1930_vm13, %v6786_v20, %v6791_v26  ;;  %v6836_v33 = vunpack.i.h.bf16 %v6834_v19  ;;  %v6835_v43 = vunpack.i.l.bf16 %v6834_v19 }
 0xe04   :  { %v8590_v56 = vpop.permute.xlu0 %6793  ;;  %v2165_v59 = vsel %vm1932_vm15, %v2164_v52, %v6790_v53 }
 0xe05   :  { %v6795_v62 = vunpack.i.l.bf16 %v8590_v56  ;;  %v2166_v0 = vsel %vm1350_vm9, %v2165_v59, %v6805_v61  ;;  %v6796_v40 = vunpack.i.h.bf16 %v8590_v56 }
 0xe07   :  { %v2167_v7 = vsel %vm555_vm14, %v2166_v0, %v6795_v62  ;;  %v2017_v0 = vsel %vm1932_vm15, %v2016_v10, %v6806_v28 }
 0xe08   :  { %v6799_v63 = vpop.permute.xlu0 %6798 }
 0xe09   :  { %v6800_v4 = vunpack.i.l.bf16 %v6799_v63  ;;  %v6801_v44 = vunpack.i.h.bf16 %v6799_v63 }
 0xe0b   :  { %v2162_v6 = vsel %vm1756_vm12, %v2161_v5, %v6800_v4  ;;  %v2013_v22 = vsel %vm1475_vm11, %v8513_v38, %v6801_v44  ;;  %v6844_v38 = vpop.permute.xlu1 %6843 }
 0xe0c   :  { %v8602_v9 = vpop.permute.xlu0 %6808  ;;  %v2163_v13 = vsel %vm1928_vm0, %v2162_v6, %v6780_v50  ;;  %v2014_v12 = vsel %vm1756_vm12, %v2013_v22, %v6781_v27  ;;  %v6846_v45 = vunpack.i.h.bf16 %v6844_v38  ;;  %v6845_v47 = vunpack.i.l.bf16 %v6844_v38 }
 0xe0d   :  { %v6917_v15 = vpack.i.bf16 %v2167_v7, %v2163_v13  ;;  %v6810_v23 = vunpack.i.l.bf16 %v8602_v9  ;;  %v6811_v31 = vunpack.i.h.bf16 %v8602_v9  ;;  %v2015_v53 = vsel %vm1928_vm0, %v2014_v12, %v6786_v20 }
 0xe0f   :  { %6918 = vrot.lane.b32.xlu1 %v6917_v15, %s7891_s11  ;;  %v2168_v11 = vsel %vm1936_vm2, %v6795_v62, %v6810_v23 }
 0xe10   :  { %v6814_v16 = vpop.permute.xlu0 %6813 }
 0xe11   :  { %v6815_v29 = vunpack.i.l.bf16 %v6814_v16  ;;  %v6816_v42 = vunpack.i.h.bf16 %v6814_v16 }
 0xe14   :  { %v8606_v60 = vpop.permute.xlu0 %6818 }
 0xe15   :  { %v6820_v21 = vunpack.i.l.bf16 %v8606_v60  ;;  %v6821_v34 = vunpack.i.h.bf16 %v8606_v60 }
 0xe17   :  { %v2171_v17 = vsel %vm1942_vm1, %v6815_v29, %v6820_v21 }
 0xe18   :  { %v6824_v57 = vpop.permute.xlu0 %6823 }
 0xe19   :  { %v6826_v24 = vunpack.i.h.bf16 %v6824_v57  ;;  %v6825_v25 = vunpack.i.l.bf16 %v6824_v57 }
 0xe1b   :  { %v2023_v18 = vsel %vm1942_vm1, %v6821_v34, %v6826_v24  ;;  %v2172_v54 = vsel %vm1944_vm3, %v2171_v17, %v6825_v25 }
 0xe1c   :  { %v6829_v30 = vpop.permute.xlu0 %6828  ;;  %v2173_v51 = vsel %vm1946_vm7, %v2172_v54, %v6835_v43  ;;  %v2024_v52 = vsel %vm1944_vm3, %v2023_v18, %v6836_v33 }
 0xe1d   :  { %v6831_v36 = vunpack.i.h.bf16 %v6829_v30  ;;  %v6830_v32 = vunpack.i.l.bf16 %v6829_v30 }
 0xe1f   :  { %v2020_v14 = vsel %vm1936_vm2, %v6811_v31, %v6831_v36  ;;  %v2169_v35 = vsel %vm1938_vm5, %v2168_v11, %v6830_v32 }
 0xe20   :  { %v6839_v41 = vpop.permute.xlu0 %6838  ;;  %v2021_v50 = vsel %vm1938_vm5, %v2020_v14, %v6816_v42  ;;  %v2170_v55 = vsel %vm1940_vm6, %v2169_v35, %v6815_v29 }
 0xe21   :  { %v6841_v48 = vunpack.i.h.bf16 %v6839_v41  ;;  %v6840_v49 = vunpack.i.l.bf16 %v6839_v41  ;;  %v2022_v6 = vsel %vm1940_vm6, %v2021_v50, %v6821_v34 }
 0xe23   :  { %v2174_v56 = vsel %vm1948_vm8, %v2173_v51, %v6840_v49  ;;  %v2025_v58 = vsel %vm1946_vm7, %v2024_v52, %v6841_v48  ;;  %v2175_v59 = vsel %vm1950_vm10, %v6840_v49, %v6845_v47 }
 0xe24   :  { %v6927_v61 = vpack.i.bf16 %v2174_v56, %v2170_v55  ;;  %v2011_v62 = vpop.permute.xlu0 %2010  ;;  %v6922_v63 = vpack.i.bf16 %v2015_v53, %v2175_v59  ;;  %v2026_v4 = vsel %vm1948_vm8, %v2025_v58, %v6846_v45 }
 0xe25   :  { %v2027_v5 = vsel %vm1950_vm10, %v6846_v45, %v2011_v62 }
 0xe26   :  { %7813 = shalt.err (!%p7810_p2)  }
 0xe27   :  { %190 = dma.hbm_to_vmem [thread:$0]  %s9123_s23, 53760, %s188_s20, [#allocation3]  ;;  %v2018_v7 = vsel %vm1350_vm9, %v2017_v0, %v6796_v40  ;;  %6928 = vrot.lane.b32.xlu0 %v6927_v61, %s7891_s11  ;;  %6923 = vrot.lane.b32.xlu1 %v6922_v63, %s7891_s11  ;;  %v6937_v13 = vpack.i.bf16 %v2027_v5, %v2026_v4  ;;  %v6849_v16 = vpop.permute.xlu1 %6848  ;;  %v6776_v27 = vunpack.i.h.bf16 %v8582_v46 }
 0xe28   :  { %v2019_v9 = vsel %vm555_vm14, %v2018_v7, %v6811_v31  ;;  %v6854_v60 = vpop.permute.xlu0 %6853  ;;  %v6850_v20 = vunpack.i.l.bf16 %v6849_v16  ;;  %v6851_v10 = vunpack.i.h.bf16 %v6849_v16 }
 0xe29   :  { %v6932_v15 = vpack.i.bf16 %v2022_v6, %v2019_v9  ;;  %v6855_v57 = vunpack.i.l.bf16 %v6854_v60  ;;  %v2100_v32 = vsel %vm1475_vm11, %v6776_v27, %v1866_v37  ;;  %v6856_v33 = vunpack.i.h.bf16 %v6854_v60 }
 0xe2b   :  { %6938 = vrot.lane.b32.xlu0 %v6937_v13, %s7891_s11  ;;  %6933 = vrot.lane.b32.xlu1 %v6932_v15, %s7891_s11  ;;  %v2103_v24 = vsel %vm1930_vm13, %v6850_v20, %v6855_v57 }
 0xe2f   :  { %v8646_v44 = vpop.permute.xlu1 %6858  ;;  %v8648_v19 = vpop.permute.xlu0 %6863 }
 0xe30   :  { %v6860_v25 = vunpack.i.l.bf16 %v8646_v44  ;;  %v6865_v26 = vunpack.i.l.bf16 %v8648_v19  ;;  %v6861_v12 = vunpack.i.h.bf16 %v8646_v44  ;;  %v6866_v46 = vunpack.i.h.bf16 %v8648_v19 }
 0xe32   :  { %v2110_v34 = vsel %vm1942_vm1, %v6860_v25, %v6865_v26 }
 0xe33   :  { %v6869_v21 = vpop.permute.xlu1 %6868  ;;  %v6874_v22 = vpop.permute.xlu0 %6873 }
 0xe34   :  { %v6870_v23 = vunpack.i.l.bf16 %v6869_v21  ;;  %v6871_v36 = vunpack.i.h.bf16 %v6869_v21  ;;  %v6876_v17 = vunpack.i.h.bf16 %v6874_v22  ;;  %v6875_v11 = vunpack.i.l.bf16 %v6874_v22 }
 0xe36   :  { %v2104_v28 = vsel %vm1932_vm15, %v2103_v24, %v6870_v23  ;;  %v1931_v35 = vsel %vm1930_vm13, %v6856_v33, %v6871_v36 }
 0xe37   :  { %v6879_v29 = vpop.permute.xlu1 %6878  ;;  %v6884_v30 = vpop.permute.xlu0 %6883 }
 0xe38   :  { %v6885_v31 = vunpack.i.l.bf16 %v6884_v30  ;;  %v6881_v41 = vunpack.i.h.bf16 %v6879_v29  ;;  %v6880_v37 = vunpack.i.l.bf16 %v6879_v29  ;;  %v6886_v45 = vunpack.i.h.bf16 %v6884_v30 }
 0xe3a   :  { %v2111_v38 = vsel %vm1944_vm3, %v2110_v34, %v6885_v31  ;;  %v2107_v6 = vsel %vm1936_vm2, %v6875_v11, %v6880_v37  ;;  %v1943_v7 = vsel %vm1942_vm1, %v6866_v46, %v6886_v45 }
 0xe3b   :  { %v6889_v18 = vpop.permute.xlu1 %6888  ;;  %v6894_v54 = vpop.permute.xlu0 %6893 }
 0xe3c   :  { %v6891_v14 = vunpack.i.h.bf16 %v6889_v18  ;;  %v6890_v43 = vunpack.i.l.bf16 %v6889_v18  ;;  %v6896_v40 = vunpack.i.h.bf16 %v6894_v54  ;;  %v6895_v42 = vunpack.i.l.bf16 %v6894_v54 }
 0xe3e   :  { %v1926_v47 = vsel %vm1475_vm11, %v8515_v39, %v6891_v14  ;;  %v2101_v48 = vsel %vm1756_vm12, %v2100_v32, %v6890_v43  ;;  %v1933_v49 = vsel %vm1932_vm15, %v1931_v35, %v6896_v40  ;;  %v2105_v50 = vsel %vm1350_vm9, %v2104_v28, %v6895_v42 }
 0xe3f   :  { %v1927_v51 = vsel %vm1756_vm12, %v1926_v47, %v6851_v10  ;;  %v2102_v52 = vsel %vm1928_vm0, %v2101_v48, %v6850_v20  ;;  %v1934_v53 = vsel %vm1350_vm9, %v1933_v49, %v6876_v17  ;;  %v2106_v55 = vsel %vm555_vm14, %v2105_v50, %v6875_v11  ;;  %v6899_v56 = vpop.permute.xlu1 %6898  ;;  %v6904_v58 = vpop.permute.xlu0 %6903 }
 0xe40   :  { %v1929_v59 = vsel %vm1928_vm0, %v1927_v51, %v6856_v33  ;;  %v2202_v61 = vrot.slane %v2102_v52, 7  ;;  %v1935_v39 = vsel %vm555_vm14, %v1934_v53, %v6881_v41  ;;  %v2203_v62 = vrot.slane %v2106_v55, 7 }
 0xe41   :  { %v6901_v63 = vunpack.i.h.bf16 %v6899_v56  ;;  %v6900_v0 = vunpack.i.l.bf16 %v6899_v56  ;;  %v6906_v4 = vunpack.i.h.bf16 %v6904_v58  ;;  %v6905_v5 = vunpack.i.l.bf16 %v6904_v58 }
 0xe42   :  { %v2220_v9 = vsel %vm273_vm4, %v1929_v59, %v2202_v61  ;;  %v2221_v13 = vsel %vm273_vm4, %v1935_v39, %v2203_v62  ;;  %vm2043_vm14 = vcmask 392192  }
 0xe43   :  { %v8678_v15 = vpack.c.bf16 %v2220_v9, %v2220_v9  ;;  %v8680_v16 = vpack.c.bf16 %v2221_v13, %v2221_v13  ;;  %v1937_v60 = vsel %vm1936_vm2, %v6881_v41, %v6901_v63  ;;  %v2108_v44 = vsel %vm1938_vm5, %v2107_v6, %v6900_v0  ;;  %v6909_v19 = vpop.permute.xlu1 %6908  ;;  %v6914_v57 = vpop.permute.xlu0 %6913 }
 0xe44   :  { %v1939_v20 = vsel %vm1938_vm5, %v1937_v60, %v6861_v12  ;;  %v2109_v21 = vsel %vm1940_vm6, %v2108_v44, %v6860_v25  ;;  %v1945_v22 = vsel %vm1944_vm3, %v1943_v7, %v6906_v4  ;;  %v2112_v23 = vsel %vm1946_vm7, %v2111_v38, %v6905_v5 }
 0xe45   :  { %v1941_v24 = vsel %vm1940_vm6, %v1939_v20, %v6866_v46  ;;  %v2204_v26 = vrot.slane %v2109_v21, 7  ;;  %v6911_v27 = vunpack.i.h.bf16 %v6909_v19  ;;  %v6910_v28 = vunpack.i.l.bf16 %v6909_v19 }
 0xe46   :  { %v6916_v29 = vunpack.i.h.bf16 %v6914_v57  ;;  %v6915_v12 = vunpack.i.l.bf16 %v6914_v57 }
 0xe47   :  { %v2222_v30 = vsel %vm273_vm4, %v1941_v24, %v2204_v26  ;;  %v1947_v31 = vsel %vm1946_vm7, %v1945_v22, %v6911_v27  ;;  %v2113_v34 = vsel %vm1948_vm8, %v2112_v23, %v6910_v28  ;;  %v1924_v17 = vpop.permute.xlu0 %1923 }
 0xe48   :  { %v8692_v36 = vpack.c.bf16 %v2222_v30, %v2222_v30  ;;  %v2205_v32 = vrot.slane %v2113_v34, 7  ;;  %v1949_v25 = vsel %vm1948_vm8, %v1947_v31, %v6916_v29  ;;  %v2114_v11 = vsel %vm1950_vm10, %v6910_v28, %v6915_v12 }
 0xe49   :  { %v1951_v37 = vsel %vm1950_vm10, %v6916_v29, %v1924_v17 }
 0xe4a   :  { %v2223_v10 = vsel %vm273_vm4, %v1949_v25, %v2205_v32 }
 0xe4b   :  { %v8696_v33 = vpack.c.bf16 %v2223_v10, %v2223_v10 }
 0xe81   :  { %v6919_v38 = vpop.permute.xlu1 %6918 }
 0xe82   :  { %v6920_v46 = vunpack.i.l.bf16 %v6919_v38  ;;  %v6921_v54 = vunpack.i.h.bf16 %v6919_v38 }
 0xe84   :  { %v2196_v18 = vsel %vm2043_vm14, %v2114_v11, %v6920_v46  ;;  %v2191_v50 = vsel %vm2043_vm14, %v6920_v46, %v6921_v54 }
 0xe85   :  { %v2206_v45 = vrot.slane %v2196_v18, 7  ;;  %v2207_v0 = vrot.slane %v2191_v50, 7 }
 0xe99   :  { %v6929_v14 = vpop.permute.xlu0 %6928  ;;  %v6924_v43 = vpop.permute.xlu1 %6923 }
 0xe9a   :  { %v6931_v40 = vunpack.i.h.bf16 %v6929_v14  ;;  %v6930_v42 = vunpack.i.l.bf16 %v6929_v14  ;;  %v6926_v35 = vunpack.i.h.bf16 %v6924_v43  ;;  %v6925_v41 = vunpack.i.l.bf16 %v6924_v43 }
 0xe9c   :  { %v2193_v47 = vsel %vm2043_vm14, %v6930_v42, %v6931_v40  ;;  %v2053_v48 = vsel %vm2043_vm14, %v1951_v37, %v6926_v35  ;;  %v2194_v49 = vsel %vm2043_vm14, %v6931_v40, %v6925_v41  ;;  %v2192_v51 = vsel %vm2043_vm14, %v6921_v54, %v6930_v42 }
 0xe9d   :  { %v2224_v52 = vsel %vm273_vm4, %v2053_v48, %v2206_v45  ;;  %v6939_v53 = vpop.permute.xlu0 %6938  ;;  %v6934_v55 = vpop.permute.xlu1 %6933  ;;  %v2209_v39 = vrot.slane %v2193_v47, 7  ;;  %v2210_v62 = vrot.slane %v2194_v49, 7  ;;  %v2208_v4 = vrot.slane %v2192_v51, 7 }
 0xe9e   :  { %v8707_v56 = vpack.c.bf16 %v2224_v52, %v2224_v52  ;;  %v6941_v58 = vunpack.i.h.bf16 %v6939_v53  ;;  %v6940_v59 = vunpack.i.l.bf16 %v6939_v53  ;;  %v6936_v61 = vunpack.i.h.bf16 %v6934_v55 }
 0xe9f   :  { %v6935_v63 = vunpack.i.l.bf16 %v6934_v55 }
 0xea0   :  { %v2047_v5 = vsel %vm2043_vm14, %v6940_v59, %v6941_v58  ;;  %v2046_v6 = vsel %vm2043_vm14, %v6936_v61, %v6940_v59 }
 0xea1   :  { %v2228_v7 = vsel %vm273_vm4, %v2047_v5, %v2210_v62  ;;  %v2227_v9 = vsel %vm273_vm4, %v2046_v6, %v2209_v39  ;;  %v2044_v13 = vsel %vm2043_vm14, %v6926_v35, %v6935_v63  ;;  %v2045_v60 = vsel %vm2043_vm14, %v6935_v63, %v6936_v61 }
 0xea2   :  { %v8715_v44 = vpack.c.bf16 %v2228_v7, %v2228_v7  ;;  %v8717_v19 = vpack.c.bf16 %v2227_v9, %v2227_v9  ;;  %v2225_v57 = vsel %vm273_vm4, %v2044_v13, %v2207_v0  ;;  %v2226_v20 = vsel %vm273_vm4, %v2045_v60, %v2208_v4 }
 0xea3   :  { %v8721_v21 = vpack.c.bf16 %v2225_v57, %v2225_v57  ;;  %v8723_v22 = vpack.c.bf16 %v2226_v20, %v2226_v20 }
 0xea4   :  { %7844 = dma.done.wait [#allocation3], 53760 }
 0xea5   :  { %7845 = vsyncadd [#allocation3], 4294913536  ;;  %4829 = vmatprep.mubr.bf16.mxu1 %v8680_v16  ;;  %4870 = vmatprep.mubr.bf16.mxu0 %v8696_v33  ;;  %v6987_v23 = vld [vmem:[#allocation2 + $0x154] ss:$24 sps:$4 sm:$0xff]   ;;  %v6991_v26 = vld [vmem:[#allocation2 + $0x150] ss:$24 sps:$4 sm:$0xff]  }
 0xea6   :  { %v6989_v24 = vld [vmem:[#allocation2 + $0x454] ss:$24 sps:$4 sm:$0xff]   ;;  %4797 = vmatprep.subr.bf16.mxu1 %v6987_v23  ;;  %v6992_v27 = vld [vmem:[#allocation2 + $0x450] ss:$24 sps:$4 sm:$0xff]   ;;  %v6993_v28 = vld [vmem:[#allocation2 + $0x124] ss:$24 sps:$4 sm:$0xff]  }
 0xea7   :  { %4838 = vmatprep.subr.bf16.mxu0 %v6989_v24  ;;  %4798 = vmatpush1.bf16.msra.mxu1 %v6991_v26  ;;  %v6995_v29 = vld [vmem:[#allocation2 + $0x424] ss:$24 sps:$4 sm:$0xff]   ;;  %v6997_v30 = vld [vmem:[#allocation2 + $0x120] ss:$24 sps:$4 sm:$0xff]   ;;  %v6999_v34 = vld [vmem:[#allocation2 + $0xf4] ss:$24 sps:$4 sm:$0xff]  }
 0xea8   :  { %4839 = vmatpush1.bf16.msra.mxu0 %v6992_v27  ;;  %4799 = vmatprep.subr.bf16.mxu1 %v6993_v28  ;;  %v6998_v31 = vld [vmem:[#allocation2 + $0x420] ss:$24 sps:$4 sm:$0xff]   ;;  %v7001_v32 = vld [vmem:[#allocation2 + $0x3f4] ss:$24 sps:$4 sm:$0xff]   ;;  %v7003_v25 = vld [vmem:[#allocation2 + $0xf0] ss:$24 sps:$4 sm:$0xff]  }
 0xea9   :  { %4840 = vmatprep.subr.bf16.mxu0 %v6995_v29  ;;  %v7004_v10 = vld [vmem:[#allocation2 + $0x3f0] ss:$24 sps:$4 sm:$0xff]   ;;  %v7005_v38 = vld [vmem:[#allocation2 + $0xc4] ss:$24 sps:$4 sm:$0xff]   ;;  %v7009_v46 = vld [vmem:[#allocation2 + $0xc0] ss:$24 sps:$4 sm:$0xff]  }
 0xeaa   :  { %v7007_v12 = vld [vmem:[#allocation2 + $0x3c4] ss:$24 sps:$4 sm:$0xff]   ;;  %v7010_v17 = vld [vmem:[#allocation2 + $0x3c0] ss:$24 sps:$4 sm:$0xff]   ;;  %v7011_v11 = vld [vmem:[#allocation2 + $0x94] ss:$24 sps:$4 sm:$0xff]  }
 0xeab   :  { %4800 = vmatpush1.bf16.msra.mxu1 %v6997_v30  ;;  %v7013_v18 = vld [vmem:[#allocation2 + $0x394] ss:$24 sps:$4 sm:$0xff]   ;;  %v7015_v54 = vld [vmem:[#allocation2 + $0x90] ss:$24 sps:$4 sm:$0xff]   ;;  %v7017_v43 = vld [vmem:[#allocation2 + $0x64] ss:$24 sps:$4 sm:$0xff]  }
 0xeac   :  { %4841 = vmatpush1.bf16.msra.mxu0 %v6998_v31  ;;  %4801 = vmatprep.subr.bf16.mxu1 %v6999_v34  ;;  %v7016_v14 = vld [vmem:[#allocation2 + $0x390] ss:$24 sps:$4 sm:$0xff]   ;;  %v7019_v40 = vld [vmem:[#allocation2 + $0x364] ss:$24 sps:$4 sm:$0xff]   ;;  %v7021_v42 = vld [vmem:[#allocation2 + $0x60] ss:$24 sps:$4 sm:$0xff]  }
 0xead   :  { %4842 = vmatprep.subr.bf16.mxu0 %v7001_v32  ;;  %v7022_v35 = vld [vmem:[#allocation2 + $0x360] ss:$24 sps:$4 sm:$0xff]   ;;  %v7023_v41 = vld [vmem:[#allocation2 + $0x34] ss:$24 sps:$4 sm:$0xff]   ;;  %v7027_v45 = vld [vmem:[#allocation2 + $0x30] ss:$24 sps:$4 sm:$0xff]  }
 0xeae   :  { %v7025_v37 = vld [vmem:[#allocation2 + $0x334] ss:$24 sps:$4 sm:$0xff]   ;;  %v7028_v47 = vld [vmem:[#allocation2 + $0x330] ss:$24 sps:$4 sm:$0xff]   ;;  %v7029_v48 = vld [vmem:[#allocation2 + $0x4] ss:$24 sps:$4 sm:$0xff]  }
 0xeaf   :  { %4802 = vmatpush1.bf16.msra.mxu1 %v7003_v25  ;;  %v7031_v49 = vld [vmem:[#allocation2 + $0x304] ss:$24 sps:$4 sm:$0xff]   ;;  %v7033_v50 = vld [vmem:[#allocation2] ss:$24 sps:$4 sm:$0xff]   ;;  %v7035_v52 = vld [vmem:[#allocation2 + $0x2d4] ss:$24 sps:$4 sm:$0xff]  }
 0xeb0   :  { %4843 = vmatpush1.bf16.msra.mxu0 %v7004_v10  ;;  %4803 = vmatprep.subr.bf16.mxu1 %v7005_v38  ;;  %v7034_v51 = vld [vmem:[#allocation2 + $0x300] ss:$24 sps:$4 sm:$0xff]   ;;  %v7037_v53 = vld [vmem:[#allocation2 + $0x5d4] ss:$24 sps:$4 sm:$0xff]   ;;  %v7039_v55 = vld [vmem:[#allocation2 + $0x2d0] ss:$24 sps:$4 sm:$0xff]  }
 0xeb1   :  { %4844 = vmatprep.subr.bf16.mxu0 %v7007_v12  ;;  %v7040_v58 = vld [vmem:[#allocation2 + $0x5d0] ss:$24 sps:$4 sm:$0xff]   ;;  %v7041_v59 = vld [vmem:[#allocation2 + $0x2a4] ss:$24 sps:$4 sm:$0xff]   ;;  %v7045_v39 = vld [vmem:[#allocation2 + $0x2a0] ss:$24 sps:$4 sm:$0xff]  }
 0xeb2   :  { %v7043_v61 = vld [vmem:[#allocation2 + $0x5a4] ss:$24 sps:$4 sm:$0xff]   ;;  %v7046_v62 = vld [vmem:[#allocation2 + $0x5a0] ss:$24 sps:$4 sm:$0xff]   ;;  %v7047_v63 = vld [vmem:[#allocation2 + $0x274] ss:$24 sps:$4 sm:$0xff]  }
 0xeb3   :  { %4804 = vmatpush1.bf16.msra.mxu1 %v7009_v46  ;;  %v7049_v0 = vld [vmem:[#allocation2 + $0x574] ss:$24 sps:$4 sm:$0xff]   ;;  %v7051_v4 = vld [vmem:[#allocation2 + $0x270] ss:$24 sps:$4 sm:$0xff]   ;;  %v7053_v6 = vld [vmem:[#allocation2 + $0x244] ss:$24 sps:$4 sm:$0xff]  }
 0xeb4   :  { %4845 = vmatpush1.bf16.msra.mxu0 %v7010_v17  ;;  %4805 = vmatprep.subr.bf16.mxu1 %v7011_v11  ;;  %v7052_v5 = vld [vmem:[#allocation2 + $0x570] ss:$24 sps:$4 sm:$0xff]   ;;  %v7055_v7 = vld [vmem:[#allocation2 + $0x544] ss:$24 sps:$4 sm:$0xff]   ;;  %v7057_v9 = vld [vmem:[#allocation2 + $0x240] ss:$24 sps:$4 sm:$0xff]  }
 0xeb5   :  { %4846 = vmatprep.subr.bf16.mxu0 %v7013_v18  ;;  %v7058_v13 = vld [vmem:[#allocation2 + $0x540] ss:$24 sps:$4 sm:$0xff]   ;;  %v7059_v60 = vld [vmem:[#allocation2 + $0x214] ss:$24 sps:$4 sm:$0xff]   ;;  %v7063_v20 = vld [vmem:[#allocation2 + $0x210] ss:$24 sps:$4 sm:$0xff]  }
 0xeb6   :  { %v7061_v57 = vld [vmem:[#allocation2 + $0x514] ss:$24 sps:$4 sm:$0xff]   ;;  %v7064_v23 = vld [vmem:[#allocation2 + $0x510] ss:$24 sps:$4 sm:$0xff]   ;;  %v7065_v24 = vld [vmem:[#allocation2 + $0x1e4] ss:$24 sps:$4 sm:$0xff]  }
 0xeb7   :  { %4806 = vmatpush1.bf16.msra.mxu1 %v7015_v54  ;;  %v7067_v26 = vld [vmem:[#allocation2 + $0x4e4] ss:$24 sps:$4 sm:$0xff]   ;;  %v7069_v27 = vld [vmem:[#allocation2 + $0x1e0] ss:$24 sps:$4 sm:$0xff]   ;;  %v7071_v29 = vld [vmem:[#allocation2 + $0x1b4] ss:$24 sps:$4 sm:$0xff]  }
 0xeb8   :  { %4847 = vmatpush1.bf16.msra.mxu0 %v7016_v14  ;;  %4807 = vmatprep.subr.bf16.mxu1 %v7017_v43  ;;  %v7070_v28 = vld [vmem:[#allocation2 + $0x4e0] ss:$24 sps:$4 sm:$0xff]   ;;  %v7073_v30 = vld [vmem:[#allocation2 + $0x4b4] ss:$24 sps:$4 sm:$0xff]   ;;  %v7075_v31 = vld [vmem:[#allocation2 + $0x1b0] ss:$24 sps:$4 sm:$0xff]  }
 0xeb9   :  { %4848 = vmatprep.subr.bf16.mxu0 %v7019_v40  ;;  %v7076_v34 = vld [vmem:[#allocation2 + $0x4b0] ss:$24 sps:$4 sm:$0xff]   ;;  %v7077_v32 = vld [vmem:[#allocation2 + $0x184] ss:$24 sps:$4 sm:$0xff]   ;;  %v7081_v10 = vld [vmem:[#allocation2 + $0x180] ss:$24 sps:$4 sm:$0xff]  }
 0xeba   :  { %v7079_v25 = vld [vmem:[#allocation2 + $0x484] ss:$24 sps:$4 sm:$0xff]   ;;  %v7082_v38 = vld [vmem:[#allocation2 + $0x480] ss:$24 sps:$4 sm:$0xff]   ;;  %v7085_v12 = vld [vmem:[#allocation2 + $0x754] ss:$24 sps:$4 sm:$0xff]  }
 0xebb   :  { %4808 = vmatpush1.bf16.msra.mxu1 %v7021_v42  ;;  %v7088_v46 = vld [vmem:[#allocation2 + $0xa54] ss:$24 sps:$4 sm:$0xff]   ;;  %v7083_v17 = vld [vmem:[#allocation2 + $0x750] ss:$24 sps:$4 sm:$0xff]   ;;  %v7091_v18 = vld [vmem:[#allocation2 + $0x724] ss:$24 sps:$4 sm:$0xff]  }
 0xebc   :  { %4849 = vmatpush1.bf16.msra.mxu0 %v7022_v35  ;;  %4809 = vmatprep.subr.bf16.mxu1 %v7023_v41  ;;  %v7086_v11 = vld [vmem:[#allocation2 + $0xa50] ss:$24 sps:$4 sm:$0xff]   ;;  %v7094_v54 = vld [vmem:[#allocation2 + $0xa24] ss:$24 sps:$4 sm:$0xff]   ;;  %v7089_v14 = vld [vmem:[#allocation2 + $0x720] ss:$24 sps:$4 sm:$0xff]  }
 0xebd   :  { %4850 = vmatprep.subr.bf16.mxu0 %v7025_v37  ;;  %v7092_v43 = vld [vmem:[#allocation2 + $0xa20] ss:$24 sps:$4 sm:$0xff]   ;;  %v7097_v40 = vld [vmem:[#allocation2 + $0x6f4] ss:$24 sps:$4 sm:$0xff]   ;;  %v7095_v35 = vld [vmem:[#allocation2 + $0x6f0] ss:$24 sps:$4 sm:$0xff]  }
 0xebe   :  { %v7100_v42 = vld [vmem:[#allocation2 + $0x9f4] ss:$24 sps:$4 sm:$0xff]   ;;  %v7098_v41 = vld [vmem:[#allocation2 + $0x9f0] ss:$24 sps:$4 sm:$0xff]   ;;  %v7103_v37 = vld [vmem:[#allocation2 + $0x6c4] ss:$24 sps:$4 sm:$0xff]  }
 0xebf   :  { %4810 = vmatpush1.bf16.msra.mxu1 %v7027_v45  ;;  %v7106_v45 = vld [vmem:[#allocation2 + $0x9c4] ss:$24 sps:$4 sm:$0xff]   ;;  %vm9156_vm4 = vcmask 785408   ;;  %vm5773_vm1 = vcmask 74752  }
 0xec0   :  { %4851 = vmatpush1.bf16.msra.mxu0 %v7028_v47  ;;  %4811 = vmatprep.subr.bf16.mxu1 %v7029_v48  ;;  %v7101_v47 = vld [vmem:[#allocation2 + $0x6c0] ss:$24 sps:$4 sm:$0xff]   ;;  %vm9157_vm9 = vmmov %vm9156_vm4 }
 0xec1   :  { %4852 = vmatprep.subr.bf16.mxu0 %v7031_v49  ;;  %v7104_v48 = vld [vmem:[#allocation2 + $0x9c0] ss:$24 sps:$4 sm:$0xff]   ;;  %v7109_v49 = vld [vmem:[#allocation2 + $0x694] ss:$24 sps:$4 sm:$0xff]   ;;  %vm9158_vm11 = vmmov %vm9156_vm4 }
 0xec3   :  { %4812 = vmatpush1.bf16.msra.mxu1 %v7033_v50  ;;  %v7112_v50 = vld [vmem:[#allocation2 + $0x994] ss:$24 sps:$4 sm:$0xff]  }
 0xec4   :  { %4853 = vmatpush1.bf16.msra.mxu0 %v7034_v51  ;;  %4813 = vmatprep.subr.bf16.mxu1 %v7035_v52  ;;  %v7107_v51 = vld [vmem:[#allocation2 + $0x690] ss:$24 sps:$4 sm:$0xff]  }
 0xec5   :  { %4854 = vmatprep.subr.bf16.mxu0 %v7037_v53  ;;  %v7110_v52 = vld [vmem:[#allocation2 + $0x990] ss:$24 sps:$4 sm:$0xff]   ;;  %v7115_v53 = vld [vmem:[#allocation2 + $0x664] ss:$24 sps:$4 sm:$0xff]  }
 0xec7   :  { %4814 = vmatpush2.bf16.msra.mxu1 %v7039_v55  ;;  %v7118_v55 = vld [vmem:[#allocation2 + $0x964] ss:$24 sps:$4 sm:$0xff]  }
 0xec8   :  { %4855 = vmatpush2.bf16.msra.mxu0 %v7040_v58  ;;  %4815 = vmatprep.subr.bf16.mxu1 %v7041_v59  ;;  %v7113_v58 = vld [vmem:[#allocation2 + $0x660] ss:$24 sps:$4 sm:$0xff]  }
 0xec9   :  { %4856 = vmatprep.subr.bf16.mxu0 %v7043_v61  ;;  %v7116_v59 = vld [vmem:[#allocation2 + $0x960] ss:$24 sps:$4 sm:$0xff]   ;;  %v7121_v61 = vld [vmem:[#allocation2 + $0x634] ss:$24 sps:$4 sm:$0xff]  }
 0xecb   :  { %4816 = vmatpush2.bf16.msra.mxu1 %v7045_v39  ;;  %v7124_v39 = vld [vmem:[#allocation2 + $0x934] ss:$24 sps:$4 sm:$0xff]  }
 0xecc   :  { %4857 = vmatpush2.bf16.msra.mxu0 %v7046_v62  ;;  %4817 = vmatprep.subr.bf16.mxu1 %v7047_v63  ;;  %v7119_v62 = vld [vmem:[#allocation2 + $0x630] ss:$24 sps:$4 sm:$0xff]  }
 0xecd   :  { %4858 = vmatprep.subr.bf16.mxu0 %v7049_v0  ;;  %v7122_v63 = vld [vmem:[#allocation2 + $0x930] ss:$24 sps:$4 sm:$0xff]   ;;  %v7127_v0 = vld [vmem:[#allocation2 + $0x604] ss:$24 sps:$4 sm:$0xff]  }
 0xecf   :  { %4818 = vmatpush2.bf16.msra.mxu1 %v7051_v4  ;;  %v7130_v4 = vld [vmem:[#allocation2 + $0x904] ss:$24 sps:$4 sm:$0xff]  }
 0xed0   :  { %4859 = vmatpush2.bf16.msra.mxu0 %v7052_v5  ;;  %4819 = vmatprep.subr.bf16.mxu1 %v7053_v6  ;;  %v7125_v5 = vld [vmem:[#allocation2 + $0x600] ss:$24 sps:$4 sm:$0xff]  }
 0xed1   :  { %4860 = vmatprep.subr.bf16.mxu0 %v7055_v7  ;;  %v7128_v6 = vld [vmem:[#allocation2 + $0x900] ss:$24 sps:$4 sm:$0xff]   ;;  %v7133_v7 = vld [vmem:[#allocation2 + $0x8d4] ss:$24 sps:$4 sm:$0xff]  }
 0xed3   :  { %4820 = vmatpush2.bf16.msra.mxu1 %v7057_v9  ;;  %v7136_v9 = vld [vmem:[#allocation2 + $0xbd4] ss:$24 sps:$4 sm:$0xff]  }
 0xed4   :  { %4861 = vmatpush2.bf16.msra.mxu0 %v7058_v13  ;;  %4821 = vmatprep.subr.bf16.mxu1 %v7059_v60  ;;  %v7131_v13 = vld [vmem:[#allocation2 + $0x8d0] ss:$24 sps:$4 sm:$0xff]  }
 0xed5   :  { %4862 = vmatprep.subr.bf16.mxu0 %v7061_v57  ;;  %v7134_v60 = vld [vmem:[#allocation2 + $0xbd0] ss:$24 sps:$4 sm:$0xff]   ;;  %v7139_v57 = vld [vmem:[#allocation2 + $0x8a4] ss:$24 sps:$4 sm:$0xff]  }
 0xed7   :  { %4822 = vmatpush2.bf16.msra.mxu1 %v7063_v20  ;;  %v7142_v20 = vld [vmem:[#allocation2 + $0xba4] ss:$24 sps:$4 sm:$0xff]  }
 0xed8   :  { %4863 = vmatpush2.bf16.msra.mxu0 %v7064_v23  ;;  %4823 = vmatprep.subr.bf16.mxu1 %v7065_v24  ;;  %v7137_v23 = vld [vmem:[#allocation2 + $0x8a0] ss:$24 sps:$4 sm:$0xff]  }
 0xed9   :  { %4864 = vmatprep.subr.bf16.mxu0 %v7067_v26  ;;  %v7140_v24 = vld [vmem:[#allocation2 + $0xba0] ss:$24 sps:$4 sm:$0xff]   ;;  %v7145_v26 = vld [vmem:[#allocation2 + $0x874] ss:$24 sps:$4 sm:$0xff]  }
 0xedb   :  { %4824 = vmatpush2.bf16.msra.mxu1 %v7069_v27  ;;  %v7148_v27 = vld [vmem:[#allocation2 + $0xb74] ss:$24 sps:$4 sm:$0xff]  }
 0xedc   :  { %4865 = vmatpush2.bf16.msra.mxu0 %v7070_v28  ;;  %4825 = vmatprep.subr.bf16.mxu1 %v7071_v29  ;;  %v7143_v28 = vld [vmem:[#allocation2 + $0x870] ss:$24 sps:$4 sm:$0xff]  }
 0xedd   :  { %4866 = vmatprep.subr.bf16.mxu0 %v7073_v30  ;;  %v7146_v29 = vld [vmem:[#allocation2 + $0xb70] ss:$24 sps:$4 sm:$0xff]   ;;  %v7151_v30 = vld [vmem:[#allocation2 + $0x844] ss:$24 sps:$4 sm:$0xff]  }
 0xedf   :  { %4826 = vmatpush2.bf16.msra.mxu1 %v7075_v31  ;;  %v7154_v31 = vld [vmem:[#allocation2 + $0xb44] ss:$24 sps:$4 sm:$0xff]  }
 0xee0   :  { %4867 = vmatpush2.bf16.msra.mxu0 %v7076_v34  ;;  %4827 = vmatprep.subr.bf16.mxu1 %v7077_v32  ;;  %v7149_v34 = vld [vmem:[#allocation2 + $0x840] ss:$24 sps:$4 sm:$0xff]  }
 0xee1   :  { %4868 = vmatprep.subr.bf16.mxu0 %v7079_v25  ;;  %v7152_v32 = vld [vmem:[#allocation2 + $0xb40] ss:$24 sps:$4 sm:$0xff]   ;;  %v7157_v25 = vld [vmem:[#allocation2 + $0x814] ss:$24 sps:$4 sm:$0xff]  }
 0xee3   :  { %4828 = vmatpush2.bf16.msra.mxu1 %v7081_v10  ;;  %v7160_v10 = vld [vmem:[#allocation2 + $0xb14] ss:$24 sps:$4 sm:$0xff]  }
 0xee4   :  { %4869 = vmatpush2.bf16.msra.mxu0 %v7082_v38  ;;  %4879 = vmatprep.subr.bf16.mxu1 %v7085_v12  ;;  %v7155_v38 = vld [vmem:[#allocation2 + $0x810] ss:$24 sps:$4 sm:$0xff]  }
 0xee5   :  { %4920 = vmatprep.subr.bf16.mxu0 %v7088_v46  ;;  %v7158_v12 = vld [vmem:[#allocation2 + $0xb10] ss:$24 sps:$4 sm:$0xff]   ;;  %v7163_v46 = vld [vmem:[#allocation2 + $0x7e4] ss:$24 sps:$4 sm:$0xff]  }
 0xee6   :  { %4830 = vmatmul.mubr.bf16.vlgmr.msra.gmra.mxu1 %v8678_v15 }
 0xee7   :  { %4871 = vmatmul.mubr.bf16.vlgmr.msra.gmra.mxu0 %v8692_v36  ;;  %4880 = vmatpush1.bf16.msra.mxu1 %v7083_v17  ;;  %v7166_v17 = vld [vmem:[#allocation2 + $0xae4] ss:$24 sps:$4 sm:$0xff]  }
 0xee8   :  { %4921 = vmatpush1.bf16.msra.mxu0 %v7086_v11  ;;  %4881 = vmatprep.subr.bf16.mxu1 %v7091_v18  ;;  %v7161_v11 = vld [vmem:[#allocation2 + $0x7e0] ss:$24 sps:$4 sm:$0xff]  }
 0xee9   :  { %4922 = vmatprep.subr.bf16.mxu0 %v7094_v54  ;;  %4911 = vmatprep.mubr.bf16.mxu1 %v8721_v21  ;;  %v7164_v18 = vld [vmem:[#allocation2 + $0xae0] ss:$24 sps:$4 sm:$0xff]   ;;  %v7169_v54 = vld [vmem:[#allocation2 + $0x7b4] ss:$24 sps:$4 sm:$0xff]  }
 0xeea   :  { %4952 = vmatprep.mubr.bf16.mxu0 %v8717_v19 }
 0xeeb   :  { %4882 = vmatpush1.bf16.msra.mxu1 %v7089_v14  ;;  %v7172_v14 = vld [vmem:[#allocation2 + $0xab4] ss:$24 sps:$4 sm:$0xff]  }
 0xeec   :  { %4923 = vmatpush1.bf16.msra.mxu0 %v7092_v43  ;;  %4883 = vmatprep.subr.bf16.mxu1 %v7097_v40  ;;  %v7167_v43 = vld [vmem:[#allocation2 + $0x7b0] ss:$24 sps:$4 sm:$0xff]  }
 0xeed   :  { %4924 = vmatprep.subr.bf16.mxu0 %v7100_v42  ;;  %v7170_v40 = vld [vmem:[#allocation2 + $0xab0] ss:$24 sps:$4 sm:$0xff]   ;;  %v7175_v42 = vld [vmem:[#allocation2 + $0x784] ss:$24 sps:$4 sm:$0xff]  }
 0xeef   :  { %4884 = vmatpush1.bf16.msra.mxu1 %v7095_v35  ;;  %v7178_v35 = vld [vmem:[#allocation2 + $0xa84] ss:$24 sps:$4 sm:$0xff]  }
 0xef0   :  { %4925 = vmatpush1.bf16.msra.mxu0 %v7098_v41  ;;  %4885 = vmatprep.subr.bf16.mxu1 %v7103_v37  ;;  %v7173_v41 = vld [vmem:[#allocation2 + $0x780] ss:$24 sps:$4 sm:$0xff]  }
 0xef1   :  { %4926 = vmatprep.subr.bf16.mxu0 %v7106_v45  ;;  %v7176_v37 = vld [vmem:[#allocation2 + $0xa80] ss:$24 sps:$4 sm:$0xff]   ;;  %v7181_v45 = vld [vmem:[#allocation2 + $0xcf4] ss:$24 sps:$4 sm:$0xff]  }
 0xef3   :  { %4886 = vmatpush1.bf16.msra.mxu1 %v7101_v47  ;;  %v7184_v47 = vld [vmem:[#allocation2 + $0x15c] ss:$24 sps:$4 sm:$0xff]  }
 0xef4   :  { %4927 = vmatpush1.bf16.msra.mxu0 %v7104_v48  ;;  %4887 = vmatprep.subr.bf16.mxu1 %v7109_v49  ;;  %v7179_v48 = vld [vmem:[#allocation2 + $0xcf0] ss:$24 sps:$4 sm:$0xff]  }
 0xef5   :  { %4928 = vmatprep.subr.bf16.mxu0 %v7112_v50  ;;  %v7182_v49 = vld [vmem:[#allocation2 + $0x158] ss:$24 sps:$4 sm:$0xff]   ;;  %v7187_v50 = vld [vmem:[#allocation2 + $0xcc4] ss:$24 sps:$4 sm:$0xff]  }
 0xef7   :  { %4888 = vmatpush1.bf16.msra.mxu1 %v7107_v51  ;;  %v7190_v51 = vld [vmem:[#allocation2 + $0x12c] ss:$24 sps:$4 sm:$0xff]  }
 0xef8   :  { %4929 = vmatpush1.bf16.msra.mxu0 %v7110_v52  ;;  %4889 = vmatprep.subr.bf16.mxu1 %v7115_v53  ;;  %v7185_v52 = vld [vmem:[#allocation2 + $0xcc0] ss:$24 sps:$4 sm:$0xff]  }
 0xef9   :  { %4930 = vmatprep.subr.bf16.mxu0 %v7118_v55  ;;  %v7188_v53 = vld [vmem:[#allocation2 + $0x128] ss:$24 sps:$4 sm:$0xff]   ;;  %v7193_v55 = vld [vmem:[#allocation2 + $0xc94] ss:$24 sps:$4 sm:$0xff]  }
 0xefb   :  { %4890 = vmatpush1.bf16.msra.mxu1 %v7113_v58  ;;  %v7196_v58 = vld [vmem:[#allocation2 + $0xfc] ss:$24 sps:$4 sm:$0xff]  }
 0xefc   :  { %4931 = vmatpush1.bf16.msra.mxu0 %v7116_v59  ;;  %4891 = vmatprep.subr.bf16.mxu1 %v7121_v61  ;;  %v7191_v59 = vld [vmem:[#allocation2 + $0xc90] ss:$24 sps:$4 sm:$0xff]  }
 0xefd   :  { %4932 = vmatprep.subr.bf16.mxu0 %v7124_v39  ;;  %v7194_v61 = vld [vmem:[#allocation2 + $0xf8] ss:$24 sps:$4 sm:$0xff]   ;;  %v7199_v39 = vld [vmem:[#allocation2 + $0xc64] ss:$24 sps:$4 sm:$0xff]  }
 0xeff   :  { %4892 = vmatpush1.bf16.msra.mxu1 %v7119_v62  ;;  %v7202_v62 = vld [vmem:[#allocation2 + $0xcc] ss:$24 sps:$4 sm:$0xff]  }
 0xf00   :  { %4933 = vmatpush1.bf16.msra.mxu0 %v7122_v63  ;;  %4893 = vmatprep.subr.bf16.mxu1 %v7127_v0  ;;  %v7197_v63 = vld [vmem:[#allocation2 + $0xc60] ss:$24 sps:$4 sm:$0xff]  }
 0xf01   :  { %4934 = vmatprep.subr.bf16.mxu0 %v7130_v4  ;;  %v7200_v0 = vld [vmem:[#allocation2 + $0xc8] ss:$24 sps:$4 sm:$0xff]   ;;  %v7205_v4 = vld [vmem:[#allocation2 + $0xc34] ss:$24 sps:$4 sm:$0xff]  }
 0xf03   :  { %4894 = vmatpush1.bf16.msra.mxu1 %v7125_v5  ;;  %v7208_v5 = vld [vmem:[#allocation2 + $0x9c] ss:$24 sps:$4 sm:$0xff]  }
 0xf04   :  { %4935 = vmatpush1.bf16.msra.mxu0 %v7128_v6  ;;  %4895 = vmatprep.subr.bf16.mxu1 %v7133_v7  ;;  %v7203_v6 = vld [vmem:[#allocation2 + $0xc30] ss:$24 sps:$4 sm:$0xff]  }
 0xf05   :  { %4936 = vmatprep.subr.bf16.mxu0 %v7136_v9  ;;  %v7206_v7 = vld [vmem:[#allocation2 + $0x98] ss:$24 sps:$4 sm:$0xff]   ;;  %v7211_v9 = vld [vmem:[#allocation2 + $0xc04] ss:$24 sps:$4 sm:$0xff]  }
 0xf07   :  { %4896 = vmatpush2.bf16.msra.mxu1 %v7131_v13  ;;  %v7214_v13 = vld [vmem:[#allocation2 + $0x6c] ss:$24 sps:$4 sm:$0xff]  }
 0xf08   :  { %4937 = vmatpush2.bf16.msra.mxu0 %v7134_v60  ;;  %4897 = vmatprep.subr.bf16.mxu1 %v7139_v57  ;;  %v7209_v60 = vld [vmem:[#allocation2 + $0xc00] ss:$24 sps:$4 sm:$0xff]  }
 0xf09   :  { %4938 = vmatprep.subr.bf16.mxu0 %v7142_v20  ;;  %v7212_v57 = vld [vmem:[#allocation2 + $0x68] ss:$24 sps:$4 sm:$0xff]   ;;  %v7217_v20 = vld [vmem:[#allocation2 + $0x3c] ss:$24 sps:$4 sm:$0xff]  }
 0xf0b   :  { %4898 = vmatpush2.bf16.msra.mxu1 %v7137_v23  ;;  %v7220_v23 = vld [vmem:[#allocation2 + $0x45c] ss:$24 sps:$4 sm:$0xff]  }
 0xf0c   :  { %4939 = vmatpush2.bf16.msra.mxu0 %v7140_v24  ;;  %4899 = vmatprep.subr.bf16.mxu1 %v7145_v26  ;;  %v7215_v24 = vld [vmem:[#allocation2 + $0x38] ss:$24 sps:$4 sm:$0xff]  }
 0xf0d   :  { %4940 = vmatprep.subr.bf16.mxu0 %v7148_v27  ;;  %v7218_v26 = vld [vmem:[#allocation2 + $0x458] ss:$24 sps:$4 sm:$0xff]   ;;  %v7223_v27 = vld [vmem:[#allocation2 + $0xc] ss:$24 sps:$4 sm:$0xff]  }
 0xf0f   :  { %4900 = vmatpush2.bf16.msra.mxu1 %v7143_v28  ;;  %v7226_v28 = vld [vmem:[#allocation2 + $0x42c] ss:$24 sps:$4 sm:$0xff]  }
 0xf10   :  { %4941 = vmatpush2.bf16.msra.mxu0 %v7146_v29  ;;  %4901 = vmatprep.subr.bf16.mxu1 %v7151_v30  ;;  %v7221_v29 = vld [vmem:[#allocation2 + $0x8] ss:$24 sps:$4 sm:$0xff]  }
 0xf11   :  { %4942 = vmatprep.subr.bf16.mxu0 %v7154_v31  ;;  %v7224_v30 = vld [vmem:[#allocation2 + $0x428] ss:$24 sps:$4 sm:$0xff]   ;;  %v7229_v31 = vld [vmem:[#allocation2 + $0x2dc] ss:$24 sps:$4 sm:$0xff]  }
 0xf13   :  { %4902 = vmatpush2.bf16.msra.mxu1 %v7149_v34  ;;  %v7232_v34 = vld [vmem:[#allocation2 + $0x3fc] ss:$24 sps:$4 sm:$0xff]  }
 0xf14   :  { %4943 = vmatpush2.bf16.msra.mxu0 %v7152_v32  ;;  %4903 = vmatprep.subr.bf16.mxu1 %v7157_v25  ;;  %v7227_v32 = vld [vmem:[#allocation2 + $0x2d8] ss:$24 sps:$4 sm:$0xff]  }
 0xf15   :  { %4944 = vmatprep.subr.bf16.mxu0 %v7160_v10  ;;  %v7230_v25 = vld [vmem:[#allocation2 + $0x3f8] ss:$24 sps:$4 sm:$0xff]   ;;  %v7235_v10 = vld [vmem:[#allocation2 + $0x2ac] ss:$24 sps:$4 sm:$0xff]  }
 0xf17   :  { %4904 = vmatpush2.bf16.msra.mxu1 %v7155_v38  ;;  %v7238_v38 = vld [vmem:[#allocation2 + $0x3cc] ss:$24 sps:$4 sm:$0xff]  }
 0xf18   :  { %4945 = vmatpush2.bf16.msra.mxu0 %v7158_v12  ;;  %4905 = vmatprep.subr.bf16.mxu1 %v7163_v46  ;;  %v7233_v12 = vld [vmem:[#allocation2 + $0x2a8] ss:$24 sps:$4 sm:$0xff]  }
 0xf19   :  { %4946 = vmatprep.subr.bf16.mxu0 %v7166_v17  ;;  %v7236_v46 = vld [vmem:[#allocation2 + $0x3c8] ss:$24 sps:$4 sm:$0xff]   ;;  %v7241_v17 = vld [vmem:[#allocation2 + $0x27c] ss:$24 sps:$4 sm:$0xff]  }
 0xf1b   :  { %4906 = vmatpush2.bf16.msra.mxu1 %v7161_v11  ;;  %v7244_v11 = vld [vmem:[#allocation2 + $0x39c] ss:$24 sps:$4 sm:$0xff]  }
 0xf1c   :  { %4947 = vmatpush2.bf16.msra.mxu0 %v7164_v18  ;;  %4907 = vmatprep.subr.bf16.mxu1 %v7169_v54  ;;  %v7239_v18 = vld [vmem:[#allocation2 + $0x278] ss:$24 sps:$4 sm:$0xff]  }
 0xf1d   :  { %4948 = vmatprep.subr.bf16.mxu0 %v7172_v14  ;;  %v7242_v54 = vld [vmem:[#allocation2 + $0x398] ss:$24 sps:$4 sm:$0xff]   ;;  %v7247_v14 = vld [vmem:[#allocation2 + $0x24c] ss:$24 sps:$4 sm:$0xff]  }
 0xf1f   :  { %4908 = vmatpush2.bf16.msra.mxu1 %v7167_v43  ;;  %v7250_v43 = vld [vmem:[#allocation2 + $0x36c] ss:$24 sps:$4 sm:$0xff]  }
 0xf20   :  { %4949 = vmatpush2.bf16.msra.mxu0 %v7170_v40  ;;  %4909 = vmatprep.subr.bf16.mxu1 %v7175_v42  ;;  %v7245_v40 = vld [vmem:[#allocation2 + $0x248] ss:$24 sps:$4 sm:$0xff]  }
 0xf21   :  { %4950 = vmatprep.subr.bf16.mxu0 %v7178_v35  ;;  %v7248_v42 = vld [vmem:[#allocation2 + $0x368] ss:$24 sps:$4 sm:$0xff]   ;;  %v7253_v35 = vld [vmem:[#allocation2 + $0x21c] ss:$24 sps:$4 sm:$0xff]  }
 0xf23   :  { %4910 = vmatpush2.bf16.msra.mxu1 %v7173_v41  ;;  %v7256_v41 = vld [vmem:[#allocation2 + $0x33c] ss:$24 sps:$4 sm:$0xff]  }
 0xf24   :  { %4951 = vmatpush2.bf16.msra.mxu0 %v7176_v37  ;;  %4965 = vmatprep.subr.bf16.mxu1 %v7181_v45  ;;  %v7251_v37 = vld [vmem:[#allocation2 + $0x218] ss:$24 sps:$4 sm:$0xff]  }
 0xf25   :  { %5002 = vmatprep.subr.bf16.mxu0 %v7184_v47  ;;  %v7254_v45 = vld [vmem:[#allocation2 + $0x338] ss:$24 sps:$4 sm:$0xff]   ;;  %v7259_v47 = vld [vmem:[#allocation2 + $0x1ec] ss:$24 sps:$4 sm:$0xff]  }
 0xf26   :  { %4912 = vmatmul.mubr.bf16.vlgmr.msra.gmra.mxu1 %v8707_v56 }
 0xf27   :  { %4953 = vmatmul.mubr.bf16.vlgmr.msra.gmra.mxu0 %v8723_v22  ;;  %4966 = vmatpush1.bf16.msra.mxu1 %v7179_v48  ;;  %v7262_v48 = vld [vmem:[#allocation2 + $0x30c] ss:$24 sps:$4 sm:$0xff]  }
 0xf28   :  { %5003 = vmatpush1.bf16.msra.mxu0 %v7182_v49  ;;  %4967 = vmatprep.subr.bf16.mxu1 %v7187_v50  ;;  %v7257_v49 = vld [vmem:[#allocation2 + $0x1e8] ss:$24 sps:$4 sm:$0xff]  }
 0xf29   :  { %5004 = vmatprep.subr.bf16.mxu0 %v7190_v51  ;;  %4993 = vmatprep.mubr.bf16.mxu1 %v7866_v8  ;;  %v7260_v50 = vld [vmem:[#allocation2 + $0x308] ss:$24 sps:$4 sm:$0xff]   ;;  %v7265_v51 = vld [vmem:[#allocation2 + $0x1bc] ss:$24 sps:$4 sm:$0xff]  }
 0xf2a   :  { %5034 = vmatprep.mubr.bf16.mxu0 %v8680_v16 }
 0xf2b   :  { %4968 = vmatpush1.bf16.msra.mxu1 %v7185_v52  ;;  %v7268_v52 = vld [vmem:[#allocation2 + $0x5dc] ss:$24 sps:$4 sm:$0xff]  }
 0xf2c   :  { %5005 = vmatpush1.bf16.msra.mxu0 %v7188_v53  ;;  %4969 = vmatprep.subr.bf16.mxu1 %v7193_v55  ;;  %v7263_v53 = vld [vmem:[#allocation2 + $0x1b8] ss:$24 sps:$4 sm:$0xff]  }
 0xf2d   :  { %5006 = vmatprep.subr.bf16.mxu0 %v7196_v58  ;;  %v7266_v55 = vld [vmem:[#allocation2 + $0x5d8] ss:$24 sps:$4 sm:$0xff]   ;;  %v7271_v58 = vld [vmem:[#allocation2 + $0x18c] ss:$24 sps:$4 sm:$0xff]  }
 0xf2f   :  { %4970 = vmatpush1.bf16.msra.mxu1 %v7191_v59  ;;  %v7274_v59 = vld [vmem:[#allocation2 + $0x5ac] ss:$24 sps:$4 sm:$0xff]  }
 0xf30   :  { %5007 = vmatpush1.bf16.msra.mxu0 %v7194_v61  ;;  %4971 = vmatprep.subr.bf16.mxu1 %v7199_v39  ;;  %v7269_v61 = vld [vmem:[#allocation2 + $0x188] ss:$24 sps:$4 sm:$0xff]  }
 0xf31   :  { %5008 = vmatprep.subr.bf16.mxu0 %v7202_v62  ;;  %v7272_v39 = vld [vmem:[#allocation2 + $0x5a8] ss:$24 sps:$4 sm:$0xff]   ;;  %v7277_v62 = vld [vmem:[#allocation2 + $0x57c] ss:$24 sps:$4 sm:$0xff]  }
 0xf33   :  { %4972 = vmatpush1.bf16.msra.mxu1 %v7197_v63  ;;  %v7280_v63 = vld [vmem:[#allocation2 + $0x75c] ss:$24 sps:$4 sm:$0xff]  }
 0xf34   :  { %5009 = vmatpush1.bf16.msra.mxu0 %v7200_v0  ;;  %4973 = vmatprep.subr.bf16.mxu1 %v7205_v4  ;;  %v7275_v0 = vld [vmem:[#allocation2 + $0x578] ss:$24 sps:$4 sm:$0xff]  }
 0xf35   :  { %5010 = vmatprep.subr.bf16.mxu0 %v7208_v5  ;;  %v7278_v4 = vld [vmem:[#allocation2 + $0x758] ss:$24 sps:$4 sm:$0xff]   ;;  %v7283_v5 = vld [vmem:[#allocation2 + $0x54c] ss:$24 sps:$4 sm:$0xff]  }
 0xf37   :  { %4974 = vmatpush1.bf16.msra.mxu1 %v7203_v6  ;;  %v7286_v6 = vld [vmem:[#allocation2 + $0x72c] ss:$24 sps:$4 sm:$0xff]  }
 0xf38   :  { %5011 = vmatpush1.bf16.msra.mxu0 %v7206_v7  ;;  %4975 = vmatprep.subr.bf16.mxu1 %v7211_v9  ;;  %v7281_v7 = vld [vmem:[#allocation2 + $0x548] ss:$24 sps:$4 sm:$0xff]  }
 0xf39   :  { %5012 = vmatprep.subr.bf16.mxu0 %v7214_v13  ;;  %v7284_v9 = vld [vmem:[#allocation2 + $0x728] ss:$24 sps:$4 sm:$0xff]   ;;  %v7289_v13 = vld [vmem:[#allocation2 + $0x51c] ss:$24 sps:$4 sm:$0xff]  }
 0xf3b   :  { %4976 = vmatpush1.bf16.msra.mxu1 %v7209_v60  ;;  %v7292_v60 = vld [vmem:[#allocation2 + $0x6fc] ss:$24 sps:$4 sm:$0xff]  }
 0xf3c   :  { %5013 = vmatpush1.bf16.msra.mxu0 %v7212_v57  ;;  %5043 = vmatprep.subr.bf16.mxu1 %v7220_v23  ;;  %v7287_v57 = vld [vmem:[#allocation2 + $0x518] ss:$24 sps:$4 sm:$0xff]   ;;  %v7295_v23 = vld [vmem:[#allocation2 + $0x4ec] ss:$24 sps:$4 sm:$0xff]  }
 0xf3d   :  { %5014 = vmatprep.subr.bf16.mxu0 %v7217_v20  ;;  %v7290_v20 = vld [vmem:[#allocation2 + $0x6f8] ss:$24 sps:$4 sm:$0xff]  }
 0xf3e   :  { %6259 = vmatmul.mubr.msk.bf16.vlgmr.msra.gmra.mxu1 %vm9156_vm4, %v8715_v44 }
 0xf3f   :  { %5044 = vmatpush1.bf16.msra.mxu1 %v7218_v26  ;;  %5075 = vmatprep.mubr.bf16.mxu1 %v8696_v33  ;;  %v7293_v26 = vld [vmem:[#allocation2 + $0x4e8] ss:$24 sps:$4 sm:$0xff]  }
 0xf40   :  { %5015 = vmatpush1.bf16.msra.mxu0 %v7215_v24  ;;  %5045 = vmatprep.subr.bf16.mxu1 %v7226_v28  ;;  %v7298_v24 = vld [vmem:[#allocation2 + $0x6cc] ss:$24 sps:$4 sm:$0xff]   ;;  %v7301_v28 = vld [vmem:[#allocation2 + $0x4bc] ss:$24 sps:$4 sm:$0xff]  }
 0xf41   :  { %5016 = vmatprep.subr.bf16.mxu0 %v7223_v27  ;;  %v7296_v27 = vld [vmem:[#allocation2 + $0x6c8] ss:$24 sps:$4 sm:$0xff]  }
 0xf43   :  { %5046 = vmatpush1.bf16.msra.mxu1 %v7224_v30  ;;  %v7299_v30 = vld [vmem:[#allocation2 + $0x4b8] ss:$24 sps:$4 sm:$0xff]  }
 0xf44   :  { %5017 = vmatpush1.bf16.msra.mxu0 %v7221_v29  ;;  %5047 = vmatprep.subr.bf16.mxu1 %v7232_v34  ;;  %v7304_v29 = vld [vmem:[#allocation2 + $0x69c] ss:$24 sps:$4 sm:$0xff]   ;;  %v7307_v34 = vld [vmem:[#allocation2 + $0x48c] ss:$24 sps:$4 sm:$0xff]  }
 0xf45   :  { %5018 = vmatprep.subr.bf16.mxu0 %v7229_v31  ;;  %v7302_v31 = vld [vmem:[#allocation2 + $0x698] ss:$24 sps:$4 sm:$0xff]  }
 0xf47   :  { %5048 = vmatpush1.bf16.msra.mxu1 %v7230_v25  ;;  %v7305_v25 = vld [vmem:[#allocation2 + $0x488] ss:$24 sps:$4 sm:$0xff]  }
 0xf48   :  { %5019 = vmatpush2.bf16.msra.mxu0 %v7227_v32  ;;  %5049 = vmatprep.subr.bf16.mxu1 %v7238_v38  ;;  %v7310_v32 = vld [vmem:[#allocation2 + $0x66c] ss:$24 sps:$4 sm:$0xff]   ;;  %v7313_v38 = vld [vmem:[#allocation2 + $0x63c] ss:$24 sps:$4 sm:$0xff]  }
 0xf49   :  { %5020 = vmatprep.subr.bf16.mxu0 %v7235_v10  ;;  %v7308_v10 = vld [vmem:[#allocation2 + $0x668] ss:$24 sps:$4 sm:$0xff]  }
 0xf4b   :  { %5050 = vmatpush1.bf16.msra.mxu1 %v7236_v46  ;;  %v7311_v46 = vld [vmem:[#allocation2 + $0x638] ss:$24 sps:$4 sm:$0xff]  }
 0xf4c   :  { %5021 = vmatpush2.bf16.msra.mxu0 %v7233_v12  ;;  %5051 = vmatprep.subr.bf16.mxu1 %v7244_v11  ;;  %v7316_v12 = vld [vmem:[#allocation2 + $0xa5c] ss:$24 sps:$4 sm:$0xff]   ;;  %v7319_v11 = vld [vmem:[#allocation2 + $0x60c] ss:$24 sps:$4 sm:$0xff]  }
 0xf4d   :  { %5022 = vmatprep.subr.bf16.mxu0 %v7241_v17  ;;  %v7314_v17 = vld [vmem:[#allocation2 + $0xa58] ss:$24 sps:$4 sm:$0xff]  }
 0xf4f   :  { %5052 = vmatpush1.bf16.msra.mxu1 %v7242_v54  ;;  %v7317_v54 = vld [vmem:[#allocation2 + $0x608] ss:$24 sps:$4 sm:$0xff]  }
 0xf50   :  { %5023 = vmatpush2.bf16.msra.mxu0 %v7239_v18  ;;  %5053 = vmatprep.subr.bf16.mxu1 %v7250_v43  ;;  %v7322_v18 = vld [vmem:[#allocation2 + $0xa2c] ss:$24 sps:$4 sm:$0xff]   ;;  %v7325_v43 = vld [vmem:[#allocation2 + $0x8dc] ss:$24 sps:$4 sm:$0xff]  }
 0xf51   :  { %5024 = vmatprep.subr.bf16.mxu0 %v7247_v14  ;;  %v7320_v14 = vld [vmem:[#allocation2 + $0xa28] ss:$24 sps:$4 sm:$0xff]  }
 0xf53   :  { %5054 = vmatpush1.bf16.msra.mxu1 %v7248_v42  ;;  %v7323_v42 = vld [vmem:[#allocation2 + $0x8d8] ss:$24 sps:$4 sm:$0xff]  }
 0xf54   :  { %5025 = vmatpush2.bf16.msra.mxu0 %v7245_v40  ;;  %5055 = vmatprep.subr.bf16.mxu1 %v7256_v41  ;;  %v7328_v40 = vld [vmem:[#allocation2 + $0x9fc] ss:$24 sps:$4 sm:$0xff]   ;;  %v7331_v41 = vld [vmem:[#allocation2 + $0x8ac] ss:$24 sps:$4 sm:$0xff]  }
 0xf55   :  { %5026 = vmatprep.subr.bf16.mxu0 %v7253_v35  ;;  %v7326_v35 = vld [vmem:[#allocation2 + $0x9f8] ss:$24 sps:$4 sm:$0xff]  }
 0xf57   :  { %5056 = vmatpush1.bf16.msra.mxu1 %v7254_v45  ;;  %v7329_v45 = vld [vmem:[#allocation2 + $0x8a8] ss:$24 sps:$4 sm:$0xff]  }
 0xf58   :  { %5027 = vmatpush2.bf16.msra.mxu0 %v7251_v37  ;;  %5057 = vmatprep.subr.bf16.mxu1 %v7262_v48  ;;  %v7334_v37 = vld [vmem:[#allocation2 + $0x9cc] ss:$24 sps:$4 sm:$0xff]   ;;  %v7337_v48 = vld [vmem:[#allocation2 + $0x87c] ss:$24 sps:$4 sm:$0xff]  }
 0xf59   :  { %5028 = vmatprep.subr.bf16.mxu0 %v7259_v47  ;;  %v7332_v47 = vld [vmem:[#allocation2 + $0x9c8] ss:$24 sps:$4 sm:$0xff]  }
 0xf5b   :  { %5058 = vmatpush1.bf16.msra.mxu1 %v7260_v50  ;;  %v7335_v50 = vld [vmem:[#allocation2 + $0x878] ss:$24 sps:$4 sm:$0xff]  }
 0xf5c   :  { %5029 = vmatpush2.bf16.msra.mxu0 %v7257_v49  ;;  %5059 = vmatprep.subr.bf16.mxu1 %v7268_v52  ;;  %v7340_v49 = vld [vmem:[#allocation2 + $0x99c] ss:$24 sps:$4 sm:$0xff]   ;;  %v7343_v52 = vld [vmem:[#allocation2 + $0x84c] ss:$24 sps:$4 sm:$0xff]  }
 0xf5d   :  { %5030 = vmatprep.subr.bf16.mxu0 %v7265_v51  ;;  %v7338_v51 = vld [vmem:[#allocation2 + $0x998] ss:$24 sps:$4 sm:$0xff]  }
 0xf5f   :  { %5060 = vmatpush2.bf16.msra.mxu1 %v7266_v55  ;;  %v7341_v55 = vld [vmem:[#allocation2 + $0x848] ss:$24 sps:$4 sm:$0xff]  }
 0xf60   :  { %5031 = vmatpush2.bf16.msra.mxu0 %v7263_v53  ;;  %5061 = vmatprep.subr.bf16.mxu1 %v7274_v59  ;;  %v7346_v53 = vld [vmem:[#allocation2 + $0x96c] ss:$24 sps:$4 sm:$0xff]   ;;  %v7349_v59 = vld [vmem:[#allocation2 + $0x81c] ss:$24 sps:$4 sm:$0xff]  }
 0xf61   :  { %5032 = vmatprep.subr.bf16.mxu0 %v7271_v58  ;;  %v7344_v58 = vld [vmem:[#allocation2 + $0x968] ss:$24 sps:$4 sm:$0xff]  }
 0xf63   :  { %5062 = vmatpush2.bf16.msra.mxu1 %v7272_v39  ;;  %v7347_v39 = vld [vmem:[#allocation2 + $0x818] ss:$24 sps:$4 sm:$0xff]  }
 0xf64   :  { %5033 = vmatpush2.bf16.msra.mxu0 %v7269_v61  ;;  %5063 = vmatprep.subr.bf16.mxu1 %v7277_v62  ;;  %v7352_v61 = vld [vmem:[#allocation2 + $0x93c] ss:$24 sps:$4 sm:$0xff]   ;;  %v7350_v62 = vld [vmem:[#allocation2 + $0x938] ss:$24 sps:$4 sm:$0xff]  }
 0xf65   :  { %5084 = vmatprep.subr.bf16.mxu0 %v7280_v63  ;;  %v7355_v63 = vld [vmem:[#allocation2 + $0x7ec] ss:$24 sps:$4 sm:$0xff]  }
 0xf67   :  { %5035 = vmatmul.mubr.bf16.vlgmr.msra.gmra.mxu0 %v8678_v15  ;;  %5064 = vmatpush2.bf16.msra.mxu1 %v7275_v0  ;;  %v7358_v0 = vld [vmem:[#allocation2 + $0x90c] ss:$24 sps:$4 sm:$0xff]  }
 0xf68   :  { %5085 = vmatpush1.bf16.msra.mxu0 %v7278_v4  ;;  %5065 = vmatprep.subr.bf16.mxu1 %v7283_v5  ;;  %v7353_v4 = vld [vmem:[#allocation2 + $0x7e8] ss:$24 sps:$4 sm:$0xff]  }
 0xf69   :  { %5086 = vmatprep.subr.bf16.mxu0 %v7286_v6  ;;  %5116 = vmatprep.mubr.bf16.mxu0 %v8721_v21  ;;  %v7356_v5 = vld [vmem:[#allocation2 + $0x908] ss:$24 sps:$4 sm:$0xff]   ;;  %v7361_v6 = vld [vmem:[#allocation2 + $0x7bc] ss:$24 sps:$4 sm:$0xff]  }
 0xf6b   :  { %5066 = vmatpush2.bf16.msra.mxu1 %v7281_v7  ;;  %v7364_v7 = vld [vmem:[#allocation2 + $0xbdc] ss:$24 sps:$4 sm:$0xff]  }
 0xf6c   :  { %5087 = vmatpush1.bf16.msra.mxu0 %v7284_v9  ;;  %5067 = vmatprep.subr.bf16.mxu1 %v7289_v13  ;;  %v7359_v9 = vld [vmem:[#allocation2 + $0x7b8] ss:$24 sps:$4 sm:$0xff]  }
 0xf6d   :  { %5088 = vmatprep.subr.bf16.mxu0 %v7292_v60  ;;  %v7362_v13 = vld [vmem:[#allocation2 + $0xbd8] ss:$24 sps:$4 sm:$0xff]   ;;  %v7367_v60 = vld [vmem:[#allocation2 + $0x78c] ss:$24 sps:$4 sm:$0xff]  }
 0xf6f   :  { %5068 = vmatpush2.bf16.msra.mxu1 %v7287_v57  ;;  %v7370_v57 = vld [vmem:[#allocation2 + $0xbac] ss:$24 sps:$4 sm:$0xff]  }
 0xf70   :  { %5089 = vmatpush1.bf16.msra.mxu0 %v7290_v20  ;;  %5069 = vmatprep.subr.bf16.mxu1 %v7295_v23  ;;  %v7365_v20 = vld [vmem:[#allocation2 + $0x788] ss:$24 sps:$4 sm:$0xff]  }
 0xf71   :  { %5090 = vmatprep.subr.bf16.mxu0 %v7298_v24  ;;  %v7368_v23 = vld [vmem:[#allocation2 + $0xba8] ss:$24 sps:$4 sm:$0xff]   ;;  %v2662_v24 = vld [vmem:[#allocation15] sm:$0x3f] }
 0xf73   :  { %5070 = vmatpush2.bf16.msra.mxu1 %v7293_v26  ;;  %v7373_v26 = vld [vmem:[#allocation2 + $0xb7c] ss:$24 sps:$4 sm:$0xff]  }
 0xf74   :  { %5091 = vmatpush1.bf16.msra.mxu0 %v7296_v27  ;;  %5071 = vmatprep.subr.bf16.mxu1 %v7301_v28  ;;  %v7376_v27 = vld [vmem:[#allocation2 + $0xcfc] ss:$24 sps:$4 sm:$0xff]   ;;  %v7371_v28 = vld [vmem:[#allocation2 + $0xb78] ss:$24 sps:$4 sm:$0xff]  }
 0xf75   :  { %5092 = vmatprep.subr.bf16.mxu0 %v7304_v29  ;;  %v2667_v29 = vrot.slane %v2662_v24, %v195_v2  ;;  %v7385_v2 = vld [vmem:[#allocation2 + $0xb1c] ss:$24 sps:$4 sm:$0xff]  }
 0xf77   :  { %5072 = vmatpush2.bf16.msra.mxu1 %v7299_v30  ;;  %v7374_v30 = vld [vmem:[#allocation2 + $0xcf8] ss:$24 sps:$4 sm:$0xff]  }
 0xf78   :  { %5093 = vmatpush1.bf16.msra.mxu0 %v7302_v31  ;;  %5073 = vmatprep.subr.bf16.mxu1 %v7307_v34  ;;  %v7379_v31 = vld [vmem:[#allocation2 + $0xb4c] ss:$24 sps:$4 sm:$0xff]  }
 0xf79   :  { %5094 = vmatprep.subr.bf16.mxu0 %v7310_v32  ;;  %v7382_v34 = vld [vmem:[#allocation2 + $0xccc] ss:$24 sps:$4 sm:$0xff]   ;;  %v2671_v32 = vrot.slane %v2662_v24, %v199_v3  ;;  %v7425_v24 = vld [vmem:[#allocation2 + $0xd0] ss:$24 sps:$4 sm:$0xff]  }
 0xf7b   :  { %5074 = vmatpush2.bf16.msra.mxu1 %v7305_v25 }
 0xf7c   :  { %5095 = vmatpush1.bf16.msra.mxu0 %v7308_v10  ;;  %5125 = vmatprep.subr.bf16.mxu1 %v7316_v12  ;;  %v7377_v12 = vld [vmem:[#allocation2 + $0xb48] ss:$24 sps:$4 sm:$0xff]  }
 0xf7d   :  { %5096 = vmatprep.subr.bf16.mxu0 %v7313_v38 }
 0xf7e   :  { %5076 = vmatmul.mubr.bf16.vlgmr.msra.gmra.mxu1 %v8692_v36 }
 0xf7f   :  { %5126 = vmatpush1.bf16.msra.mxu1 %v7314_v17  ;;  %5157 = vmatprep.mubr.bf16.mxu1 %v8717_v19 }
 0xf80   :  { %5097 = vmatpush1.bf16.msra.mxu0 %v7311_v46  ;;  %5127 = vmatprep.subr.bf16.mxu1 %v7322_v18  ;;  %v7380_v46 = vld [vmem:[#allocation2 + $0xcc8] ss:$24 sps:$4 sm:$0xff]   ;;  %v7388_v18 = vld [vmem:[#allocation2 + $0xc9c] ss:$24 sps:$4 sm:$0xff]  }
 0xf81   :  { %5098 = vmatprep.subr.bf16.mxu0 %v7319_v11 }
 0xf83   :  { %5128 = vmatpush1.bf16.msra.mxu1 %v7320_v14 }
 0xf84   :  { %5099 = vmatpush1.bf16.msra.mxu0 %v7317_v54  ;;  %5129 = vmatprep.subr.bf16.mxu1 %v7328_v40 }
 0xf85   :  { %5100 = vmatprep.subr.bf16.mxu0 %v7325_v43 }
 0xf87   :  { %5130 = vmatpush1.bf16.msra.mxu1 %v7326_v35  ;;  %v7386_v35 = vld [vmem:[#allocation2 + $0xc98] ss:$24 sps:$4 sm:$0xff]  }
 0xf88   :  { %5101 = vmatpush2.bf16.msra.mxu0 %v7323_v42  ;;  %5131 = vmatprep.subr.bf16.mxu1 %v7334_v37  ;;  %v7383_v42 = vld [vmem:[#allocation2 + $0xb18] ss:$24 sps:$4 sm:$0xff]   ;;  %v7391_v37 = vld [vmem:[#allocation2 + $0xaec] ss:$24 sps:$4 sm:$0xff]  }
 0xf89   :  { %5102 = vmatprep.subr.bf16.mxu0 %v7331_v41 }
 0xf8b   :  { %5132 = vmatpush1.bf16.msra.mxu1 %v7332_v47 }
 0xf8c   :  { %5103 = vmatpush2.bf16.msra.mxu0 %v7329_v45  ;;  %5133 = vmatprep.subr.bf16.mxu1 %v7340_v49  ;;  %v7394_v45 = vld [vmem:[#allocation2 + $0xc6c] ss:$24 sps:$4 sm:$0xff]   ;;  %v7392_v49 = vld [vmem:[#allocation2 + $0xc68] ss:$24 sps:$4 sm:$0xff]  }
 0xf8d   :  { %5104 = vmatprep.subr.bf16.mxu0 %v7337_v48  ;;  %v7389_v48 = vld [vmem:[#allocation2 + $0xae8] ss:$24 sps:$4 sm:$0xff]  }
 0xf8f   :  { %5134 = vmatpush1.bf16.msra.mxu1 %v7338_v51  ;;  %v7400_v51 = vld [vmem:[#allocation2 + $0xc3c] ss:$24 sps:$4 sm:$0xff]  }
 0xf90   :  { %5105 = vmatpush2.bf16.msra.mxu0 %v7335_v50  ;;  %5135 = vmatprep.subr.bf16.mxu1 %v7346_v53  ;;  %v7397_v50 = vld [vmem:[#allocation2 + $0xabc] ss:$24 sps:$4 sm:$0xff]   ;;  %v7398_v53 = vld [vmem:[#allocation2 + $0xc38] ss:$24 sps:$4 sm:$0xff]  }
 0xf91   :  { %5106 = vmatprep.subr.bf16.mxu0 %v7343_v52  ;;  %v7395_v52 = vld [vmem:[#allocation2 + $0xab8] ss:$24 sps:$4 sm:$0xff]  }
 0xf93   :  { %5136 = vmatpush1.bf16.msra.mxu1 %v7344_v58  ;;  %v7406_v58 = vld [vmem:[#allocation2 + $0xc0c] ss:$24 sps:$4 sm:$0xff]  }
 0xf94   :  { %5107 = vmatpush2.bf16.msra.mxu0 %v7341_v55  ;;  %5137 = vmatprep.subr.bf16.mxu1 %v7352_v61  ;;  %v7403_v55 = vld [vmem:[#allocation2 + $0xa8c] ss:$24 sps:$4 sm:$0xff]   ;;  %v7404_v61 = vld [vmem:[#allocation2 + $0xc08] ss:$24 sps:$4 sm:$0xff]  }
 0xf95   :  { %5108 = vmatprep.subr.bf16.mxu0 %v7349_v59  ;;  %v7401_v59 = vld [vmem:[#allocation2 + $0xa88] ss:$24 sps:$4 sm:$0xff]  }
 0xf97   :  { %5138 = vmatpush1.bf16.msra.mxu1 %v7350_v62  ;;  %v7412_v62 = vld [vmem:[#allocation2 + $0x464] ss:$24 sps:$4 sm:$0xff]  }
 0xf98   :  { %5109 = vmatpush2.bf16.msra.mxu0 %v7347_v39  ;;  %5139 = vmatprep.subr.bf16.mxu1 %v7358_v0  ;;  %v7409_v39 = vld [vmem:[#allocation2 + $0x164] ss:$24 sps:$4 sm:$0xff]   ;;  %v7410_v0 = vld [vmem:[#allocation2 + $0x460] ss:$24 sps:$4 sm:$0xff]  }
 0xf99   :  { %5110 = vmatprep.subr.bf16.mxu0 %v7355_v63  ;;  %v7407_v63 = vld [vmem:[#allocation2 + $0x160] ss:$24 sps:$4 sm:$0xff]  }
 0xf9b   :  { %5140 = vmatpush1.bf16.msra.mxu1 %v7356_v5  ;;  %v7418_v5 = vld [vmem:[#allocation2 + $0x434] ss:$24 sps:$4 sm:$0xff]  }
 0xf9c   :  { %5111 = vmatpush2.bf16.msra.mxu0 %v7353_v4  ;;  %5141 = vmatprep.subr.bf16.mxu1 %v7364_v7  ;;  %v7415_v4 = vld [vmem:[#allocation2 + $0x134] ss:$24 sps:$4 sm:$0xff]   ;;  %v7416_v7 = vld [vmem:[#allocation2 + $0x430] ss:$24 sps:$4 sm:$0xff]  }
 0xf9d   :  { %5112 = vmatprep.subr.bf16.mxu0 %v7361_v6  ;;  %v7413_v6 = vld [vmem:[#allocation2 + $0x130] ss:$24 sps:$4 sm:$0xff]  }
 0xf9f   :  { %5142 = vmatpush2.bf16.msra.mxu1 %v7362_v13  ;;  %v7424_v13 = vld [vmem:[#allocation2 + $0x404] ss:$24 sps:$4 sm:$0xff]  }
 0xfa0   :  { %5113 = vmatpush2.bf16.msra.mxu0 %v7359_v9  ;;  %5143 = vmatprep.subr.bf16.mxu1 %v7370_v57  ;;  %v7421_v9 = vld [vmem:[#allocation2 + $0x104] ss:$24 sps:$4 sm:$0xff]   ;;  %v7422_v57 = vld [vmem:[#allocation2 + $0x400] ss:$24 sps:$4 sm:$0xff]  }
 0xfa1   :  { %5114 = vmatprep.subr.bf16.mxu0 %v7367_v60  ;;  %v7419_v60 = vld [vmem:[#allocation2 + $0x100] ss:$24 sps:$4 sm:$0xff]  }
 0xfa3   :  { %5144 = vmatpush2.bf16.msra.mxu1 %v7368_v23  ;;  %v7430_v23 = vld [vmem:[#allocation2 + $0x3d4] ss:$24 sps:$4 sm:$0xff]  }
 0xfa4   :  { %5115 = vmatpush2.bf16.msra.mxu0 %v7365_v20  ;;  %5145 = vmatprep.subr.bf16.mxu1 %v7373_v26  ;;  %v7427_v20 = vld [vmem:[#allocation2 + $0xd4] ss:$24 sps:$4 sm:$0xff]   ;;  %v7428_v26 = vld [vmem:[#allocation2 + $0x3d0] ss:$24 sps:$4 sm:$0xff]  }
 0xfa5   :  { %5170 = vmatprep.subr.bf16.mxu0 %v7376_v27  ;;  %v7433_v27 = vld [vmem:[#allocation2 + $0xa4] ss:$24 sps:$4 sm:$0xff]  }
 0xfa6   :  { %v4831_v25 = vpop.f32.mrf.mxu1 }
 0xfa7   :  { %5117 = vmatmul.mubr.bf16.vlgmr.msra.gmra.mxu0 %v8707_v56  ;;  %v4872_v10 = vpop.f32.mrf.mxu0  ;;  %v4832_v38 = vadd.f32 %v4831_v25, %v2667_v29  ;;  %5146 = vmatpush2.bf16.msra.mxu1 %v7371_v28  ;;  %v7436_v28 = vld [vmem:[#allocation2 + $0x3a4] ss:$24 sps:$4 sm:$0xff]   ;;  %v7439_v29 = vld [vmem:[#allocation2 + $0x74] ss:$24 sps:$4 sm:$0xff]  }
 0xfa8   :  { %5171 = vmatpush1.bf16.msra.mxu0 %v7374_v30  ;;  %v4833_v17 = vpop.f32.mrf.mxu1  ;;  %5147 = vmatprep.subr.bf16.mxu1 %v7379_v31  ;;  %v7442_v30 = vld [vmem:[#allocation2 + $0x374] ss:$24 sps:$4 sm:$0xff]   ;;  %v7437_v31 = vld [vmem:[#allocation2 + $0x70] ss:$24 sps:$4 sm:$0xff]   ;;  %v7448_v25 = vld [vmem:[#allocation2 + $0x344] ss:$24 sps:$4 sm:$0xff]  }
 0xfa9   :  { %v4874_v11 = vpop.f32.mrf.mxu0  ;;  %5172 = vmatprep.subr.bf16.mxu0 %v7382_v34  ;;  %v4834_v54 = vadd.f32 %v4833_v17, %v2671_v32  ;;  %v8747_v14 = vadd.f32 %v4872_v10, %v4832_v38  ;;  %5198 = vmatprep.mubr.bf16.mxu0 %v7866_v8  ;;  %v7440_v34 = vld [vmem:[#allocation2 + $0x370] ss:$24 sps:$4 sm:$0xff]   ;;  %v7445_v32 = vld [vmem:[#allocation2 + $0x44] ss:$24 sps:$4 sm:$0xff]   ;;  %v7443_v10 = vld [vmem:[#allocation2 + $0x40] ss:$24 sps:$4 sm:$0xff]  }
 0xfaa   :  { %v4835_v3 = vpop.f32.mrf.mxu1  ;;  %v7446_v38 = vld [vmem:[#allocation2 + $0x340] ss:$24 sps:$4 sm:$0xff]   ;;  %v7449_v17 = vld [vmem:[#allocation2 + $0x10] ss:$24 sps:$4 sm:$0xff]  }
 0xfab   :  { %v4876_v43 = vpop.f32.mrf.mxu0  ;;  %v8750_v40 = vadd.f32 %v4874_v11, %v4834_v54  ;;  %5148 = vmatpush2.bf16.msra.mxu1 %v7377_v12  ;;  %v7451_v12 = vld [vmem:[#allocation2 + $0x14] ss:$24 sps:$4 sm:$0xff]   ;;  %v7452_v11 = vld [vmem:[#allocation2 + $0x310] ss:$24 sps:$4 sm:$0xff]   ;;  %v7455_v54 = vld [vmem:[#allocation2 + $0x2e0] ss:$24 sps:$4 sm:$0xff]  }
 0xfac   :  { %5173 = vmatpush1.bf16.msra.mxu0 %v7380_v46  ;;  %v4836_v41 = vpop.f32.mrf.mxu1  ;;  %5149 = vmatprep.subr.bf16.mxu1 %v7385_v2  ;;  %v7454_v46 = vld [vmem:[#allocation2 + $0x314] ss:$24 sps:$4 sm:$0xff]   ;;  %v7457_v2 = vld [vmem:[#allocation2 + $0x2e4] ss:$24 sps:$4 sm:$0xff]   ;;  %v7458_v3 = vld [vmem:[#allocation2 + $0x5e0] ss:$24 sps:$4 sm:$0xff]  }
 0xfad   :  { %5174 = vmatprep.subr.bf16.mxu0 %v7388_v18  ;;  %v4877_v47 = vpop.f32.mrf.mxu0  ;;  %v7460_v18 = vld [vmem:[#allocation2 + $0x5e4] ss:$24 sps:$4 sm:$0xff]   ;;  %v7463_v43 = vld [vmem:[#allocation2 + $0x2b4] ss:$24 sps:$4 sm:$0xff]   ;;  %v7464_v41 = vld [vmem:[#allocation2 + $0x5b0] ss:$24 sps:$4 sm:$0xff]  }
 0xfae   :  { %v7467_v47 = vld [vmem:[#allocation2 + $0x280] ss:$24 sps:$4 sm:$0xff]  }
 0xfaf   :  { %5150 = vmatpush2.bf16.msra.mxu1 %v7383_v42  ;;  %v7466_v42 = vld [vmem:[#allocation2 + $0x5b4] ss:$24 sps:$4 sm:$0xff]  }
 0xfb0   :  { %5175 = vmatpush1.bf16.msra.mxu0 %v7386_v35  ;;  %5151 = vmatprep.subr.bf16.mxu1 %v7391_v37  ;;  %v7461_v35 = vld [vmem:[#allocation2 + $0x2b0] ss:$24 sps:$4 sm:$0xff]   ;;  %v7469_v37 = vld [vmem:[#allocation2 + $0x284] ss:$24 sps:$4 sm:$0xff]  }
 0xfb1   :  { %5176 = vmatprep.subr.bf16.mxu0 %v7394_v45  ;;  %v7472_v45 = vld [vmem:[#allocation2 + $0x584] ss:$24 sps:$4 sm:$0xff]  }
 0xfb3   :  { %5152 = vmatpush2.bf16.msra.mxu1 %v7389_v48  ;;  %v7470_v48 = vld [vmem:[#allocation2 + $0x580] ss:$24 sps:$4 sm:$0xff]  }
 0xfb4   :  { %5177 = vmatpush1.bf16.msra.mxu0 %v7392_v49  ;;  %5153 = vmatprep.subr.bf16.mxu1 %v7397_v50  ;;  %v7475_v49 = vld [vmem:[#allocation2 + $0x254] ss:$24 sps:$4 sm:$0xff]  }
 0xfb5   :  { %5178 = vmatprep.subr.bf16.mxu0 %v7400_v51  ;;  %v7478_v50 = vld [vmem:[#allocation2 + $0x554] ss:$24 sps:$4 sm:$0xff]  }
 0xfb7   :  { %5154 = vmatpush2.bf16.msra.mxu1 %v7395_v52 }
 0xfb8   :  { %5179 = vmatpush1.bf16.msra.mxu0 %v7398_v53  ;;  %5155 = vmatprep.subr.bf16.mxu1 %v7403_v55  ;;  %v7473_v55 = vld [vmem:[#allocation2 + $0x250] ss:$24 sps:$4 sm:$0xff]  }
 0xfb9   :  { %5180 = vmatprep.subr.bf16.mxu0 %v7406_v58  ;;  %v7476_v58 = vld [vmem:[#allocation2 + $0x550] ss:$24 sps:$4 sm:$0xff]  }
 0xfbb   :  { %5156 = vmatpush2.bf16.msra.mxu1 %v7401_v59 }
 0xfbc   :  { %5181 = vmatpush1.bf16.msra.mxu0 %v7404_v61  ;;  %5207 = vmatprep.subr.bf16.mxu1 %v7409_v39  ;;  %v7481_v39 = vld [vmem:[#allocation2 + $0x224] ss:$24 sps:$4 sm:$0xff]  }
 0xfbd   :  { %5248 = vmatprep.subr.bf16.mxu0 %v7412_v62  ;;  %v7484_v62 = vld [vmem:[#allocation2 + $0x524] ss:$24 sps:$4 sm:$0xff]  }
 0xfbe   :  { %5158 = vmatmul.mubr.bf16.vlgmr.msra.gmra.mxu1 %v8723_v22 }
 0xfbf   :  { %6260 = vmatmul.mubr.msk.bf16.vlgmr.msra.gmra.mxu0 %vm9157_vm9, %v8715_v44  ;;  %5208 = vmatpush1.bf16.msra.mxu1 %v7407_v63 }
 0xfc0   :  { %5249 = vmatpush1.bf16.msra.mxu0 %v7410_v0  ;;  %5209 = vmatprep.subr.bf16.mxu1 %v7415_v4 }
 0xfc1   :  { %5250 = vmatprep.subr.bf16.mxu0 %v7418_v5  ;;  %5239 = vmatprep.mubr.bf16.mxu1 %v8680_v16  ;;  %v7431_v16 = vld [vmem:[#allocation2 + $0xa0] ss:$24 sps:$4 sm:$0xff]  }
 0xfc2   :  { %5280 = vmatprep.mubr.bf16.mxu0 %v8696_v33  ;;  %v7434_v33 = vld [vmem:[#allocation2 + $0x3a0] ss:$24 sps:$4 sm:$0xff]  }
 0xfc3   :  { %5210 = vmatpush1.bf16.msra.mxu1 %v7413_v6  ;;  %v7479_v5 = vld [vmem:[#allocation2 + $0x220] ss:$24 sps:$4 sm:$0xff]  }
 0xfc4   :  { %5251 = vmatpush1.bf16.msra.mxu0 %v7416_v7  ;;  %5211 = vmatprep.subr.bf16.mxu1 %v7421_v9  ;;  %v7482_v6 = vld [vmem:[#allocation2 + $0x520] ss:$24 sps:$4 sm:$0xff]   ;;  %v7487_v7 = vld [vmem:[#allocation2 + $0x1f4] ss:$24 sps:$4 sm:$0xff]  }
 0xfc5   :  { %5252 = vmatprep.subr.bf16.mxu0 %v7424_v13  ;;  %v7490_v9 = vld [vmem:[#allocation2 + $0x4f4] ss:$24 sps:$4 sm:$0xff]  }
 0xfc7   :  { %5212 = vmatpush1.bf16.msra.mxu1 %v7419_v60  ;;  %v7485_v60 = vld [vmem:[#allocation2 + $0x1f0] ss:$24 sps:$4 sm:$0xff]  }
 0xfc8   :  { %5253 = vmatpush1.bf16.msra.mxu0 %v7422_v57  ;;  %5213 = vmatprep.subr.bf16.mxu1 %v7427_v20  ;;  %v7488_v57 = vld [vmem:[#allocation2 + $0x4f0] ss:$24 sps:$4 sm:$0xff]   ;;  %v7493_v20 = vld [vmem:[#allocation2 + $0x1c4] ss:$24 sps:$4 sm:$0xff]  }
 0xfc9   :  { %5254 = vmatprep.subr.bf16.mxu0 %v7430_v23  ;;  %v7496_v23 = vld [vmem:[#allocation2 + $0x4c4] ss:$24 sps:$4 sm:$0xff]  }
 0xfcb   :  { %5214 = vmatpush1.bf16.msra.mxu1 %v7425_v24  ;;  %v7491_v24 = vld [vmem:[#allocation2 + $0x1c0] ss:$24 sps:$4 sm:$0xff]  }
 0xfcc   :  { %5255 = vmatpush1.bf16.msra.mxu0 %v7428_v26  ;;  %5215 = vmatprep.subr.bf16.mxu1 %v7433_v27  ;;  %v7494_v26 = vld [vmem:[#allocation2 + $0x4c0] ss:$24 sps:$4 sm:$0xff]   ;;  %v7499_v27 = vld [vmem:[#allocation2 + $0x194] ss:$24 sps:$4 sm:$0xff]  }
 0xfcd   :  { %5256 = vmatprep.subr.bf16.mxu0 %v7436_v28  ;;  %v7502_v28 = vld [vmem:[#allocation2 + $0x494] ss:$24 sps:$4 sm:$0xff]  }
 0xfcf   :  { %5216 = vmatpush1.bf16.msra.mxu1 %v7431_v16  ;;  %v7497_v16 = vld [vmem:[#allocation2 + $0x190] ss:$24 sps:$4 sm:$0xff]  }
 0xfd0   :  { %5257 = vmatpush1.bf16.msra.mxu0 %v7434_v33  ;;  %5217 = vmatprep.subr.bf16.mxu1 %v7439_v29  ;;  %v7500_v33 = vld [vmem:[#allocation2 + $0x490] ss:$24 sps:$4 sm:$0xff]   ;;  %v7505_v29 = vld [vmem:[#allocation2 + $0x764] ss:$24 sps:$4 sm:$0xff]  }
 0xfd1   :  { %5258 = vmatprep.subr.bf16.mxu0 %v7442_v30  ;;  %v7508_v30 = vld [vmem:[#allocation2 + $0xa64] ss:$24 sps:$4 sm:$0xff]  }
 0xfd3   :  { %5218 = vmatpush1.bf16.msra.mxu1 %v7437_v31  ;;  %v7503_v31 = vld [vmem:[#allocation2 + $0x760] ss:$24 sps:$4 sm:$0xff]  }
 0xfd4   :  { %5259 = vmatpush1.bf16.msra.mxu0 %v7440_v34  ;;  %5219 = vmatprep.subr.bf16.mxu1 %v7445_v32  ;;  %v7506_v34 = vld [vmem:[#allocation2 + $0xa60] ss:$24 sps:$4 sm:$0xff]   ;;  %v7511_v32 = vld [vmem:[#allocation2 + $0x734] ss:$24 sps:$4 sm:$0xff]  }
 0xfd5   :  { %5260 = vmatprep.subr.bf16.mxu0 %v7448_v25  ;;  %v7514_v25 = vld [vmem:[#allocation2 + $0xa34] ss:$24 sps:$4 sm:$0xff]  }
 0xfd7   :  { %5220 = vmatpush1.bf16.msra.mxu1 %v7443_v10 }
 0xfd8   :  { %5261 = vmatpush1.bf16.msra.mxu0 %v7446_v38  ;;  %5221 = vmatprep.subr.bf16.mxu1 %v7451_v12  ;;  %v7509_v12 = vld [vmem:[#allocation2 + $0x730] ss:$24 sps:$4 sm:$0xff]  }
 0xfd9   :  { %5262 = vmatprep.subr.bf16.mxu0 %v7454_v46  ;;  %v7512_v46 = vld [vmem:[#allocation2 + $0xa30] ss:$24 sps:$4 sm:$0xff]  }
 0xfdb   :  { %5222 = vmatpush1.bf16.msra.mxu1 %v7449_v17 }
 0xfdc   :  { %5263 = vmatpush1.bf16.msra.mxu0 %v7452_v11  ;;  %5223 = vmatprep.subr.bf16.mxu1 %v7457_v2  ;;  %v7517_v11 = vld [vmem:[#allocation2 + $0x704] ss:$24 sps:$4 sm:$0xff]  }
 0xfdd   :  { %5264 = vmatprep.subr.bf16.mxu0 %v7460_v18  ;;  %v7520_v2 = vld [vmem:[#allocation2 + $0xa04] ss:$24 sps:$4 sm:$0xff]  }
 0xfdf   :  { %5224 = vmatpush2.bf16.msra.mxu1 %v7455_v54 }
 0xfe0   :  { %5265 = vmatpush2.bf16.msra.mxu0 %v7458_v3  ;;  %5225 = vmatprep.subr.bf16.mxu1 %v7463_v43  ;;  %v7523_v3 = vld [vmem:[#allocation2 + $0x6d4] ss:$24 sps:$4 sm:$0xff]  }
 0xfe1   :  { %5266 = vmatprep.subr.bf16.mxu0 %v7466_v42  ;;  %v7526_v43 = vld [vmem:[#allocation2 + $0x9d4] ss:$24 sps:$4 sm:$0xff]   ;;  %v7521_v42 = vld [vmem:[#allocation2 + $0x6d0] ss:$24 sps:$4 sm:$0xff]  }
 0xfe3   :  { %5226 = vmatpush2.bf16.msra.mxu1 %v7461_v35  ;;  %v7524_v35 = vld [vmem:[#allocation2 + $0x9d0] ss:$24 sps:$4 sm:$0xff]  }
 0xfe4   :  { %5267 = vmatpush2.bf16.msra.mxu0 %v7464_v41  ;;  %5227 = vmatprep.subr.bf16.mxu1 %v7469_v37  ;;  %v7529_v41 = vld [vmem:[#allocation2 + $0x6a4] ss:$24 sps:$4 sm:$0xff]   ;;  %v7530_v37 = vld [vmem:[#allocation2 + $0x9a0] ss:$24 sps:$4 sm:$0xff]  }
 0xfe5   :  { %5268 = vmatprep.subr.bf16.mxu0 %v7472_v45  ;;  %v7535_v45 = vld [vmem:[#allocation2 + $0x674] ss:$24 sps:$4 sm:$0xff]  }
 0xfe6   :  { %v4913_v51 = vpop.f32.mrf.mxu1 }
 0xfe7   :  { %v4954_v52 = vpop.f32.mrf.mxu0  ;;  %v4914_v53 = vadd.f32 %v4913_v51, %v8747_v14  ;;  %5228 = vmatpush2.bf16.msra.mxu1 %v7467_v47  ;;  %v7538_v47 = vld [vmem:[#allocation2 + $0x974] ss:$24 sps:$4 sm:$0xff]   ;;  %v7544_v51 = vld [vmem:[#allocation2 + $0x944] ss:$24 sps:$4 sm:$0xff]  }
 0xfe8   :  { %5269 = vmatpush2.bf16.msra.mxu0 %v7470_v48  ;;  %v8758_v59 = vpop.f32.mrf.mxu1  ;;  %5229 = vmatprep.subr.bf16.mxu1 %v7475_v49  ;;  %v7533_v48 = vld [vmem:[#allocation2 + $0x670] ss:$24 sps:$4 sm:$0xff]  }
 0xfe9   :  { %v8760_v61 = vpop.f32.mrf.mxu0  ;;  %5270 = vmatprep.subr.bf16.mxu0 %v7478_v50  ;;  %v4955_v63 = vadd.f32 %v4954_v52, %v4914_v53  ;;  %v7536_v49 = vld [vmem:[#allocation2 + $0x970] ss:$24 sps:$4 sm:$0xff]   ;;  %v7541_v50 = vld [vmem:[#allocation2 + $0x644] ss:$24 sps:$4 sm:$0xff]   ;;  %v4916_v52 = vadd.f32 %v8758_v59, %v8750_v40  ;;  %v7539_v53 = vld [vmem:[#allocation2 + $0x640] ss:$24 sps:$4 sm:$0xff]  }
 0xfea   :  { %v4917_v0 = vpop.f32.mrf.mxu1  ;;  %v7556_v40 = vld [vmem:[#allocation2 + $0xbe4] ss:$24 sps:$4 sm:$0xff]  }
 0xfeb   :  { %v4958_v4 = vpop.f32.mrf.mxu0  ;;  %5230 = vmatpush2.bf16.msra.mxu1 %v7473_v55  ;;  %v7542_v55 = vld [vmem:[#allocation2 + $0x940] ss:$24 sps:$4 sm:$0xff]   ;;  %v7545_v0 = vld [vmem:[#allocation2 + $0x610] ss:$24 sps:$4 sm:$0xff]  }
 0xfec   :  { %5271 = vmatpush2.bf16.msra.mxu0 %v7476_v58  ;;  %v4918_v14 = vpop.f32.mrf.mxu1  ;;  %5231 = vmatprep.subr.bf16.mxu1 %v7481_v39  ;;  %v7547_v58 = vld [vmem:[#allocation2 + $0x614] ss:$24 sps:$4 sm:$0xff]   ;;  %v7548_v4 = vld [vmem:[#allocation2 + $0x910] ss:$24 sps:$4 sm:$0xff]  }
 0xfed   :  { %5272 = vmatprep.subr.bf16.mxu0 %v7484_v62  ;;  %v4959_v13 = vpop.f32.mrf.mxu0  ;;  %v7550_v39 = vld [vmem:[#allocation2 + $0x914] ss:$24 sps:$4 sm:$0xff]   ;;  %v4957_v62 = vadd.f32 %v8760_v61, %v4916_v52  ;;  %v7554_v14 = vld [vmem:[#allocation2 + $0xbe0] ss:$24 sps:$4 sm:$0xff]  }
 0xfee   :  { %v7562_v61 = vld [vmem:[#allocation2 + $0xbb4] ss:$24 sps:$4 sm:$0xff]   ;;  %v7557_v13 = vld [vmem:[#allocation2 + $0x8b0] ss:$24 sps:$4 sm:$0xff]  }
 0xfef   :  { %5232 = vmatpush2.bf16.msra.mxu1 %v7479_v5  ;;  %v7553_v5 = vld [vmem:[#allocation2 + $0x8e4] ss:$24 sps:$4 sm:$0xff]   ;;  %v7604_v52 = vld [vmem:[#allocation2 + $0xcd4] ss:$24 sps:$4 sm:$0xff]  }
 0xff0   :  { %5273 = vmatpush2.bf16.msra.mxu0 %v7482_v6  ;;  %5233 = vmatprep.subr.bf16.mxu1 %v7487_v7  ;;  %v7551_v6 = vld [vmem:[#allocation2 + $0x8e0] ss:$24 sps:$4 sm:$0xff]   ;;  %v7559_v7 = vld [vmem:[#allocation2 + $0x8b4] ss:$24 sps:$4 sm:$0xff]  }
 0xff1   :  { %5274 = vmatprep.subr.bf16.mxu0 %v7490_v9 }
 0xff3   :  { %5234 = vmatpush2.bf16.msra.mxu1 %v7485_v60  ;;  %v7560_v60 = vld [vmem:[#allocation2 + $0xbb0] ss:$24 sps:$4 sm:$0xff]  }
 0xff4   :  { %5275 = vmatpush2.bf16.msra.mxu0 %v7488_v57  ;;  %5235 = vmatprep.subr.bf16.mxu1 %v7493_v20  ;;  %v7565_v57 = vld [vmem:[#allocation2 + $0x884] ss:$24 sps:$4 sm:$0xff]  }
 0xff5   :  { %5276 = vmatprep.subr.bf16.mxu0 %v7496_v23  ;;  %v7568_v20 = vld [vmem:[#allocation2 + $0xb84] ss:$24 sps:$4 sm:$0xff]   ;;  %v7563_v23 = vld [vmem:[#allocation2 + $0x880] ss:$24 sps:$4 sm:$0xff]  }
 0xff7   :  { %5236 = vmatpush2.bf16.msra.mxu1 %v7491_v24  ;;  %v7566_v24 = vld [vmem:[#allocation2 + $0xb80] ss:$24 sps:$4 sm:$0xff]  }
 0xff8   :  { %5277 = vmatpush2.bf16.msra.mxu0 %v7494_v26  ;;  %5237 = vmatprep.subr.bf16.mxu1 %v7499_v27  ;;  %v7571_v26 = vld [vmem:[#allocation2 + $0x854] ss:$24 sps:$4 sm:$0xff]  }
 0xff9   :  { %5278 = vmatprep.subr.bf16.mxu0 %v7502_v28  ;;  %v7574_v27 = vld [vmem:[#allocation2 + $0xb54] ss:$24 sps:$4 sm:$0xff]  }
 0xffb   :  { %5238 = vmatpush2.bf16.msra.mxu1 %v7497_v16  ;;  %v7569_v16 = vld [vmem:[#allocation2 + $0x850] ss:$24 sps:$4 sm:$0xff]  }
 0xffc   :  { %5279 = vmatpush2.bf16.msra.mxu0 %v7500_v33  ;;  %5289 = vmatprep.subr.bf16.mxu1 %v7505_v29  ;;  %v7572_v33 = vld [vmem:[#allocation2 + $0xb50] ss:$24 sps:$4 sm:$0xff]   ;;  %v7577_v29 = vld [vmem:[#allocation2 + $0x824] ss:$24 sps:$4 sm:$0xff]  }
 0xffd   :  { %5330 = vmatprep.subr.bf16.mxu0 %v7508_v30  ;;  %v7580_v30 = vld [vmem:[#allocation2 + $0xb24] ss:$24 sps:$4 sm:$0xff]  }
 0xffe   :  { %v4995_v10 = vpop.f32.mrf.mxu1  ;;  %5240 = vmatmul.mubr.bf16.vlgmr.msra.gmra.mxu1 %v8678_v15  ;;  %v7515_v15 = vld [vmem:[#allocation2 + $0x700] ss:$24 sps:$4 sm:$0xff]  }
 0xfff   :  { %5281 = vmatmul.mubr.bf16.vlgmr.msra.gmra.mxu0 %v8692_v36  ;;  %v8764_v38 = vadd.f32 %v4995_v10, %v4955_v63  ;;  %5290 = vmatpush1.bf16.msra.mxu1 %v7503_v31  ;;  %v7518_v36 = vld [vmem:[#allocation2 + $0xa00] ss:$24 sps:$4 sm:$0xff]   ;;  %v7583_v10 = vld [vmem:[#allocation2 + $0x7f4] ss:$24 sps:$4 sm:$0xff]  }
0x1000   :  { %5331 = vmatpush1.bf16.msra.mxu0 %v7506_v34  ;;  %v4997_v17 = vpop.f32.mrf.mxu1  ;;  %5291 = vmatprep.subr.bf16.mxu1 %v7511_v32  ;;  %v7575_v32 = vld [vmem:[#allocation2 + $0x820] ss:$24 sps:$4 sm:$0xff]  }
0x1001   :  { %5332 = vmatprep.subr.bf16.mxu0 %v7514_v25  ;;  %5321 = vmatprep.mubr.bf16.mxu1 %v8721_v21  ;;  %v7532_v21 = vld [vmem:[#allocation2 + $0x9a4] ss:$24 sps:$4 sm:$0xff]   ;;  %v8771_v63 = vadd.f32 %v4997_v17, %v4957_v62  ;;  %v7578_v25 = vld [vmem:[#allocation2 + $0xb20] ss:$24 sps:$4 sm:$0xff]   ;;  %v7581_v17 = vld [vmem:[#allocation2 + $0x7f0] ss:$24 sps:$4 sm:$0xff]  }
0x1002   :  { %5362 = vmatprep.mubr.bf16.mxu0 %v8717_v19  ;;  %v4999_v18 = vpop.f32.mrf.mxu1  ;;  %v7527_v19 = vld [vmem:[#allocation2 + $0x6a0] ss:$24 sps:$4 sm:$0xff]   ;;  %v5489_v62 = vld [vmem:[%s9121_s21 + $0xe8] sm:$0xff]  ;;  %vm5412_vm12 = vcmp.gt.f32.partialorder %v8764_v38, 0.0 }
0x1003   :  { %5292 = vmatpush1.bf16.msra.mxu1 %v7509_v12  ;;  %v5419_v59 = vmin.f32 %v8771_v63, 0.0  ;;  %v7586_v12 = vld [vmem:[#allocation2 + $0xaf4] ss:$24 sps:$4 sm:$0xff]   ;;  %v7589_v18 = vld [vmem:[#allocation2 + $0x7c4] ss:$24 sps:$4 sm:$0xff]   ;;  %vm5413_vm10 = vcmp.gt.f32.partialorder %v8771_v63, 0.0 }
0x1004   :  { %5333 = vmatpush1.bf16.msra.mxu0 %v7512_v46  ;;  %v5000_v54 = vpop.f32.mrf.mxu1  ;;  %5293 = vmatprep.subr.bf16.mxu1 %v7517_v11  ;;  %v7584_v11 = vld [vmem:[#allocation2 + $0xaf0] ss:$24 sps:$4 sm:$0xff]  }
0x1005   :  { %5334 = vmatprep.subr.bf16.mxu0 %v7520_v2  ;;  %v5426_v9 = vmul.f32 1.442695, %v5419_v59  ;;  %v7590_v54 = vld [vmem:[#allocation2 + $0xac0] ss:$24 sps:$4 sm:$0xff]  }
0x1006   :  { %v5487_v59 = vld [vmem:[%s9121_s21 + $0xd8] sm:$0xff] }
0x1007   :  { %5294 = vmatpush1.bf16.msra.mxu1 %v7515_v15  ;;  %7617 = vpow2.f32 %v5426_v9  ;;  %v7592_v15 = vld [vmem:[#allocation2 + $0xac4] ss:$24 sps:$4 sm:$0xff]   ;;  %v7608_v9 = vld [vmem:[#allocation2 + $0xc70] ss:$24 sps:$4 sm:$0xff]  }
0x1008   :  { %5335 = vmatpush1.bf16.msra.mxu0 %v7518_v36  ;;  %5295 = vmatprep.subr.bf16.mxu1 %v7523_v3  ;;  %v7587_v36 = vld [vmem:[#allocation2 + $0x7c0] ss:$24 sps:$4 sm:$0xff]  }
0x1009   :  { %5336 = vmatprep.subr.bf16.mxu0 %v7526_v43  ;;  %v7595_v43 = vld [vmem:[#allocation2 + $0x794] ss:$24 sps:$4 sm:$0xff]  }
0x100b   :  { %5296 = vmatpush1.bf16.msra.mxu1 %v7521_v42  ;;  %v7598_v42 = vld [vmem:[#allocation2 + $0xa94] ss:$24 sps:$4 sm:$0xff]  }
0x100c   :  { %5337 = vmatpush1.bf16.msra.mxu0 %v7524_v35  ;;  %5297 = vmatprep.subr.bf16.mxu1 %v7529_v41  ;;  %v7593_v35 = vld [vmem:[#allocation2 + $0x790] ss:$24 sps:$4 sm:$0xff]  }
0x100d   :  { %5338 = vmatprep.subr.bf16.mxu0 %v7532_v21  ;;  %v7596_v41 = vld [vmem:[#allocation2 + $0xa90] ss:$24 sps:$4 sm:$0xff]  }
0x100f   :  { %5298 = vmatpush1.bf16.msra.mxu1 %v7527_v19  ;;  %v7601_v19 = vld [vmem:[#allocation2 + $0xd04] ss:$24 sps:$4 sm:$0xff]  }
0x1010   :  { %5339 = vmatpush1.bf16.msra.mxu0 %v7530_v37  ;;  %5299 = vmatprep.subr.bf16.mxu1 %v7535_v45  ;;  %v5418_v37 = vmin.f32 %v8764_v38, 0.0  ;;  %v5491_v45 = vld [vmem:[%s9121_s21 + $0xf8] sm:$0xff] }
0x1011   :  { %5340 = vmatprep.subr.bf16.mxu0 %v7538_v47  ;;  %v7599_v47 = vld [vmem:[#allocation2 + $0xd00] ss:$24 sps:$4 sm:$0xff]  }
0x1013   :  { %5300 = vmatpush1.bf16.msra.mxu1 %v7533_v48 }
0x1014   :  { %5341 = vmatpush1.bf16.msra.mxu0 %v7536_v49  ;;  %5301 = vmatprep.subr.bf16.mxu1 %v7541_v50  ;;  %v7618_v2 = vpop.eup %7617  ;;  %v5475_v49 = vld [vmem:[%s9121_s21 + $0x78] sm:$0xff]  ;;  %v5424_v50 = vmul.f32 1.442695, %v5418_v37  ;;  %v5520_v37 = vld [vmem:[%s9121_s21 + $0x1e0] sm:$0xff] }
0x1015   :  { %5342 = vmatprep.subr.bf16.mxu0 %v7544_v51  ;;  %v6263_v3 = vadd.f32 -1.0, %v7618_v2  ;;  %v5490_v51 = vld [vmem:[%s9121_s21 + $0xf0] sm:$0xff]  ;;  %v5463_v2 = vld [vmem:[%s9121_s21 + $0x18] sm:$0xff] }
0x1016   :  { %7619 = vpow2.f32 %v5424_v50  ;;  %v5518_v50 = vld [vmem:[%s9121_s21 + $0x1d0] sm:$0xff] }
0x1017   :  { %5302 = vmatpush1.bf16.msra.mxu1 %v7539_v53  ;;  %v5443_v21 = vmul.f32 1.6732632, %v6263_v3  ;;  %v5462_v3 = vld [vmem:[%s9121_s21 + $0x10] sm:$0xff] }
0x1018   :  { %5343 = vmatpush1.bf16.msra.mxu0 %v7542_v55  ;;  %5303 = vmatprep.subr.bf16.mxu1 %v7547_v58  ;;  %v5474_v58 = vld [vmem:[%s9121_s21 + $0x70] sm:$0xff] }
0x1019   :  { %5344 = vmatprep.subr.bf16.mxu0 %v7550_v39  ;;  %v5449_v48 = vsel %vm5413_vm10, %v8771_v63, %v5443_v21  ;;  %v7602_v39 = vld [vmem:[#allocation2 + $0xcd0] ss:$24 sps:$4 sm:$0xff]  }
0x101a   :  { %v5455_v55 = vmul.f32 1.050701, %v5449_v48 }
0x101b   :  { %5304 = vmatpush1.bf16.msra.mxu1 %v7545_v0  ;;  %v5488_v0 = vld [vmem:[%s9121_s21 + $0xe0] sm:$0xff] }
0x101c   :  { %5345 = vmatpush1.bf16.msra.mxu0 %v7548_v4  ;;  %5305 = vmatprep.subr.bf16.mxu1 %v7553_v5  ;;  %v5472_v5 = vld [vmem:[%s9121_s21 + $0x60] sm:$0xff] }
0x101d   :  { %5346 = vmatprep.subr.bf16.mxu0 %v7556_v40  ;;  %v7605_v40 = vld [vmem:[#allocation2 + $0xca0] ss:$24 sps:$4 sm:$0xff]  }
0x101f   :  { %5306 = vmatpush2.bf16.msra.mxu1 %v7551_v6 }
0x1020   :  { %5347 = vmatpush2.bf16.msra.mxu0 %v7554_v14  ;;  %5307 = vmatprep.subr.bf16.mxu1 %v7559_v7  ;;  %v5471_v14 = vld [vmem:[%s9121_s21 + $0x58] sm:$0xff]  ;;  %v7610_v7 = vld [vmem:[#allocation2 + $0xc74] ss:$24 sps:$4 sm:$0xff]  }
0x1021   :  { %5348 = vmatprep.subr.bf16.mxu0 %v7562_v61  ;;  %v5470_v61 = vld [vmem:[%s9121_s21 + $0x50] sm:$0xff] }
0x1023   :  { %5308 = vmatpush2.bf16.msra.mxu1 %v7557_v13  ;;  %v5485_v13 = vld [vmem:[%s9121_s21 + $0xc8] sm:$0xff] }
0x1024   :  { %5349 = vmatpush2.bf16.msra.mxu0 %v7560_v60  ;;  %5309 = vmatprep.subr.bf16.mxu1 %v7565_v57  ;;  %v5469_v60 = vld [vmem:[%s9121_s21 + $0x48] sm:$0xff]  ;;  %v7613_v57 = vld [vmem:[#allocation2 + $0xc44] ss:$24 sps:$4 sm:$0xff]  }
0x1025   :  { %5350 = vmatprep.subr.bf16.mxu0 %v7568_v20  ;;  %v5484_v20 = vld [vmem:[%s9121_s21 + $0xc0] sm:$0xff] }
0x1027   :  { %v8774_v28 = vpop.f32.mrf.mxu0  ;;  %5310 = vmatpush2.bf16.msra.mxu1 %v7563_v23  ;;  %v5468_v23 = vld [vmem:[%s9121_s21 + $0x40] sm:$0xff] }
0x1028   :  { %5351 = vmatpush2.bf16.msra.mxu0 %v7566_v24  ;;  %5311 = vmatprep.subr.bf16.mxu1 %v7571_v26  ;;  %v7611_v24 = vld [vmem:[#allocation2 + $0xc40] ss:$24 sps:$4 sm:$0xff]  }
0x1029   :  { %5352 = vmatprep.subr.bf16.mxu0 %v7574_v27  ;;  %v8776_v31 = vpop.f32.mrf.mxu0  ;;  %v5483_v26 = vld [vmem:[%s9121_s21 + $0xb8] sm:$0xff] }
0x102a   :  { %v5467_v27 = vld [vmem:[%s9121_s21 + $0x38] sm:$0xff] }
0x102b   :  { %v5040_v34 = vpop.f32.mrf.mxu0  ;;  %5312 = vmatpush2.bf16.msra.mxu1 %v7569_v16  ;;  %v7616_v16 = vld [vmem:[#allocation2 + $0xc14] ss:$24 sps:$4 sm:$0xff]  }
0x102c   :  { %5353 = vmatpush2.bf16.msra.mxu0 %v7572_v33  ;;  %5313 = vmatprep.subr.bf16.mxu1 %v7577_v29  ;;  %v5482_v33 = vld [vmem:[%s9121_s21 + $0xb0] sm:$0xff]  ;;  %v7620_v29 = vpop.eup %7619 }
0x102d   :  { %5354 = vmatprep.subr.bf16.mxu0 %v7580_v30  ;;  %v5041_v46 = vpop.f32.mrf.mxu0  ;;  %v5466_v30 = vld [vmem:[%s9121_s21 + $0x30] sm:$0xff] }
0x102e   :  { %v7614_v34 = vld [vmem:[#allocation2 + $0xc10] ss:$24 sps:$4 sm:$0xff]   ;;  %v5523_v46 = vld [vmem:[%s9121_s21 + $0x1f8] sm:$0xff] }
0x102f   :  { %5314 = vmatpush2.bf16.msra.mxu1 %v7575_v32  ;;  %v5481_v32 = vld [vmem:[%s9121_s21 + $0xa8] sm:$0xff] }
0x1030   :  { %5355 = vmatpush2.bf16.msra.mxu0 %v7578_v25  ;;  %5315 = vmatprep.subr.bf16.mxu1 %v7583_v10  ;;  %v5465_v25 = vld [vmem:[%s9121_s21 + $0x28] sm:$0xff]  ;;  %v6262_v10 = vadd.f32 -1.0, %v7620_v29 }
0x1031   :  { %5356 = vmatprep.subr.bf16.mxu0 %v7586_v12  ;;  %v5480_v12 = vld [vmem:[%s9121_s21 + $0xa0] sm:$0xff] }
0x1033   :  { %5316 = vmatpush2.bf16.msra.mxu1 %v7581_v17  ;;  %v5464_v17 = vld [vmem:[%s9121_s21 + $0x20] sm:$0xff] }
0x1034   :  { %5357 = vmatpush2.bf16.msra.mxu0 %v7584_v11  ;;  %5317 = vmatprep.subr.bf16.mxu1 %v7589_v18  ;;  %v5479_v11 = vld [vmem:[%s9121_s21 + $0x98] sm:$0xff] }
0x1035   :  { %5358 = vmatprep.subr.bf16.mxu0 %v7592_v15  ;;  %v5507_v18 = vld [vmem:[%s9121_s21 + $0x178] sm:$0xff]  ;;  %v5442_v15 = vmul.f32 1.6732632, %v6262_v10 }
0x1037   :  { %5318 = vmatpush2.bf16.msra.mxu1 %v7587_v36  ;;  %v5478_v36 = vld [vmem:[%s9121_s21 + $0x90] sm:$0xff]  ;;  %v5448_v21 = vsel %vm5412_vm12, %v8764_v38, %v5442_v15  ;;  %v5504_v38 = vld [vmem:[%s9121_s21 + $0x160] sm:$0xff] }
0x1038   :  { %5359 = vmatpush2.bf16.msra.mxu0 %v7590_v54  ;;  %5319 = vmatprep.subr.bf16.mxu1 %v7595_v43  ;;  %v5522_v54 = vld [vmem:[%s9121_s21 + $0x1f0] sm:$0xff]  ;;  %v5454_v48 = vmul.f32 1.050701, %v5448_v21 }
0x1039   :  { %5360 = vmatprep.subr.bf16.mxu0 %v7598_v42  ;;  %v5506_v43 = vld [vmem:[%s9121_s21 + $0x170] sm:$0xff]  ;;  %v5477_v42 = vld [vmem:[%s9121_s21 + $0x88] sm:$0xff] }
0x103b   :  { %5320 = vmatpush2.bf16.msra.mxu1 %v7593_v35  ;;  %v5521_v35 = vld [vmem:[%s9121_s21 + $0x1e8] sm:$0xff] }
0x103c   :  { %5361 = vmatpush2.bf16.msra.mxu0 %v7596_v41  ;;  %5375 = vmatprep.subr.bf16.mxu1 %v7601_v19  ;;  %v5505_v41 = vld [vmem:[%s9121_s21 + $0x168] sm:$0xff]  ;;  %v5476_v19 = vld [vmem:[%s9121_s21 + $0x80] sm:$0xff] }
0x103d   :  { %6280 = vmatprep.subr.mxu0 %v5491_v45  ;;  %v5460_v45 = vld [vmem:[%s9121_s21] sm:$0xff] }
0x103e   :  { %v8790_v53 = vpop.f32.mrf.mxu1  ;;  %5322 = vmatmul.mubr.bf16.vlgmr.msra.gmra.mxu1 %v8707_v56  ;;  %v5473_v56 = vld [vmem:[%s9121_s21 + $0x68] sm:$0xff] }
0x103f   :  { %5363 = vmatmul.mubr.bf16.vlgmr.msra.gmra.mxu0 %v8723_v22  ;;  %5376 = vmatpush1.bf16.msra.mxu1 %v7599_v47  ;;  %v7607_v22 = vld [vmem:[#allocation2 + $0xca4] ss:$24 sps:$4 sm:$0xff]  }
0x1040   :  { %6281 = vmatpush3.msra.mxu0 %v5475_v49  ;;  %5627 = vmatprep.mubr.f32.mxu0 %v5455_v55  ;;  %v8800_v63 = vpop.f32.mrf.mxu1  ;;  %v5519_v47 = vld [vmem:[%s9121_s21 + $0x1d8] sm:$0xff]  ;;  %v5501_v55 = vld [vmem:[%s9121_s21 + $0x148] sm:$0xff] }
0x1041   :  { %6282 = vmatprep.subr.mxu0 %v5490_v51  ;;  %5377 = vmatprep.subr.bf16.mxu1 %v7604_v52  ;;  %v5503_v49 = vld [vmem:[%s9121_s21 + $0x158] sm:$0xff]  ;;  %v5502_v51 = vld [vmem:[%s9121_s21 + $0x150] sm:$0xff]  ;;  %v5517_v52 = vld [vmem:[%s9121_s21 + $0x1c8] sm:$0xff] }
0x1042   :  { %6283 = vmatpush3.msra.mxu0 %v5474_v58  ;;  %v5081_v4 = vpop.f32.mrf.mxu1  ;;  %5403 = vmatprep.mubr.bf16.mxu1 %v7866_v8  ;;  %v5486_v8 = vld [vmem:[%s9121_s21 + $0xd0] sm:$0xff]  ;;  %v5516_v58 = vld [vmem:[%s9121_s21 + $0x1c0] sm:$0xff] }
0x1043   :  { %6284 = vmatprep.subr.mxu0 %v5489_v62  ;;  %5378 = vmatpush1.bf16.msra.mxu1 %v7602_v39  ;;  %v5500_v39 = vld [vmem:[%s9121_s21 + $0x140] sm:$0xff]  ;;  %v5515_v62 = vld [vmem:[%s9121_s21 + $0x1b8] sm:$0xff]  ;;  %v5498_v4 = vld [vmem:[%s9121_s21 + $0x130] sm:$0xff] }
0x1044   :  { %6285 = vmatpush3.msra.mxu0 %v5473_v56  ;;  %v5082_v6 = vpop.f32.mrf.mxu1  ;;  %5379 = vmatprep.subr.bf16.mxu1 %v7607_v22  ;;  %v5499_v56 = vld [vmem:[%s9121_s21 + $0x138] sm:$0xff]  ;;  %v5514_v22 = vld [vmem:[%s9121_s21 + $0x1b0] sm:$0xff] }
0x1045   :  { %6286 = vmatprep.subr.mxu0 %v5488_v0  ;;  %v5512_v6 = vld [vmem:[%s9121_s21 + $0x1a0] sm:$0xff] }
0x1046   :  { %6287 = vmatpush3.msra.mxu0 %v5472_v5  ;;  %v5513_v5 = vld [vmem:[%s9121_s21 + $0x1a8] sm:$0xff] }
0x1047   :  { %6288 = vmatprep.subr.mxu0 %v5487_v59  ;;  %5380 = vmatpush1.bf16.msra.mxu1 %v7605_v40  ;;  %v5497_v59 = vld [vmem:[%s9121_s21 + $0x128] sm:$0xff] }
0x1048   :  { %6289 = vmatpush3.msra.mxu0 %v5471_v14  ;;  %5381 = vmatprep.subr.bf16.mxu1 %v7610_v7  ;;  %v5496_v7 = vld [vmem:[%s9121_s21 + $0x120] sm:$0xff] }
0x1049   :  { %6290 = vmatprep.subr.mxu0 %v5486_v8  ;;  %v5511_v8 = vld [vmem:[%s9121_s21 + $0x198] sm:$0xff] }
0x104a   :  { %6291 = vmatpush3.msra.mxu0 %v5470_v61 }
0x104b   :  { %6292 = vmatprep.subr.mxu0 %v5485_v13  ;;  %5382 = vmatpush1.bf16.msra.mxu1 %v7608_v9  ;;  %v5495_v9 = vld [vmem:[%s9121_s21 + $0x118] sm:$0xff]  ;;  %v5510_v13 = vld [vmem:[%s9121_s21 + $0x190] sm:$0xff] }
0x104c   :  { %6293 = vmatpush3.msra.mxu0 %v5469_v60  ;;  %5383 = vmatprep.subr.bf16.mxu1 %v7613_v57  ;;  %v5494_v60 = vld [vmem:[%s9121_s21 + $0x110] sm:$0xff]  ;;  %v2674_v57 = vsub.s32 2, %v8055_v1 }
0x104d   :  { %6294 = vmatprep.subr.mxu0 %v5484_v20  ;;  %v5509_v20 = vld [vmem:[%s9121_s21 + $0x188] sm:$0xff] }
0x104e   :  { %6295 = vmatpush3.msra.mxu0 %v5468_v23  ;;  %v5493_v23 = vld [vmem:[%s9121_s21 + $0x108] sm:$0xff] }
0x104f   :  { %6296 = vmatprep.subr.mxu0 %v5483_v26  ;;  %5384 = vmatpush1.bf16.msra.mxu1 %v7611_v24  ;;  %v2678_v24 = vsub.s32 3, %v8055_v1  ;;  %v5508_v26 = vld [vmem:[%s9121_s21 + $0x180] sm:$0xff] }
0x1050   :  { %6297 = vmatpush3.msra.mxu0 %v5467_v27  ;;  %5385 = vmatprep.subr.bf16.mxu1 %v7616_v16  ;;  %v5492_v27 = vld [vmem:[%s9121_s21 + $0x100] sm:$0xff]  ;;  %v8986_v16 = vld [vmem:[#allocation15] sm:$0x3f] }
0x1051   :  { %6298 = vmatprep.subr.mxu0 %v5482_v33  ;;  %v2675_v33 = vrot.slane %v8986_v16, %v2674_v57  ;;  %v2679_v29 = vrot.slane %v8986_v16, %v2678_v24  ;;  %v5544_v57 = vld [vmem:[%s9121_s21 + $0x2a0] sm:$0xff]  ;;  %v5527_v24 = vld [vmem:[%s9121_s21 + $0x218] sm:$0xff] }
0x1052   :  { %6299 = vmatpush3.msra.mxu0 %v5466_v30 }
0x1053   :  { %6300 = vmatprep.subr.mxu0 %v5481_v32  ;;  %5386 = vmatpush1.bf16.msra.mxu1 %v7614_v34  ;;  %v5037_v30 = vadd.f32 %v8774_v28, %v2675_v33  ;;  %v5039_v34 = vadd.f32 %v8776_v31, %v2679_v29  ;;  %v5555_v31 = vld [vmem:[%s9121_s21 + $0x2f8] sm:$0xff]  ;;  %v5541_v33 = vld [vmem:[%s9121_s21 + $0x288] sm:$0xff] }
0x1054   :  { %6301 = vmatpush3.msra.mxu0 %v5465_v25  ;;  %6315 = vmatprep.subr.mxu1 %v5523_v46  ;;  %v5525_v29 = vld [vmem:[%s9121_s21 + $0x208] sm:$0xff] }
0x1055   :  { %6302 = vmatprep.subr.mxu0 %v5480_v12  ;;  %v5078_v32 = vadd.f32 %v8790_v53, %v5037_v30  ;;  %v5080_v25 = vadd.f32 %v8800_v63, %v5039_v34  ;;  %v5540_v30 = vld [vmem:[%s9121_s21 + $0x280] sm:$0xff] }
0x1056   :  { %6303 = vmatpush3.msra.mxu0 %v5464_v17  ;;  %6261 = vmatmul.mubr.msk.bf16.vlgmr.msra.gmra.mxu1 %vm9158_vm11, %v8715_v44  ;;  %v5461_v44 = vld [vmem:[%s9121_s21 + $0x8] sm:$0xff]  ;;  %v5524_v34 = vld [vmem:[%s9121_s21 + $0x200] sm:$0xff] }
0x1057   :  { %6304 = vmatprep.subr.mxu0 %v5479_v11  ;;  %6316 = vmatpush3.msra.mxu1 %v5507_v18 }
0x1058   :  { %6305 = vmatpush3.msra.mxu0 %v5463_v2  ;;  %6317 = vmatprep.subr.mxu1 %v5522_v54 }
0x1059   :  { %6306 = vmatprep.subr.mxu0 %v5478_v36  ;;  %6318 = vmatpush3.msra.mxu1 %v5506_v43 }
0x105a   :  { %6307 = vmatpush3.msra.mxu0 %v5462_v3  ;;  %6319 = vmatprep.subr.mxu1 %v5521_v35 }
0x105b   :  { %6308 = vmatprep.subr.mxu0 %v5477_v42  ;;  %6320 = vmatpush3.msra.mxu1 %v5505_v41 }
0x105c   :  { %6309 = vmatpush3.msra.mxu0 %v5461_v44  ;;  %6321 = vmatprep.subr.mxu1 %v5520_v37  ;;  %v5539_v37 = vld [vmem:[%s9121_s21 + $0x278] sm:$0xff] }
0x105d   :  { %6310 = vmatprep.subr.mxu0 %v5476_v19  ;;  %6322 = vmatpush3.msra.mxu1 %v5504_v38 }
0x105e   :  { %6311 = vmatpush3.msra.mxu0 %v5460_v45  ;;  %6323 = vmatprep.subr.mxu1 %v5519_v47  ;;  %v5554_v47 = vld [vmem:[%s9121_s21 + $0x2f0] sm:$0xff] }
0x105f   :  { %5628 = vmatmul.mubr.f32.vlgmr.msra.gmra.mxu0 %v5454_v48  ;;  %6324 = vmatpush3.msra.mxu1 %v5503_v49  ;;  %v5538_v48 = vld [vmem:[%s9121_s21 + $0x270] sm:$0xff] }
0x1060   :  { %6325 = vmatprep.subr.mxu1 %v5518_v50  ;;  %6350 = vmatprep.subr.mxu0 %v5555_v31  ;;  %v5553_v50 = vld [vmem:[%s9121_s21 + $0x2e8] sm:$0xff] }
0x1061   :  { %6326 = vmatpush3.msra.mxu1 %v5502_v51  ;;  %6351 = vmatpush3.msra.mxu0 %v5539_v37 }
0x1062   :  { %6327 = vmatprep.subr.mxu1 %v5517_v52  ;;  %6352 = vmatprep.subr.mxu0 %v5554_v47  ;;  %v5537_v52 = vld [vmem:[%s9121_s21 + $0x268] sm:$0xff] }
0x1063   :  { %6328 = vmatpush3.msra.mxu1 %v5501_v55  ;;  %6353 = vmatpush3.msra.mxu0 %v5538_v48 }
0x1064   :  { %6329 = vmatprep.subr.mxu1 %v5516_v58  ;;  %6354 = vmatprep.subr.mxu0 %v5553_v50  ;;  %v5552_v58 = vld [vmem:[%s9121_s21 + $0x2e0] sm:$0xff] }
0x1065   :  { %6330 = vmatpush3.msra.mxu1 %v5500_v39  ;;  %6355 = vmatpush3.msra.mxu0 %v5537_v52 }
0x1066   :  { %6331 = vmatprep.subr.mxu1 %v5515_v62  ;;  %6356 = vmatprep.subr.mxu0 %v5552_v58  ;;  %v5536_v62 = vld [vmem:[%s9121_s21 + $0x260] sm:$0xff] }
0x1067   :  { %v5118_v0 = vpop.f32.mrf.mxu0  ;;  %6332 = vmatpush3.msra.mxu1 %v5499_v56  ;;  %6357 = vmatpush3.msra.mxu0 %v5536_v62 }
0x1068   :  { %6333 = vmatprep.subr.mxu1 %v5514_v22  ;;  %v5119_v10 = vadd.f32 %v5118_v0, %v5078_v32  ;;  %v5551_v22 = vld [vmem:[%s9121_s21 + $0x2d8] sm:$0xff]  ;;  %v2682_v32 = vsub.s32 4, %v8055_v1 }
0x1069   :  { %v5120_v40 = vpop.f32.mrf.mxu0  ;;  %6334 = vmatpush3.msra.mxu1 %v5498_v4  ;;  %6358 = vmatprep.subr.mxu0 %v5551_v22  ;;  %v5535_v0 = vld [vmem:[%s9121_s21 + $0x258] sm:$0xff]  ;;  %v5550_v4 = vld [vmem:[%s9121_s21 + $0x2d0] sm:$0xff] }
0x106a   :  { %6335 = vmatprep.subr.mxu1 %v5513_v5  ;;  %v5121_v17 = vadd.f32 %v5120_v40, %v5080_v25  ;;  %6359 = vmatpush3.msra.mxu0 %v5535_v0  ;;  %v5534_v5 = vld [vmem:[%s9121_s21 + $0x250] sm:$0xff]  ;;  %v5549_v40 = vld [vmem:[%s9121_s21 + $0x2c8] sm:$0xff]  ;;  %v2686_v25 = vsub.s32 5, %v8055_v1 }
0x106b   :  { %v5122_v14 = vpop.f32.mrf.mxu0  ;;  %6336 = vmatpush3.msra.mxu1 %v5497_v59  ;;  %6360 = vmatprep.subr.mxu0 %v5550_v4  ;;  %v5533_v59 = vld [vmem:[%s9121_s21 + $0x248] sm:$0xff] }
0x106c   :  { %6337 = vmatprep.subr.mxu1 %v5512_v6  ;;  %6361 = vmatpush3.msra.mxu0 %v5534_v5  ;;  %v5548_v6 = vld [vmem:[%s9121_s21 + $0x2c0] sm:$0xff] }
0x106d   :  { %v5123_v61 = vpop.f32.mrf.mxu0  ;;  %6338 = vmatpush3.msra.mxu1 %v5496_v7  ;;  %6362 = vmatprep.subr.mxu0 %v5549_v40  ;;  %v5532_v14 = vld [vmem:[%s9121_s21 + $0x240] sm:$0xff]  ;;  %v5547_v7 = vld [vmem:[%s9121_s21 + $0x2b8] sm:$0xff] }
0x106e   :  { %6339 = vmatprep.subr.mxu1 %v5511_v8  ;;  %6363 = vmatpush3.msra.mxu0 %v5533_v59  ;;  %v5531_v8 = vld [vmem:[%s9121_s21 + $0x238] sm:$0xff]  ;;  %v5546_v61 = vld [vmem:[%s9121_s21 + $0x2b0] sm:$0xff] }
0x106f   :  { %6340 = vmatpush3.msra.mxu1 %v5495_v9  ;;  %6364 = vmatprep.subr.mxu0 %v5548_v6  ;;  %v5530_v9 = vld [vmem:[%s9121_s21 + $0x230] sm:$0xff] }
0x1070   :  { %6341 = vmatprep.subr.mxu1 %v5510_v13  ;;  %6365 = vmatpush3.msra.mxu0 %v5532_v14  ;;  %v5545_v13 = vld [vmem:[%s9121_s21 + $0x2a8] sm:$0xff] }
0x1071   :  { %6342 = vmatpush3.msra.mxu1 %v5494_v60  ;;  %6366 = vmatprep.subr.mxu0 %v5547_v7  ;;  %v5529_v60 = vld [vmem:[%s9121_s21 + $0x228] sm:$0xff] }
0x1072   :  { %6343 = vmatprep.subr.mxu1 %v5509_v20  ;;  %6367 = vmatpush3.msra.mxu0 %v5531_v8  ;;  %v5528_v20 = vld [vmem:[%s9121_s21 + $0x220] sm:$0xff] }
0x1073   :  { %6344 = vmatpush3.msra.mxu1 %v5493_v23  ;;  %6368 = vmatprep.subr.mxu0 %v5546_v61  ;;  %v5543_v23 = vld [vmem:[%s9121_s21 + $0x298] sm:$0xff] }
0x1074   :  { %6345 = vmatprep.subr.mxu1 %v5508_v26  ;;  %6369 = vmatpush3.msra.mxu0 %v5530_v9  ;;  %v5542_v26 = vld [vmem:[%s9121_s21 + $0x290] sm:$0xff] }
0x1075   :  { %6346 = vmatpush3.msra.mxu1 %v5492_v27  ;;  %6370 = vmatprep.subr.mxu0 %v5545_v13  ;;  %v5526_v27 = vld [vmem:[%s9121_s21 + $0x210] sm:$0xff]  ;;  %s7893_s21 = smov [#allocation18]  }
0x1076   :  { %6371 = vmatpush3.msra.mxu0 %v5529_v60  ;;  %v6268_v60 = vld [vmem:[#allocation16] ss:$0 sm:$0xff]  ;;  %s5792_s3 = sshll.u32 %s7893_s21, 4  ;;  %s5793_s3 = int_to_ptr.vmem [resolvable:$true] %s5792_s3 }
0x1077   :  { %6372 = vmatprep.subr.mxu0 %v5544_v57  ;;  %s7814_s14 = scalar_lea.vmem %s5793_s3, 32  ;;  %p7819_p4 = scmp.lt.s32.totalorder %s5793_s3, %s5793_s3 }
0x1078   :  { %6373 = vmatpush3.msra.mxu0 %v5528_v20  ;;  %p7815_p3 = scmp.ne.s32.totalorder %s5793_s3, %s7814_s14  ;;  %p7820_p5 = scmp.lt.s32.totalorder %s7814_s14, %s7814_s14 }
0x1079   :  { %6374 = vmatprep.subr.mxu0 %v5543_v23 }
0x107a   :  { %6375 = vmatpush3.msra.mxu0 %v5527_v24  ;;  %p7821_p6 = por %p7820_p5, %p7819_p4 }
0x107b   :  { %6376 = vmatprep.subr.mxu0 %v5542_v26 }
0x107c   :  { %6377 = vmatpush3.msra.mxu0 %v5526_v27  ;;  %p7822_p7 = pnand %p7821_p6, %p7815_p3 }
0x107d   :  { %6378 = vmatprep.subr.mxu0 %v5541_v33 }
0x107e   :  { %v5159_v12 = vpop.f32.mrf.mxu1  ;;  %6379 = vmatpush3.msra.mxu0 %v5525_v29 }
0x107f   :  { %v5200_v46 = vpop.f32.mrf.mxu0  ;;  %v5160_v11 = vadd.f32 %v5159_v12, %v5119_v10  ;;  %6380 = vmatprep.subr.mxu0 %v5540_v30  ;;  %v2683_v10 = vrot.slane %v8986_v16, %v2682_v32  ;;  %v2687_v12 = vrot.slane %v8986_v16, %v2686_v25 }
0x1080   :  { %v5161_v2 = vpop.f32.mrf.mxu1  ;;  %6381 = vmatpush3.msra.mxu0 %v5524_v34 }
0x1081   :  { %v5202_v18 = vpop.f32.mrf.mxu0  ;;  %v5162_v15 = vadd.f32 %v5161_v2, %v5121_v17  ;;  %v5201_v36 = vadd.f32 %v5200_v46, %v5160_v11 }
0x1082   :  { %v5163_v54 = vpop.f32.mrf.mxu1 }
0x1083   :  { %v5204_v3 = vpop.f32.mrf.mxu0  ;;  %v5420_v43 = vmin.f32 %v5201_v36, 0.0  ;;  %v5203_v42 = vadd.f32 %v5202_v18, %v5162_v15  ;;  %vm5414_vm13 = vcmp.gt.f32.partialorder %v5201_v36, 0.0 }
0x1084   :  { %v5164_v28 = vpop.f32.mrf.mxu1 }
0x1085   :  { %v5205_v35 = vpop.f32.mrf.mxu0  ;;  %v5428_v53 = vmul.f32 1.442695, %v5420_v43  ;;  %v5421_v63 = vmin.f32 %v5203_v42, 0.0  ;;  %vm5415_vm15 = vcmp.gt.f32.partialorder %v5203_v42, 0.0 }
0x1087   :  { %7621 = vpow2.f32 %v5428_v53  ;;  %v5430_v44 = vmul.f32 1.442695, %v5421_v63 }
0x1089   :  { %7623 = vpow2.f32 %v5430_v44 }
0x1094   :  { %v7622_v41 = vpop.eup %7621 }
0x1095   :  { %v6264_v21 = vadd.f32 -1.0, %v7622_v41 }
0x1096   :  { %v7624_v19 = vpop.eup %7623 }
0x1097   :  { %v5444_v45 = vmul.f32 1.6732632, %v6264_v21  ;;  %v6265_v38 = vadd.f32 -1.0, %v7624_v19 }
0x1099   :  { %v5445_v49 = vmul.f32 1.6732632, %v6265_v38  ;;  %v5450_v51 = vsel %vm5414_vm13, %v5201_v36, %v5444_v45 }
0x109a   :  { %v5456_v56 = vmul.f32 1.050701, %v5450_v51 }
0x109b   :  { %v5451_v55 = vsel %vm5415_vm15, %v5203_v42, %v5445_v49 }
0x109c   :  { %v5457_v39 = vmul.f32 1.050701, %v5451_v55 }
0x109e   :  { %5697 = vmatprep.mubr.f32.mxu1 %v5457_v39 }
0x109f   :  { %5698 = vmatmul.mubr.f32.vlgmr.msra.gmra.mxu1 %v5456_v56 }
0x10be   :  { %v5241_v46 = vpop.f32.mrf.mxu1 }
0x10bf   :  { %v5282_v17 = vpop.f32.mrf.mxu0  ;;  %v5242_v11 = vadd.f32 %v5241_v46, %v2683_v10 }
0x10c0   :  { %v5243_v2 = vpop.f32.mrf.mxu1 }
0x10c1   :  { %v5284_v18 = vpop.f32.mrf.mxu0  ;;  %v5244_v15 = vadd.f32 %v5243_v2, %v2687_v12  ;;  %v5283_v36 = vadd.f32 %v5282_v17, %v5242_v11 }
0x10c2   :  { %v5245_v54 = vpop.f32.mrf.mxu1 }
0x10c3   :  { %v5286_v3 = vpop.f32.mrf.mxu0  ;;  %v5285_v43 = vadd.f32 %v5284_v18, %v5244_v15 }
0x10c4   :  { %v5246_v42 = vpop.f32.mrf.mxu1 }
0x10c5   :  { %v5287_v28 = vpop.f32.mrf.mxu0 }
0x10fe   :  { %v5323_v35 = vpop.f32.mrf.mxu1 }
0x10ff   :  { %v5364_v31 = vpop.f32.mrf.mxu0  ;;  %v5324_v21 = vadd.f32 %v5323_v35, %v5283_v36 }
0x1100   :  { %v5325_v53 = vpop.f32.mrf.mxu1 }
0x1101   :  { %v5366_v1 = vpop.f32.mrf.mxu0  ;;  %v5326_v19 = vadd.f32 %v5325_v53, %v5285_v43  ;;  %v5365_v37 = vadd.f32 %v5364_v31, %v5324_v21 }
0x1102   :  { %v5327_v63 = vpop.f32.mrf.mxu1 }
0x1103   :  { %v5368_v44 = vpop.f32.mrf.mxu0  ;;  %v5367_v38 = vadd.f32 %v5366_v1, %v5326_v19 }
0x1104   :  { %v5328_v41 = vpop.f32.mrf.mxu1 }
0x1105   :  { %v5369_v16 = vpop.f32.mrf.mxu0 }
0x1116   :  { %v5405_v45 = vpop.f32.mrf.mxu1 }
0x1117   :  { %v5406_v47 = vadd.f32 %v5405_v45, %v5365_v37 }
0x1118   :  { %v5407_v48 = vpop.f32.mrf.mxu1 }
0x1119   :  { %v5422_v49 = vmin.f32 %v5406_v47, 0.0  ;;  %v5408_v50 = vadd.f32 %v5407_v48, %v5367_v38  ;;  %vm5416_vm0 = vcmp.gt.f32.partialorder %v5406_v47, 0.0 }
0x111a   :  { %v5409_v51 = vpop.f32.mrf.mxu1 }
0x111b   :  { %v5432_v52 = vmul.f32 1.442695, %v5422_v49  ;;  %v5423_v55 = vmin.f32 %v5408_v50, 0.0  ;;  %vm5417_vm2 = vcmp.gt.f32.partialorder %v5408_v50, 0.0 }
0x111c   :  { %v5410_v58 = vpop.f32.mrf.mxu1 }
0x111d   :  { %7625 = vpow2.f32 %v5432_v52  ;;  %v5434_v39 = vmul.f32 1.442695, %v5423_v55 }
0x111f   :  { %7627 = vpow2.f32 %v5434_v39  ;;  %v6312_v7 = vpop.f32.mrf.mxu0 }
0x1121   :  { %v6313_v61 = vpop.f32.mrf.mxu0 }
0x1122   :  { %v6314_v13 = vadd.f32 %v6313_v61, %v6312_v7 }
0x1124   :  { %v5630_v23 = vadd.f32 %v6314_v13, %v6268_v60 }
0x112a   :  { %v7626_v62 = vpop.eup %7625 }
0x112b   :  { %v6266_v56 = vadd.f32 -1.0, %v7626_v62 }
0x112c   :  { %v7628_v22 = vpop.eup %7627 }
0x112d   :  { %v5446_v0 = vmul.f32 1.6732632, %v6266_v56  ;;  %v6267_v4 = vadd.f32 -1.0, %v7628_v22 }
0x112f   :  { %v5447_v5 = vmul.f32 1.6732632, %v6267_v4  ;;  %v5452_v40 = vsel %vm5416_vm0, %v5406_v47, %v5446_v0 }
0x1130   :  { %v5458_v14 = vmul.f32 1.050701, %v5452_v40 }
0x1131   :  { %v5453_v59 = vsel %vm5417_vm2, %v5408_v50, %v5447_v5 }
0x1132   :  { %v5459_v6 = vmul.f32 1.050701, %v5453_v59 }
0x1134   :  { %5767 = vmatprep.mubr.f32.mxu0 %v5459_v6 }
0x1135   :  { %5768 = vmatmul.mubr.f32.vlgmr.msra.gmra.mxu0 %v5458_v14 }
0x115f   :  { %v6347_v8 = vpop.f32.mrf.mxu1 }
0x1161   :  { %v6348_v9 = vpop.f32.mrf.mxu1 }
0x1162   :  { %v6349_v57 = vadd.f32 %v6348_v9, %v6347_v8 }
0x1164   :  { %v5700_v26 = vadd.f32 %v6349_v57, %v5630_v23 }
0x11f5   :  { %v6382_v20 = vpop.f32.mrf.mxu0 }
0x11f7   :  { %v6383_v24 = vpop.f32.mrf.mxu0 }
0x11f8   :  { %v6384_v27 = vadd.f32 %v6383_v24, %v6382_v20 }
0x11fa   :  { %v5770_v33 = vadd.f32 %v6384_v27, %v5700_v26 }
0x11fc   :  { %v5774_v29 = vsel %vm5773_vm1, %v5770_v33, -inf }
0x11fd   :  { %5775 = vmax.xlane.f32.xlu0 %v5774_v29 }
0x1286   :  { %v5776_v30 = vpop.xlane.xlu0 %5775 }
0x1287   :  { %v5777_v34 = vsub.f32 %v5770_v33, %v5776_v30 }
0x1289   :  { %v5778_v32 = vmul.f32 1.442695, %v5777_v34 }
0x128b   :  { %7629 = vpow2.f32 %v5778_v32 }
0x1298   :  { %v7630_v25 = vpop.eup %7629 }
0x1299   :  { %v5780_v10 = vsel %vm5773_vm1, %v7630_v25, 0.0 }
0x129a   :  { %5781 = vadd.xlane.f32.xlu0 %v5780_v10 }
0x1323   :  { %v5782_v12 = vpop.xlane.xlu0 %5781 }
0x1324   :  { %7631 = vrcp.f32 %v5782_v12 }
0x1331   :  { %v7632_v46 = vpop.eup %7631 }
0x1332   :  { %v5784_v17 = vmul.f32 %v7632_v46, %v7630_v25 }
0x1334   :  { %5785 = vst.msk [vmem:[#allocation18] sm:$0x3] %vm5773_vm1, %v5784_v17 }
0x1335   :  { %7825 = shalt.err (!%p7822_p7)
}
0x1336   :  { %5795 = dma.vmem_to_hbm [thread:$0]  %s5793_s3, 32, %s9124_s24, [#allocation6]  }
0x1337   :  { %7846 = dma.done.wait [#allocation6], 32  }
0x1338   :  { %7847 = vsyncadd [#allocation6], 4294967264 }
0x1339   :  { %5799 = vsyncpa [#allocation5], 1 }
0x133a   :  { %5800 = vsyncpa [#allocation8], 1 }
0x133b   :  { %5801 = vsyncpa [#allocation11], 1 }
0x133c   :  { %5802 = vsyncpa [#allocation14], 1 }
0x133d   :  { %5803 = vsyncpa [#allocation17], 1 }
0x133e   :  { %5804 = vsyncpa [#allocation6], 1 }
0x133f   :  { %5805 = vsyncmov [#allocation3] }
0x1342   :  { %s5806_s30 = vpop.sfrf %5805 }
0x1343   :  { %p6269_p8 = scmp.ne.s32.totalorder %s5806_s30, 0 }
0x1345   :  { %5810 = shalt.err (%p6269_p8)  }

</bundles_post_ra>
